<compile_context>
chip_gen: v7x
topology: tpu7x:2x2x1
jax: 0.10.0
libtpu: 0.0.40
codegen_flags: <defaults>
</compile_context>

<pallas_src>
import math
import jax
import jax.numpy as jnp
from jax.experimental import pallas as pl
from jax.experimental.pallas import tpu as pltpu

IN_DIM = 7 * 7 * 64 + 8 * 8 * 64  # 3136 + 4096 = 7232


def _cdiv(a, b):
    return -(-a // b)


def _round_up(n, m):
    return _cdiv(n, m) * m


def _pad2(a, target_shape):
    pads = [(0, t - s) for s, t in zip(a.shape, target_shape)]
    if all(p == (0, 0) for p in pads):
        return a
    return jnp.pad(a, pads)


def _vmem_cap_bytes():
    """Per-TensorCore VMEM budget: ~3/4 of physical (96 MiB on 128 MiB v5e/v6e,
    48 MiB on v7x's 64 MiB).  Conservative 48 MiB fallback if the query fails."""
    try:
        info = pltpu.get_tpu_info()
        phys = getattr(info, "vmem_capacity_bytes", None)
        if phys:
            return min(int(phys) * 3 // 4, 96 << 20)
    except Exception:
        pass
    return 48 << 20


# ---------------------------------------------------------------------------
# Kernel
# ---------------------------------------------------------------------------
def _classifier_kernel(x_ref, w1_ref, b1_ref, w2_ref, b2_ref, o_ref):
    x = x_ref[...]
    if x.dtype != w1_ref.dtype:          # resolved at trace time; normally a no-op
        x = x.astype(w1_ref.dtype)
    # Linear 1 on the MXU with f32 accumulation; bias + ReLU ride the VPU slot.
    h = jnp.dot(x, w1_ref[...], preferred_element_type=jnp.float32)
    h = jnp.maximum(h + b1_ref[...], 0.0)
    # Dropout: identity (eval mode).
    # TODO(synk): training-mode dropout via pltpu.prng_seed / prng_random_bits.
    y = jnp.dot(h.astype(w2_ref.dtype), w2_ref[...],
                preferred_element_type=jnp.float32)
    o_ref[...] = (y + b2_ref[...]).astype(o_ref.dtype)


# ---------------------------------------------------------------------------
# One-time parameter preparation (hoisted out of the per-call forward path)
# ---------------------------------------------------------------------------
def prepare_params(w1, b1, w2, b2, *, param_dtype=None):
    """Pad/cast the weights ONCE.

    w1: (K, H), b1: (H,)/(1,H), w2: (H, C), b2: (C,)/(1,C)   [in, out] layout.
    K (=7232) stays unpadded (already a multiple of 8 sublanes; the kernel uses
    full-array K blocks).  H/C are zero-padded to lane multiples of 128 (math
    unchanged).  Biases stay f32 — the kernel adds them in f32 regardless of
    the streaming dtype of the weights.
    """
    K, H = w1.shape
    H2, C = w2.shape
    assert H2 == H
    if param_dtype is not None:
        w1 = w1.astype(param_dtype)
        w2 = w2.astype(param_dtype)
    H_pad = _round_up(H, 128)
    C_pad = _round_up(C, 128)
    w1_p = _pad2(w1, (K, H_pad))
    w2_p = _pad2(w2, (H_pad, C_pad))
    b1_p = _pad2(b1.reshape(1, H).astype(jnp.float32), (1, H_pad))
    b2_p = _pad2(b2.reshape(1, C).astype(jnp.float32), (1, C_pad))
    return (w1_p, b1_p, w2_p, b2_p, C)


# ---------------------------------------------------------------------------
# Forward
# ---------------------------------------------------------------------------
def classifier_forward(x, params, *, batch_tile=None, out_dtype=jnp.float32):
    """x: (B, 7232) in its producer dtype (f32 or bf16).  params: prepare_params(...)."""
    w1_p, b1_p, w2_p, b2_p, num_class = params
    B, K = x.shape
    assert w1_p.shape[0] == K, "x feature dim must match prepared W1"
    H_pad = w1_p.shape[1]
    C_pad = w2_p.shape[1]

    x_isz = jnp.dtype(x.dtype).itemsize
    w_isz = jnp.dtype(w1_p.dtype).itemsize
    o_isz = jnp.dtype(out_dtype).itemsize

    cap = _vmem_cap_bytes()
    if batch_tile is None:
        big_vmem = cap >= (80 << 20)             # 128 MiB chips (v5e/v6e) vs v7x
        if x_isz >= 4:
            batch_tile = 512 if big_vmem else 256
        else:                                    # bf16 / int8 streaming
            batch_tile = 1024 if big_vmem else 512

    # Sub-32-bit dtypes pack along sublanes: bf16 tiles want 16-row multiples.
    sublane = max(8, 32 // x_isz)

    # --- batch tiling plan ----------------------------------------------------
    if B <= batch_tile:
        TB = _round_up(B, sublane)
        n_tiles = 1
    else:
        # Balance the ragged last tile instead of padding a full extra tile.
        n_tiles = _cdiv(B, batch_tile)
        TB = _round_up(_cdiv(B, n_tiles), sublane)
        n_tiles = _cdiv(B, TB)

    # Footprint: Pallas double-buffers every input (including the constant-index
    # resident weights), so count them 2x.  Shrink TB if over the VMEM budget.
    def _footprint(tb):
        return (2 * (K * H_pad + H_pad * C_pad) * w_isz     # W1, W2 (x2 buffers)
                + 2 * (H_pad + C_pad) * 4                   # biases (f32, x2)
                + 2 * tb * (K * x_isz + C_pad * o_isz)      # streamed x / out tiles
                + tb * H_pad * 4)                           # h intermediate (f32)

    while TB > sublane and _footprint(TB) > int(cap * 0.8):
        TB = max(sublane, _round_up(TB // 2, sublane))
        n_tiles = _cdiv(B, TB)

    # Give v7x's two TensorCores >=2 parallel batch tiles when it costs no padding.
    if n_tiles == 1 and B >= 4 * sublane and B % (2 * sublane) == 0:
        TB = B // 2
        n_tiles = 2

    B_pad = TB * n_tiles
    x_p = _pad2(x, (B_pad, K))          # rows only; K stays unpadded, no cast

    vmem_limit = min(int(_footprint(TB) * 1.5) + (2 << 20), cap)

    cost = pl.CostEstimate(
        flops=2 * B_pad * K * H_pad + 2 * B_pad * H_pad * C_pad,
        transcendentals=0,
        bytes_accessed=(B_pad * K * x_isz
                        + (K * H_pad + H_pad * C_pad) * w_isz
                        + (H_pad + C_pad) * 4
                        + B_pad * C_pad * o_isz),
    )

    out_p = pl.pallas_call(
        _classifier_kernel,
        out_shape=jax.ShapeDtypeStruct((B_pad, C_pad), out_dtype),
        grid=(n_tiles,),
        in_specs=[
            pl.BlockSpec((TB, K), lambda i: (i, 0)),         # x streams per step
            pl.BlockSpec((K, H_pad), lambda i: (0, 0)),      # W1 resident
            pl.BlockSpec((1, H_pad), lambda i: (0, 0)),      # b1 resident
            pl.BlockSpec((H_pad, C_pad), lambda i: (0, 0)),  # W2 resident
            pl.BlockSpec((1, C_pad), lambda i: (0, 0)),      # b2 resident
        ],
        out_specs=pl.BlockSpec((TB, C_pad), lambda i: (i, 0)),
        compiler_params=pltpu.CompilerParams(
            dimension_semantics=("parallel",),
            vmem_limit_bytes=vmem_limit,
        ),
        cost_estimate=cost,
    )(x_p, w1_p, b1_p, w2_p, b2_p)

    return out_p[:B, :num_class]


# ---------------------------------------------------------------------------
# Deterministic init matching the PyTorch module
# ---------------------------------------------------------------------------
def init_params(key, in_dim, hidden_dim, num_class, dtype=jnp.float32):
    """fc.weight: xavier_uniform_; fc.bias: default nn.Linear U(-1/sqrt(fan_in), ...).
    Weights returned transposed to (in, out) for the kernel layout."""
    k1, k2, k3, k4 = jax.random.split(key, 4)

    bound1 = math.sqrt(6.0 / (in_dim + hidden_dim))
    w1 = jax.random.uniform(k1, (in_dim, hidden_dim), dtype, -bound1, bound1)
    bb1 = 1.0 / math.sqrt(in_dim)
    b1 = jax.random.uniform(k2, (1, hidden_dim), dtype, -bb1, bb1)

    bound2 = math.sqrt(6.0 / (hidden_dim + num_class))
    w2 = jax.random.uniform(k3, (hidden_dim, num_class), dtype, -bound2, bound2)
    bb2 = 1.0 / math.sqrt(hidden_dim)
    b2 = jax.random.uniform(k4, (1, num_class), dtype, -bb2, bb2)

    return w1, b1, w2, b2


if __name__ == "__main__":
    batch = 2
    hidden_dim = 128
    num_class = 10

    key = jax.random.PRNGKey(0)
    kx, kp = jax.random.split(key)

    x = jax.random.normal(kx, (batch, IN_DIM), dtype=jnp.float32)
    w1, b1, w2, b2 = init_params(kp, IN_DIM, hidden_dim, num_class)

    # ---- f32 path (tight tolerance) ----------------------------------------
    params_f32 = prepare_params(w1, b1, w2, b2)
    out = jax.block_until_ready(classifier_forward(x, params_f32))
    ref = jnp.maximum(x @ w1 + b1, 0.0) @ w2 + b2
    assert out.shape == (batch, num_class)
    assert jnp.allclose(out, ref, atol=1e-4, rtol=1e-4)

    # ---- bf16-streaming path (producer emits bf16 x; params cast once) -----
    params_bf16 = prepare_params(w1, b1, w2, b2, param_dtype=jnp.bfloat16)
    x_bf16 = x.astype(jnp.bfloat16)
    out_bf = jax.block_until_ready(classifier_forward(x_bf16, params_bf16))
    h_ref = jnp.maximum(
        jnp.dot(x_bf16, w1.astype(jnp.bfloat16),
                preferred_element_type=jnp.float32) + b1, 0.0)
    ref_bf = jnp.dot(h_ref.astype(jnp.bfloat16), w2.astype(jnp.bfloat16),
                     preferred_element_type=jnp.float32) + b2
    assert out_bf.shape == (batch, num_class)
    assert jnp.allclose(out_bf, ref_bf, atol=2e-2, rtol=2e-2)

    print("KERNEL_OK")
</pallas_src>

<mosaic_0001>
module attributes {stable_mosaic.version = 11 : i64} {
  func.func @_classifier_kernel(%arg0: i32, %arg1: memref<8x7232xf32, #tpu.memory_space<vmem>>, %arg2: memref<7232x128xf32, #tpu.memory_space<vmem>>, %arg3: memref<1x128xf32, #tpu.memory_space<vmem>>, %arg4: memref<128x128xf32, #tpu.memory_space<vmem>>, %arg5: memref<1x128xf32, #tpu.memory_space<vmem>>, %arg6: memref<8x128xf32, #tpu.memory_space<vmem>>) attributes {dimension_semantics = [#tpu.dimension_semantics<parallel>], iteration_bounds = array<i64: 1>, scalar_prefetch = 0 : i64, scratch_operands = 0 : i64, tpu.core_type = #tpu.core_type<tc>, window_params = [{transform_indices = @transform_0, window_bounds = array<i64: 8, 7232>}, {pipeline_mode = #tpu.pipeline_mode<synchronous>, transform_indices = @transform_1, window_bounds = array<i64: 7232, 128>}, {pipeline_mode = #tpu.pipeline_mode<synchronous>, transform_indices = @transform_2, window_bounds = array<i64: 1, 128>}, {pipeline_mode = #tpu.pipeline_mode<synchronous>, transform_indices = @transform_3, window_bounds = array<i64: 128, 128>}, {pipeline_mode = #tpu.pipeline_mode<synchronous>, transform_indices = @transform_4, window_bounds = array<i64: 1, 128>}, {transform_indices = @transform_5, window_bounds = array<i64: 8, 128>}]} {
    %c0 = arith.constant 0 : index
    %c0_0 = arith.constant 0 : index
    %0 = vector.load %arg1[%c0, %c0_0] : memref<8x7232xf32, #tpu.memory_space<vmem>>, vector<8x7232xf32>
    %c0_1 = arith.constant 0 : index
    %c0_2 = arith.constant 0 : index
    %1 = vector.load %arg2[%c0_1, %c0_2] : memref<7232x128xf32, #tpu.memory_space<vmem>>, vector<7232x128xf32>
    %cst = arith.constant dense<0.000000e+00> : vector<8x128xf32>
    %2 = tpu.matmul %0, %1, %cst {dimension_numbers = #tpu.dot_dimension_numbers<[1], [0], [0], [1], [0, 0, 1, 1], [], []>} : vector<8x7232xf32>, vector<7232x128xf32>, vector<8x128xf32> -> vector<8x128xf32>
    %c0_3 = arith.constant 0 : index
    %c0_4 = arith.constant 0 : index
    %3 = vector.load %arg3[%c0_3, %c0_4] : memref<1x128xf32, #tpu.memory_space<vmem>>, vector<1x128xf32>
    %4 = vector.broadcast %3 : vector<1x128xf32> to vector<8x128xf32>
    %5 = arith.addf %2, %4 : vector<8x128xf32>
    %cst_5 = arith.constant 0.000000e+00 : f32
    %6 = vector.broadcast %cst_5 : f32 to vector<8x128xf32>
    %7 = arith.maximumf %5, %6 : vector<8x128xf32>
    %c0_6 = arith.constant 0 : index
    %c0_7 = arith.constant 0 : index
    %8 = vector.load %arg4[%c0_6, %c0_7] : memref<128x128xf32, #tpu.memory_space<vmem>>, vector<128x128xf32>
    %cst_8 = arith.constant dense<0.000000e+00> : vector<8x128xf32>
    %9 = tpu.matmul %7, %8, %cst_8 {dimension_numbers = #tpu.dot_dimension_numbers<[1], [0], [0], [1], [0, 0, 1, 1], [], []>} : vector<8x128xf32>, vector<128x128xf32>, vector<8x128xf32> -> vector<8x128xf32>
    %c0_9 = arith.constant 0 : index
    %c0_10 = arith.constant 0 : index
    %10 = vector.load %arg5[%c0_9, %c0_10] : memref<1x128xf32, #tpu.memory_space<vmem>>, vector<1x128xf32>
    %11 = vector.broadcast %10 : vector<1x128xf32> to vector<8x128xf32>
    %12 = arith.addf %9, %11 : vector<8x128xf32>
    %c0_11 = arith.constant 0 : index
    %c0_12 = arith.constant 0 : index
    %13 = vector.load %arg6[%c0_11, %c0_12] : memref<8x128xf32, #tpu.memory_space<vmem>>, vector<8x128xf32>
    tpu.vector_store %arg6[%c0_11, %c0_12], %12 {strides = array<i32>} : memref<8x128xf32, #tpu.memory_space<vmem>>, vector<8x128xf32>,
    return
  }
  func.func @transform_0(%arg0: i32) -> (i32, i32) {
    %c0_i32 = arith.constant 0 : i32
    %c0_i32_0 = arith.constant 0 : i32
    return %arg0, %c0_i32 : i32, i32
  }
  func.func @transform_1(%arg0: i32) -> (i32, i32) {
    %c0_i32 = arith.constant 0 : i32
    %c0_i32_0 = arith.constant 0 : i32
    %c0_i32_1 = arith.constant 0 : i32
    return %c0_i32, %c0_i32_0 : i32, i32
  }
  func.func @transform_2(%arg0: i32) -> (i32, i32) {
    %c0_i32 = arith.constant 0 : i32
    %c0_i32_0 = arith.constant 0 : i32
    %c0_i32_1 = arith.constant 0 : i32
    return %c0_i32, %c0_i32_0 : i32, i32
  }
  func.func @transform_3(%arg0: i32) -> (i32, i32) {
    %c0_i32 = arith.constant 0 : i32
    %c0_i32_0 = arith.constant 0 : i32
    %c0_i32_1 = arith.constant 0 : i32
    return %c0_i32, %c0_i32_0 : i32, i32
  }
  func.func @transform_4(%arg0: i32) -> (i32, i32) {
    %c0_i32 = arith.constant 0 : i32
    %c0_i32_0 = arith.constant 0 : i32
    %c0_i32_1 = arith.constant 0 : i32
    return %c0_i32, %c0_i32_0 : i32, i32
  }
  func.func @transform_5(%arg0: i32) -> (i32, i32) {
    %c0_i32 = arith.constant 0 : i32
    %c0_i32_0 = arith.constant 0 : i32
    return %arg0, %c0_i32 : i32, i32
  }
}

</mosaic_0001>

<bundles_post_ra>
// kernel: tpu_custom_call.1
= control target key start
LH: loop header
LB: loop body
LE: loop exit
PB: predicated region body
PF: predicated region fallthrough
CT: control target
= control target key end

     0   :  { %10 = vsyncpa [#allocation3], 0  ;;  %s5486_s0 = inlined_call_operand.hbm [shape: f32[8,7232], index: 0, kind: input, shape index: {}]   ;;  %s5487_s1 = inlined_call_operand.hbm [shape: f32[7232,128], index: 1, kind: input, shape index: {}]   ;;  %s5488_s2 = inlined_call_operand.hbm [shape: f32[1,128], index: 2, kind: input, shape index: {}]   ;;  %s5489_s3 = inlined_call_operand.hbm [shape: f32[128,128], index: 3, kind: input, shape index: {}]   ;;  %s5490_s4 = inlined_call_operand.hbm [shape: f32[1,128], index: 4, kind: input, shape index: {}]   ;;  %s5491_s5 = inlined_call_operand.hbm [shape: f32[8,128], index: 5, kind: output, shape index: {}]  }
   0x1   :  { %11 = vsyncpa [#allocation6], 0 }
   0x2   :  { %12 = vsyncpa [#allocation9], 0 }
   0x3   :  { %13 = vsyncpa [#allocation4], 0  ;;  %s5343_s18 = smov [#allocation5]   ;;  %s5203_s22 = scalar_lea.hbm %s5487_s1, 115712 }
   0x4   :  { %s29_s19 = sshll.u32 %s5343_s18, 4  ;;  %p5204_p0 = scmp.ne.s32.totalorder %s5487_s1, %s5203_s22  ;;  %s30_s19 = int_to_ptr.vmem [resolvable:$true] %s29_s19 }
   0x5   :  { %p5207_p1 = scmp.lt.u32.totalorder %s5203_s22, %s5487_s1 }
   0x7   :  { %p5209_p2 = pnand %p5207_p1, %p5204_p0 }
   0x9   :  { %5212 = shalt.err (!%p5209_p2)
}
   0xa   :  { %s5213_s27 = scalar_lea.vmem %s30_s19, 115712  ;;  %p5218_p4 = scmp.lt.s32.totalorder %s30_s19, %s30_s19 }
   0xb   :  { %p5214_p3 = scmp.ne.s32.totalorder %s30_s19, %s5213_s27  ;;  %p5219_p5 = scmp.lt.s32.totalorder %s5213_s27, %s5213_s27 }
   0xd   :  { %p5220_p6 = por %p5219_p5, %p5218_p4 }
   0xf   :  { %p5221_p7 = pnand %p5220_p6, %p5214_p3 }
  0x11   :  { %5224 = shalt.err (!%p5221_p7)
}
  0x12   :  { %s5344_s28 = smov 128   ;;  %s5345_s29 = smov 8  }
  0x13   :  { %35 = dma.hbm_to_vmem [thread:$0]  %s5487_s1, 115712, %s30_s19, [#allocation6], %s5344_s28, %s5344_s28, %s5345_s29  }
  0x14   :  { %s5346_s7 = smov [#allocation8]   ;;  %s5347_s9 = smov [#allocation2]  }
  0x15   :  { %s51_s8 = sshll.u32 %s5346_s7, 4  ;;  %s20_s10 = sshll.u32 %s5347_s9, 4  ;;  %s52_s8 = int_to_ptr.vmem [resolvable:$true] %s51_s8  ;;  %s21_s10 = int_to_ptr.vmem [resolvable:$true] %s20_s10 }
  0x16   :  { %s5225_s13 = scalar_lea.hbm %s5489_s3, 2048 }
  0x17   :  { %p5226_p8 = scmp.ne.s32.totalorder %s5489_s3, %s5225_s13  ;;  %p5229_p9 = scmp.lt.u32.totalorder %s5225_s13, %s5489_s3 }
  0x19   :  { %p5231_p10 = pnand %p5229_p9, %p5226_p8 }
  0x1b   :  { %5234 = shalt.err (!%p5231_p10)
}
  0x1c   :  { %s5235_s1 = scalar_lea.vmem %s52_s8, 2048  ;;  %p5240_p12 = scmp.lt.s32.totalorder %s52_s8, %s52_s8 }
  0x1d   :  { %p5236_p11 = scmp.ne.s32.totalorder %s52_s8, %s5235_s1  ;;  %p5241_p13 = scmp.lt.s32.totalorder %s5235_s1, %s5235_s1 }
  0x1f   :  { %p5242_p0 = por %p5241_p13, %p5240_p12 }
  0x21   :  { %p5243_p1 = pnand %p5242_p0, %p5236_p11 }
  0x23   :  { %5246 = shalt.err (!%p5243_p1)
}
  0x24   :  { %57 = dma.hbm_to_vmem [thread:$0]  %s5489_s3, 2048, %s52_s8, [#allocation9], %s5344_s28, %s5344_s28, %s5345_s29  }
  0x25   :  { %s5247_s22 = scalar_lea.hbm %s5486_s0, 7296 }
  0x26   :  { %p5248_p2 = scmp.ne.s32.totalorder %s5486_s0, %s5247_s22  ;;  %p5251_p3 = scmp.lt.u32.totalorder %s5247_s22, %s5486_s0 }
  0x28   :  { %p5253_p4 = pnand %p5251_p3, %p5248_p2 }
  0x2a   :  { %5256 = shalt.err (!%p5253_p4)
}
  0x2b   :  { %s5257_s27 = scalar_lea.vmem %s21_s10, 7296  ;;  %p5262_p6 = scmp.lt.s32.totalorder %s21_s10, %s21_s10 }
  0x2c   :  { %p5258_p5 = scmp.ne.s32.totalorder %s21_s10, %s5257_s27  ;;  %p5263_p7 = scmp.lt.s32.totalorder %s5257_s27, %s5257_s27 }
  0x2e   :  { %p5264_p8 = por %p5263_p7, %p5262_p6 }
  0x30   :  { %p5265_p9 = pnand %p5264_p8, %p5258_p5 }
  0x32   :  { %5268 = shalt.err (!%p5265_p9)
}
  0x33   :  { %23 = dma.hbm_to_vmem [thread:$0]  %s5486_s0, 7296, %s21_s10, [#allocation3]  }
  0x34   :  { %s5348_s29 = smov [#allocation7]   ;;  %s5349_s6 = smov [#allocation10]  }
  0x35   :  { %s42_s30 = sshll.u32 %s5348_s29, 4  ;;  %s64_s7 = sshll.u32 %s5349_s6, 4  ;;  %s43_s30 = int_to_ptr.vmem [resolvable:$true] %s42_s30  ;;  %s65_s7 = int_to_ptr.vmem [resolvable:$true] %s64_s7 }
  0x36   :  { %s5269_s11 = scalar_lea.hbm %s5488_s2, 16 }
  0x37   :  { %p5270_p10 = scmp.ne.s32.totalorder %s5488_s2, %s5269_s11  ;;  %p5273_p11 = scmp.lt.u32.totalorder %s5269_s11, %s5488_s2 }
  0x39   :  { %p5275_p12 = pnand %p5273_p11, %p5270_p10 }
  0x3b   :  { %5278 = shalt.err (!%p5275_p12)
}
  0x3c   :  { %s5279_s0 = scalar_lea.vmem %s43_s30, 16  ;;  %s5283_s10 = scalar_lea.vmem %s43_s30, 32 }
  0x3d   :  { %p5280_p13 = scmp.ne.s32.totalorder %s43_s30, %s5279_s0  ;;  %p5284_p0 = scmp.lt.s32.totalorder %s43_s30, %s43_s30 }
  0x3e   :  { %p5285_p1 = scmp.lt.s32.totalorder %s5283_s10, %s5279_s0 }
  0x40   :  { %p5286_p2 = por %p5285_p1, %p5284_p0 }
  0x42   :  { %p5287_p3 = pnand %p5286_p2, %p5280_p13 }
  0x44   :  { %5290 = shalt.err (!%p5287_p3)
}
  0x45   :  { %45 = dma.hbm_to_vmem [thread:$0]  %s5488_s2, 16, %s43_s30, [#allocation6]  }
  0x46   :  { %s5291_s19 = scalar_lea.hbm %s5490_s4, 16 }
  0x47   :  { %p5292_p4 = scmp.ne.s32.totalorder %s5490_s4, %s5291_s19  ;;  %p5295_p5 = scmp.lt.u32.totalorder %s5291_s19, %s5490_s4 }
  0x49   :  { %p5297_p6 = pnand %p5295_p5, %p5292_p4 }
  0x4b   :  { %5300 = shalt.err (!%p5297_p6)
}
  0x4c   :  { %s5301_s24 = scalar_lea.vmem %s65_s7, 16  ;;  %s5305_s25 = scalar_lea.vmem %s65_s7, 32 }
  0x4d   :  { %p5302_p7 = scmp.ne.s32.totalorder %s65_s7, %s5301_s24  ;;  %p5306_p8 = scmp.lt.s32.totalorder %s65_s7, %s65_s7 }
  0x4e   :  { %p5307_p9 = scmp.lt.s32.totalorder %s5305_s25, %s5301_s24 }
  0x50   :  { %p5308_p10 = por %p5307_p9, %p5306_p8 }
  0x52   :  { %p5309_p11 = pnand %p5308_p10, %p5302_p7 }
  0x54   :  { %5312 = shalt.err (!%p5309_p11)
}
  0x55   :  { %67 = dma.hbm_to_vmem [thread:$0]  %s5490_s4, 16, %s65_s7, [#allocation9]  }
  0x56   :  { %5335 = dma.done.wait [#allocation3], 7296  }
  0x57   :  { %5336 = vsyncadd [#allocation3], 4294960000 }
  0x58   :  { %5337 = dma.done.wait [#allocation6], 115728  }
  0x59   :  { %5338 = vsyncadd [#allocation6], 4294851568 }
  0x5a   :  { %5339 = dma.done.wait [#allocation9], 2064  }
  0x5b   :  { %5340 = vsyncadd [#allocation9], 4294965232  ;;  %v156_v0 = vld [vmem:[#allocation5 + $0x80] sm:$0xff]  ;;  %v157_v1 = vld [vmem:[#allocation5 + $0x88] sm:$0xff]  ;;  %vm5351_vm0 = vmmov 0   ;;  %vm1051_vm1 = vcmask 523264  }
  0x5c   :  { %v140_v2 = vld [vmem:[#allocation5] sm:$0xff]  ;;  %v4260_v3 = vpack.c.bf16 %v157_v1, %v156_v0  ;;  %v141_v4 = vld [vmem:[#allocation5 + $0x8] sm:$0xff]  ;;  %v158_v11 = vld [vmem:[#allocation5 + $0x90] sm:$0xff]  ;;  %s5353_s4 = smov [#allocation11]  }
  0x5d   :  { %v188_v5 = vld [vmem:[#allocation5 + $0x180] sm:$0xff]  ;;  %v189_v6 = vld [vmem:[#allocation5 + $0x188] sm:$0xff]  ;;  %v4262_v7 = vpack.c.bf16 %v141_v4, %v140_v2  ;;  %v159_v13 = vld [vmem:[#allocation5 + $0x98] sm:$0xff]  ;;  %s3186_s27 = sshll.u32 %s5353_s4, 4  ;;  %s3187_s27 = int_to_ptr.vmem [resolvable:$true] %s3186_s27 }
  0x5e   :  { %v4292_v8 = vpack.c.bf16 %v189_v6, %v188_v5  ;;  %v172_v9 = vld [vmem:[#allocation5 + $0x100] sm:$0xff]  ;;  %v173_v10 = vld [vmem:[#allocation5 + $0x108] sm:$0xff]  ;;  %4261 = vmatprep.subr.bf16.mxu0 %v4260_v3  ;;  %v142_v14 = vld [vmem:[#allocation5 + $0x10] sm:$0xff]  ;;  %v4264_v16 = vpack.c.bf16 %v159_v13, %v158_v11  ;;  %s5313_s3 = scalar_lea.vmem %s3187_s27, 128  ;;  %p5318_p13 = scmp.lt.s32.totalorder %s3187_s27, %s3187_s27 }
  0x5f   :  { %v4294_v12 = vpack.c.bf16 %v173_v10, %v172_v9  ;;  %v143_v15 = vld [vmem:[#allocation5 + $0x18] sm:$0xff]  ;;  %4263 = vmatpush3.bf16.msra.mxu0 %v4262_v7  ;;  %v190_v18 = vld [vmem:[#allocation5 + $0x190] sm:$0xff]  ;;  %v160_v23 = vld [vmem:[#allocation5 + $0xa0] sm:$0xff]  ;;  %p5314_p12 = scmp.ne.s32.totalorder %s3187_s27, %s5313_s3  ;;  %p5319_p0 = scmp.lt.s32.totalorder %s5313_s3, %s5313_s3 }
  0x60   :  { %4293 = vmatprep.subr.bf16.mxu1 %v4292_v8  ;;  %v4266_v17 = vpack.c.bf16 %v143_v15, %v142_v14  ;;  %v191_v19 = vld [vmem:[#allocation5 + $0x198] sm:$0xff]  ;;  %v174_v20 = vld [vmem:[#allocation5 + $0x110] sm:$0xff]  ;;  %v161_v24 = vld [vmem:[#allocation5 + $0xa8] sm:$0xff]  ;;  %4265 = vmatprep.subr.bf16.mxu0 %v4264_v16 }
  0x61   :  { %4295 = vmatpush3.bf16.msra.mxu1 %v4294_v12  ;;  %v4296_v21 = vpack.c.bf16 %v191_v19, %v190_v18  ;;  %v175_v22 = vld [vmem:[#allocation5 + $0x118] sm:$0xff]  ;;  %v4268_v26 = vpack.c.bf16 %v161_v24, %v160_v23  ;;  %v144_v27 = vld [vmem:[#allocation5 + $0x20] sm:$0xff]  ;;  %v145_v28 = vld [vmem:[#allocation5 + $0x28] sm:$0xff]  ;;  %p5320_p1 = por %p5319_p0, %p5318_p13 }
  0x62   :  { %v4298_v25 = vpack.c.bf16 %v175_v22, %v174_v20  ;;  %v192_v29 = vld [vmem:[#allocation5 + $0x1a0] sm:$0xff]  ;;  %v193_v30 = vld [vmem:[#allocation5 + $0x1a8] sm:$0xff]  ;;  %v4270_v33 = vpack.c.bf16 %v145_v28, %v144_v27  ;;  %v162_v35 = vld [vmem:[#allocation5 + $0xb0] sm:$0xff] }
  0x63   :  { %4297 = vmatprep.subr.bf16.mxu1 %v4296_v21  ;;  %v176_v31 = vld [vmem:[#allocation5 + $0x120] sm:$0xff]  ;;  %v177_v32 = vld [vmem:[#allocation5 + $0x128] sm:$0xff]  ;;  %4267 = vmatpush3.bf16.msra.mxu0 %v4266_v17  ;;  %v4300_v34 = vpack.c.bf16 %v193_v30, %v192_v29  ;;  %v163_v36 = vld [vmem:[#allocation5 + $0xb8] sm:$0xff]  ;;  %p5321_p2 = pnand %p5320_p1, %p5314_p12 }
  0x64   :  { %v146_v37 = vld [vmem:[#allocation5 + $0x30] sm:$0xff]  ;;  %4269 = vmatprep.subr.bf16.mxu0 %v4268_v26  ;;  %v4302_v38 = vpack.c.bf16 %v177_v32, %v176_v31  ;;  %v4272_v39 = vpack.c.bf16 %v163_v36, %v162_v35  ;;  %v147_v40 = vld [vmem:[#allocation5 + $0x38] sm:$0xff]  ;;  %v164_v46 = vld [vmem:[#allocation5 + $0xc0] sm:$0xff] }
  0x65   :  { %4299 = vmatpush3.bf16.msra.mxu1 %v4298_v25  ;;  %v194_v41 = vld [vmem:[#allocation5 + $0x1b0] sm:$0xff]  ;;  %v195_v42 = vld [vmem:[#allocation5 + $0x1b8] sm:$0xff]  ;;  %v165_v47 = vld [vmem:[#allocation5 + $0xc8] sm:$0xff]  ;;  %v4274_v48 = vpack.c.bf16 %v147_v40, %v146_v37 }
  0x66   :  { %4301 = vmatprep.subr.bf16.mxu1 %v4300_v34  ;;  %v4304_v43 = vpack.c.bf16 %v195_v42, %v194_v41  ;;  %v178_v44 = vld [vmem:[#allocation5 + $0x130] sm:$0xff]  ;;  %v179_v45 = vld [vmem:[#allocation5 + $0x138] sm:$0xff]  ;;  %v196_v49 = vld [vmem:[#allocation5 + $0x1c0] sm:$0xff]  ;;  %v4276_v52 = vpack.c.bf16 %v165_v47, %v164_v46 }
  0x67   :  { %4271 = vmatpush3.bf16.msra.mxu0 %v4270_v33  ;;  %v197_v50 = vld [vmem:[#allocation5 + $0x1c8] sm:$0xff]  ;;  %v4306_v51 = vpack.c.bf16 %v179_v45, %v178_v44  ;;  %v148_v53 = vld [vmem:[#allocation5 + $0x40] sm:$0xff]  ;;  %v166_v58 = vld [vmem:[#allocation5 + $0xd0] sm:$0xff] }
  0x68   :  { %4273 = vmatprep.subr.bf16.mxu0 %v4272_v39  ;;  %v149_v54 = vld [vmem:[#allocation5 + $0x48] sm:$0xff]  ;;  %v180_v55 = vld [vmem:[#allocation5 + $0x140] sm:$0xff]  ;;  %v4308_v56 = vpack.c.bf16 %v197_v50, %v196_v49  ;;  %v167_v59 = vld [vmem:[#allocation5 + $0xd8] sm:$0xff] }
  0x69   :  { %4303 = vmatpush3.bf16.msra.mxu1 %v4302_v38  ;;  %v181_v57 = vld [vmem:[#allocation5 + $0x148] sm:$0xff]  ;;  %v198_v60 = vld [vmem:[#allocation5 + $0x1d0] sm:$0xff]  ;;  %v199_v61 = vld [vmem:[#allocation5 + $0x1d8] sm:$0xff]  ;;  %v4278_v62 = vpack.c.bf16 %v149_v54, %v148_v53  ;;  %v4280_v0 = vpack.c.bf16 %v167_v59, %v166_v58 }
  0x6a   :  { %4305 = vmatprep.subr.bf16.mxu1 %v4304_v43  ;;  %v4310_v63 = vpack.c.bf16 %v181_v57, %v180_v55  ;;  %v150_v1 = vld [vmem:[#allocation5 + $0x50] sm:$0xff]  ;;  %v151_v2 = vld [vmem:[#allocation5 + $0x58] sm:$0xff]  ;;  %v4312_v4 = vpack.c.bf16 %v199_v61, %v198_v60  ;;  %v168_v6 = vld [vmem:[#allocation5 + $0xe0] sm:$0xff] }
  0x6b   :  { %4275 = vmatpush3.bf16.msra.mxu0 %v4274_v48  ;;  %v182_v3 = vld [vmem:[#allocation5 + $0x150] sm:$0xff]  ;;  %v183_v5 = vld [vmem:[#allocation5 + $0x158] sm:$0xff]  ;;  %v169_v7 = vld [vmem:[#allocation5 + $0xe8] sm:$0xff]  ;;  %v4282_v10 = vpack.c.bf16 %v151_v2, %v150_v1 }
  0x6c   :  { %4277 = vmatprep.subr.bf16.mxu0 %v4276_v52  ;;  %v200_v8 = vld [vmem:[#allocation5 + $0x1e0] sm:$0xff]  ;;  %v201_v9 = vld [vmem:[#allocation5 + $0x1e8] sm:$0xff]  ;;  %v4314_v13 = vpack.c.bf16 %v183_v5, %v182_v3  ;;  %v4284_v14 = vpack.c.bf16 %v169_v7, %v168_v6  ;;  %v170_v19 = vld [vmem:[#allocation5 + $0xf0] sm:$0xff] }
  0x6d   :  { %4307 = vmatpush3.bf16.msra.mxu1 %v4306_v51  ;;  %v152_v11 = vld [vmem:[#allocation5 + $0x60] sm:$0xff]  ;;  %v153_v15 = vld [vmem:[#allocation5 + $0x68] sm:$0xff]  ;;  %v4316_v18 = vpack.c.bf16 %v201_v9, %v200_v8  ;;  %v171_v20 = vld [vmem:[#allocation5 + $0xf8] sm:$0xff] }
  0x6e   :  { %4309 = vmatprep.subr.bf16.mxu1 %v4308_v56  ;;  %v84_v12 = vld [vmem:[#allocation2 + $0x8] sm:$0xff]  ;;  %v185_v17 = vld [vmem:[#allocation5 + $0x168] sm:$0xff]  ;;  %v86_v21 = vld [vmem:[#allocation2 + $0x18] sm:$0xff]  ;;  %v4286_v24 = vpack.c.bf16 %v153_v15, %v152_v11  ;;  %v4288_v26 = vpack.c.bf16 %v171_v20, %v170_v19 }
  0x6f   :  { %4279 = vmatpush3.bf16.msra.mxu0 %v4278_v62  ;;  %v184_v16 = vld [vmem:[#allocation5 + $0x160] sm:$0xff]  ;;  %1119 = vmatprep.mubr.f32.mxu0 %v84_v12  ;;  %v202_v22 = vld [vmem:[#allocation5 + $0x1f0] sm:$0xff]  ;;  %v203_v23 = vld [vmem:[#allocation5 + $0x1f8] sm:$0xff] }
  0x70   :  { %4281 = vmatprep.subr.bf16.mxu0 %v4280_v0  ;;  %1189 = vmatprep.mubr.f32.mxu1 %v86_v21  ;;  %v4318_v25 = vpack.c.bf16 %v185_v17, %v184_v16  ;;  %v154_v27 = vld [vmem:[#allocation5 + $0x70] sm:$0xff]  ;;  %v155_v28 = vld [vmem:[#allocation5 + $0x78] sm:$0xff]  ;;  %v4320_v30 = vpack.c.bf16 %v203_v23, %v202_v22  ;;  %v220_v32 = vld [vmem:[#allocation5 + $0x280] sm:$0xff] }
  0x71   :  { %4311 = vmatpush3.bf16.msra.mxu1 %v4310_v63  ;;  %v186_v29 = vld [vmem:[#allocation5 + $0x170] sm:$0xff]  ;;  %v187_v31 = vld [vmem:[#allocation5 + $0x178] sm:$0xff]  ;;  %v221_v33 = vld [vmem:[#allocation5 + $0x288] sm:$0xff]  ;;  %v4290_v36 = vpack.c.bf16 %v155_v28, %v154_v27 }
  0x72   :  { %4313 = vmatprep.subr.bf16.mxu1 %v4312_v4  ;;  %v252_v34 = vld [vmem:[#allocation5 + $0x380] sm:$0xff]  ;;  %v253_v35 = vld [vmem:[#allocation5 + $0x388] sm:$0xff]  ;;  %v4322_v37 = vpack.c.bf16 %v187_v31, %v186_v29  ;;  %v4324_v38 = vpack.c.bf16 %v221_v33, %v220_v32  ;;  %v222_v44 = vld [vmem:[#allocation5 + $0x290] sm:$0xff] }
  0x73   :  { %4283 = vmatpush3.bf16.msra.mxu0 %v4282_v10  ;;  %v204_v39 = vld [vmem:[#allocation5 + $0x200] sm:$0xff]  ;;  %v205_v40 = vld [vmem:[#allocation5 + $0x208] sm:$0xff]  ;;  %v4356_v42 = vpack.c.bf16 %v253_v35, %v252_v34  ;;  %v223_v45 = vld [vmem:[#allocation5 + $0x298] sm:$0xff] }
  0x74   :  { %4285 = vmatprep.subr.bf16.mxu0 %v4284_v14  ;;  %v236_v41 = vld [vmem:[#allocation5 + $0x300] sm:$0xff]  ;;  %v237_v43 = vld [vmem:[#allocation5 + $0x308] sm:$0xff]  ;;  %v254_v46 = vld [vmem:[#allocation5 + $0x390] sm:$0xff]  ;;  %v4326_v49 = vpack.c.bf16 %v205_v40, %v204_v39  ;;  %v4328_v52 = vpack.c.bf16 %v223_v45, %v222_v44 }
  0x75   :  { %4315 = vmatpush3.bf16.msra.mxu1 %v4314_v13  ;;  %v255_v47 = vld [vmem:[#allocation5 + $0x398] sm:$0xff]  ;;  %v85_v50 = vld [vmem:[#allocation2 + $0x10] sm:$0xff]  ;;  %v4358_v51 = vpack.c.bf16 %v237_v43, %v236_v41  ;;  %v206_v53 = vld [vmem:[#allocation5 + $0x210] sm:$0xff] }
  0x76   :  { %4317 = vmatprep.subr.bf16.mxu1 %v4316_v18  ;;  %v83_v48 = vld [vmem:[#allocation2] sm:$0xff]  ;;  %v238_v55 = vld [vmem:[#allocation5 + $0x310] sm:$0xff]  ;;  %v4360_v56 = vpack.c.bf16 %v255_v47, %v254_v46  ;;  %v224_v58 = vld [vmem:[#allocation5 + $0x2a0] sm:$0xff] }
  0x77   :  { %4287 = vmatpush3.bf16.msra.mxu0 %v4286_v24  ;;  %v207_v54 = vld [vmem:[#allocation5 + $0x218] sm:$0xff]  ;;  %v225_v59 = vld [vmem:[#allocation5 + $0x2a8] sm:$0xff]  ;;  %v256_v60 = vld [vmem:[#allocation5 + $0x3a0] sm:$0xff] }
  0x78   :  { %4289 = vmatprep.subr.bf16.mxu0 %v4288_v26  ;;  %v239_v57 = vld [vmem:[#allocation5 + $0x318] sm:$0xff]  ;;  %v257_v61 = vld [vmem:[#allocation5 + $0x3a8] sm:$0xff]  ;;  %v4330_v62 = vpack.c.bf16 %v207_v54, %v206_v53  ;;  %v4332_v0 = vpack.c.bf16 %v225_v59, %v224_v58  ;;  %v208_v1 = vld [vmem:[#allocation5 + $0x220] sm:$0xff] }
  0x79   :  { %4319 = vmatpush3.bf16.msra.mxu1 %v4318_v25  ;;  %v4362_v63 = vpack.c.bf16 %v239_v57, %v238_v55  ;;  %v209_v2 = vld [vmem:[#allocation5 + $0x228] sm:$0xff]  ;;  %v240_v3 = vld [vmem:[#allocation5 + $0x320] sm:$0xff]  ;;  %v4364_v4 = vpack.c.bf16 %v257_v61, %v256_v60  ;;  %v226_v6 = vld [vmem:[#allocation5 + $0x2b0] sm:$0xff] }
  0x7a   :  { %4321 = vmatprep.subr.bf16.mxu1 %v4320_v30  ;;  %v241_v5 = vld [vmem:[#allocation5 + $0x328] sm:$0xff]  ;;  %v227_v7 = vld [vmem:[#allocation5 + $0x2b8] sm:$0xff]  ;;  %v258_v8 = vld [vmem:[#allocation5 + $0x3b0] sm:$0xff]  ;;  %v4334_v10 = vpack.c.bf16 %v209_v2, %v208_v1 }
  0x7b   :  { %4291 = vmatpush3.bf16.msra.mxu0 %v4290_v36  ;;  %v259_v9 = vld [vmem:[#allocation5 + $0x3b8] sm:$0xff]  ;;  %v4366_v11 = vpack.c.bf16 %v241_v5, %v240_v3  ;;  %v4336_v12 = vpack.c.bf16 %v227_v7, %v226_v6  ;;  %v210_v13 = vld [vmem:[#allocation5 + $0x230] sm:$0xff]  ;;  %v228_v18 = vld [vmem:[#allocation5 + $0x2c0] sm:$0xff] }
  0x7c   :  { %4325 = vmatprep.subr.bf16.mxu0 %v4324_v38  ;;  %v211_v14 = vld [vmem:[#allocation5 + $0x238] sm:$0xff]  ;;  %v242_v15 = vld [vmem:[#allocation5 + $0x330] sm:$0xff]  ;;  %v4368_v16 = vpack.c.bf16 %v259_v9, %v258_v8  ;;  %v229_v19 = vld [vmem:[#allocation5 + $0x2c8] sm:$0xff] }
  0x7d   :  { %4323 = vmatpush3.bf16.msra.mxu1 %v4322_v37  ;;  %v243_v17 = vld [vmem:[#allocation5 + $0x338] sm:$0xff]  ;;  %v260_v20 = vld [vmem:[#allocation5 + $0x3c0] sm:$0xff]  ;;  %v261_v21 = vld [vmem:[#allocation5 + $0x3c8] sm:$0xff]  ;;  %v4338_v23 = vpack.c.bf16 %v211_v14, %v210_v13  ;;  %v4340_v26 = vpack.c.bf16 %v229_v19, %v228_v18 }
  0x7e   :  { %4357 = vmatprep.subr.bf16.mxu1 %v4356_v42  ;;  %1120 = vmatmul.mubr.f32.vlgmr.msra.gmra.mrb[0].mxu0 %v83_v48  ;;  %v88_v22 = vld [vmem:[#allocation2 + $0x28] sm:$0xff]  ;;  %v4370_v25 = vpack.c.bf16 %v243_v17, %v242_v15  ;;  %v213_v27 = vld [vmem:[#allocation5 + $0x248] sm:$0xff]  ;;  %v90_v29 = vld [vmem:[#allocation2 + $0x38] sm:$0xff]  ;;  %v4372_v30 = vpack.c.bf16 %v261_v21, %v260_v20 }
  0x7f   :  { %4327 = vmatpush3.bf16.msra.mxu0 %v4326_v49  ;;  %v212_v24 = vld [vmem:[#allocation5 + $0x240] sm:$0xff]  ;;  %1259 = vmatprep.mubr.f32.mxu0 %v88_v22  ;;  %v245_v31 = vld [vmem:[#allocation5 + $0x348] sm:$0xff]  ;;  %v230_v32 = vld [vmem:[#allocation5 + $0x2d0] sm:$0xff] }
  0x80   :  { %1190 = vmatmul.mubr.f32.vlgmr.msra.gmra.mrb[0].mxu1 %v85_v50  ;;  %4329 = vmatprep.subr.bf16.mxu0 %v4328_v52  ;;  %v244_v28 = vld [vmem:[#allocation5 + $0x340] sm:$0xff]  ;;  %v231_v33 = vld [vmem:[#allocation5 + $0x2d8] sm:$0xff]  ;;  %v262_v34 = vld [vmem:[#allocation5 + $0x3d0] sm:$0xff]  ;;  %v4342_v36 = vpack.c.bf16 %v213_v27, %v212_v24 }
  0x81   :  { %4359 = vmatpush3.bf16.msra.mxu1 %v4358_v51  ;;  %1329 = vmatprep.mubr.f32.mxu1 %v90_v29  ;;  %v263_v35 = vld [vmem:[#allocation5 + $0x3d8] sm:$0xff]  ;;  %v4374_v37 = vpack.c.bf16 %v245_v31, %v244_v28  ;;  %v4344_v38 = vpack.c.bf16 %v231_v33, %v230_v32  ;;  %v214_v39 = vld [vmem:[#allocation5 + $0x250] sm:$0xff]  ;;  %v232_v44 = vld [vmem:[#allocation5 + $0x2e0] sm:$0xff] }
  0x82   :  { %4361 = vmatprep.subr.bf16.mxu1 %v4360_v56  ;;  %v215_v40 = vld [vmem:[#allocation5 + $0x258] sm:$0xff]  ;;  %v246_v41 = vld [vmem:[#allocation5 + $0x350] sm:$0xff]  ;;  %v4376_v42 = vpack.c.bf16 %v263_v35, %v262_v34  ;;  %v233_v45 = vld [vmem:[#allocation5 + $0x2e8] sm:$0xff] }
  0x83   :  { %4331 = vmatpush3.bf16.msra.mxu0 %v4330_v62  ;;  %v247_v43 = vld [vmem:[#allocation5 + $0x358] sm:$0xff]  ;;  %v264_v46 = vld [vmem:[#allocation5 + $0x3e0] sm:$0xff]  ;;  %v265_v47 = vld [vmem:[#allocation5 + $0x3e8] sm:$0xff]  ;;  %v4346_v48 = vpack.c.bf16 %v215_v40, %v214_v39  ;;  %v4348_v50 = vpack.c.bf16 %v233_v45, %v232_v44 }
  0x84   :  { %4333 = vmatprep.subr.bf16.mxu0 %v4332_v0  ;;  %v4378_v49 = vpack.c.bf16 %v247_v43, %v246_v41  ;;  %v216_v51 = vld [vmem:[#allocation5 + $0x260] sm:$0xff]  ;;  %v217_v52 = vld [vmem:[#allocation5 + $0x268] sm:$0xff]  ;;  %v4380_v54 = vpack.c.bf16 %v265_v47, %v264_v46  ;;  %v234_v56 = vld [vmem:[#allocation5 + $0x2f0] sm:$0xff] }
  0x85   :  { %4363 = vmatpush3.bf16.msra.mxu1 %v4362_v63  ;;  %v248_v53 = vld [vmem:[#allocation5 + $0x360] sm:$0xff]  ;;  %v249_v55 = vld [vmem:[#allocation5 + $0x368] sm:$0xff]  ;;  %v235_v57 = vld [vmem:[#allocation5 + $0x2f8] sm:$0xff]  ;;  %v4350_v60 = vpack.c.bf16 %v217_v52, %v216_v51 }
  0x86   :  { %4365 = vmatprep.subr.bf16.mxu1 %v4364_v4  ;;  %v266_v58 = vld [vmem:[#allocation5 + $0x3f0] sm:$0xff]  ;;  %v267_v59 = vld [vmem:[#allocation5 + $0x3f8] sm:$0xff]  ;;  %v4382_v61 = vpack.c.bf16 %v249_v55, %v248_v53  ;;  %v4352_v62 = vpack.c.bf16 %v235_v57, %v234_v56  ;;  %v284_v4 = vld [vmem:[#allocation5 + $0x480] sm:$0xff] }
  0x87   :  { %4335 = vmatpush3.bf16.msra.mxu0 %v4334_v10  ;;  %v218_v63 = vld [vmem:[#allocation5 + $0x270] sm:$0xff]  ;;  %v219_v0 = vld [vmem:[#allocation5 + $0x278] sm:$0xff]  ;;  %v4384_v2 = vpack.c.bf16 %v267_v59, %v266_v58  ;;  %v285_v5 = vld [vmem:[#allocation5 + $0x488] sm:$0xff] }
  0x88   :  { %4337 = vmatprep.subr.bf16.mxu0 %v4336_v12  ;;  %v250_v1 = vld [vmem:[#allocation5 + $0x370] sm:$0xff]  ;;  %v251_v3 = vld [vmem:[#allocation5 + $0x378] sm:$0xff]  ;;  %v316_v6 = vld [vmem:[#allocation5 + $0x580] sm:$0xff]  ;;  %v4354_v8 = vpack.c.bf16 %v219_v0, %v218_v63  ;;  %v4388_v10 = vpack.c.bf16 %v285_v5, %v284_v4 }
  0x89   :  { %4367 = vmatpush3.bf16.msra.mxu1 %v4366_v11  ;;  %v317_v7 = vld [vmem:[#allocation5 + $0x588] sm:$0xff]  ;;  %v4386_v9 = vpack.c.bf16 %v251_v3, %v250_v1  ;;  %v268_v11 = vld [vmem:[#allocation5 + $0x400] sm:$0xff]  ;;  %v287_v17 = vld [vmem:[#allocation5 + $0x498] sm:$0xff] }
  0x8a   :  { %4369 = vmatprep.subr.bf16.mxu1 %v4368_v16  ;;  %v269_v12 = vld [vmem:[#allocation5 + $0x408] sm:$0xff]  ;;  %v300_v13 = vld [vmem:[#allocation5 + $0x500] sm:$0xff]  ;;  %v4420_v14 = vpack.c.bf16 %v317_v7, %v316_v6  ;;  %v286_v16 = vld [vmem:[#allocation5 + $0x490] sm:$0xff] }
  0x8b   :  { %4339 = vmatpush3.bf16.msra.mxu0 %v4338_v23  ;;  %v301_v15 = vld [vmem:[#allocation5 + $0x508] sm:$0xff]  ;;  %v318_v18 = vld [vmem:[#allocation5 + $0x590] sm:$0xff]  ;;  %v319_v19 = vld [vmem:[#allocation5 + $0x598] sm:$0xff]  ;;  %v4390_v21 = vpack.c.bf16 %v269_v12, %v268_v11  ;;  %v4392_v24 = vpack.c.bf16 %v287_v17, %v286_v16 }
  0x8c   :  { %4341 = vmatprep.subr.bf16.mxu0 %v4340_v26  ;;  %v87_v20 = vld [vmem:[#allocation2 + $0x20] sm:$0xff]  ;;  %v89_v22 = vld [vmem:[#allocation2 + $0x30] sm:$0xff]  ;;  %v4422_v23 = vpack.c.bf16 %v301_v15, %v300_v13  ;;  %v302_v27 = vld [vmem:[#allocation5 + $0x510] sm:$0xff]  ;;  %v4424_v28 = vpack.c.bf16 %v319_v19, %v318_v18 }
  0x8d   :  { %4371 = vmatpush3.bf16.msra.mxu1 %v4370_v25  ;;  %v270_v25 = vld [vmem:[#allocation5 + $0x410] sm:$0xff]  ;;  %v271_v26 = vld [vmem:[#allocation5 + $0x418] sm:$0xff]  ;;  %v289_v31 = vld [vmem:[#allocation5 + $0x4a8] sm:$0xff] }
  0x8e   :  { %4373 = vmatprep.subr.bf16.mxu1 %v4372_v30  ;;  %v303_v29 = vld [vmem:[#allocation5 + $0x518] sm:$0xff]  ;;  %v288_v30 = vld [vmem:[#allocation5 + $0x4a0] sm:$0xff]  ;;  %v321_v33 = vld [vmem:[#allocation5 + $0x5a8] sm:$0xff]  ;;  %v4394_v35 = vpack.c.bf16 %v271_v26, %v270_v25 }
  0x8f   :  { %4343 = vmatpush3.bf16.msra.mxu0 %v4342_v36  ;;  %v320_v32 = vld [vmem:[#allocation5 + $0x5a0] sm:$0xff]  ;;  %v94_v36 = vld [vmem:[#allocation2 + $0x58] sm:$0xff]  ;;  %v273_v40 = vld [vmem:[#allocation5 + $0x428] sm:$0xff] }
  0x90   :  { %4345 = vmatprep.subr.bf16.mxu0 %v4344_v38  ;;  %v92_v34 = vld [vmem:[#allocation2 + $0x48] sm:$0xff]  ;;  %v4396_v38 = vpack.c.bf16 %v289_v31, %v288_v30  ;;  %v305_v43 = vld [vmem:[#allocation5 + $0x528] sm:$0xff]  ;;  %v290_v44 = vld [vmem:[#allocation5 + $0x4b0] sm:$0xff] }
  0x91   :  { %4375 = vmatpush3.bf16.msra.mxu1 %v4374_v37  ;;  %v4426_v37 = vpack.c.bf16 %v303_v29, %v302_v27  ;;  %v272_v39 = vld [vmem:[#allocation5 + $0x420] sm:$0xff]  ;;  %v291_v45 = vld [vmem:[#allocation5 + $0x4b8] sm:$0xff]  ;;  %v322_v46 = vld [vmem:[#allocation5 + $0x5b0] sm:$0xff] }
  0x92   :  { %4377 = vmatprep.subr.bf16.mxu1 %v4376_v42  ;;  %v304_v41 = vld [vmem:[#allocation5 + $0x520] sm:$0xff]  ;;  %v4428_v42 = vpack.c.bf16 %v321_v33, %v320_v32  ;;  %v323_v47 = vld [vmem:[#allocation5 + $0x5b8] sm:$0xff]  ;;  %v274_v51 = vld [vmem:[#allocation5 + $0x430] sm:$0xff] }
  0x93   :  { %4347 = vmatpush3.bf16.msra.mxu0 %v4346_v48  ;;  %v4398_v48 = vpack.c.bf16 %v273_v40, %v272_v39  ;;  %v275_v52 = vld [vmem:[#allocation5 + $0x438] sm:$0xff]  ;;  %v306_v53 = vld [vmem:[#allocation5 + $0x530] sm:$0xff]  ;;  %v292_v56 = vld [vmem:[#allocation5 + $0x4c0] sm:$0xff] }
  0x94   :  { %4349 = vmatprep.subr.bf16.mxu0 %v4348_v50  ;;  %v4400_v50 = vpack.c.bf16 %v291_v45, %v290_v44  ;;  %v307_v55 = vld [vmem:[#allocation5 + $0x538] sm:$0xff]  ;;  %v293_v57 = vld [vmem:[#allocation5 + $0x4c8] sm:$0xff]  ;;  %v324_v58 = vld [vmem:[#allocation5 + $0x5c0] sm:$0xff] }
  0x95   :  { %4379 = vmatpush3.bf16.msra.mxu1 %v4378_v49  ;;  %v4430_v49 = vpack.c.bf16 %v305_v43, %v304_v41  ;;  %v325_v59 = vld [vmem:[#allocation5 + $0x5c8] sm:$0xff]  ;;  %v276_v63 = vld [vmem:[#allocation5 + $0x440] sm:$0xff]  ;;  %v294_v4 = vld [vmem:[#allocation5 + $0x4d0] sm:$0xff] }
  0x96   :  { %4381 = vmatprep.subr.bf16.mxu1 %v4380_v54  ;;  %v4432_v54 = vpack.c.bf16 %v323_v47, %v322_v46  ;;  %v277_v0 = vld [vmem:[#allocation5 + $0x448] sm:$0xff]  ;;  %v308_v1 = vld [vmem:[#allocation5 + $0x540] sm:$0xff]  ;;  %v295_v5 = vld [vmem:[#allocation5 + $0x4d8] sm:$0xff] }
  0x97   :  { %4351 = vmatpush3.bf16.msra.mxu0 %v4350_v60  ;;  %v4402_v60 = vpack.c.bf16 %v275_v52, %v274_v51  ;;  %v309_v3 = vld [vmem:[#allocation5 + $0x548] sm:$0xff]  ;;  %v326_v6 = vld [vmem:[#allocation5 + $0x5d0] sm:$0xff]  ;;  %v327_v7 = vld [vmem:[#allocation5 + $0x5d8] sm:$0xff] }
  0x98   :  { %4353 = vmatprep.subr.bf16.mxu0 %v4352_v62  ;;  %v4404_v62 = vpack.c.bf16 %v293_v57, %v292_v56  ;;  %v278_v11 = vld [vmem:[#allocation5 + $0x450] sm:$0xff]  ;;  %v279_v12 = vld [vmem:[#allocation5 + $0x458] sm:$0xff]  ;;  %v296_v16 = vld [vmem:[#allocation5 + $0x4e0] sm:$0xff] }
  0x99   :  { %4383 = vmatpush3.bf16.msra.mxu1 %v4382_v61  ;;  %v4434_v61 = vpack.c.bf16 %v307_v55, %v306_v53  ;;  %v310_v13 = vld [vmem:[#allocation5 + $0x550] sm:$0xff]  ;;  %v311_v15 = vld [vmem:[#allocation5 + $0x558] sm:$0xff]  ;;  %v297_v17 = vld [vmem:[#allocation5 + $0x4e8] sm:$0xff] }
  0x9a   :  { %4385 = vmatprep.subr.bf16.mxu1 %v4384_v2  ;;  %v4436_v2 = vpack.c.bf16 %v325_v59, %v324_v58  ;;  %v328_v18 = vld [vmem:[#allocation5 + $0x5e0] sm:$0xff]  ;;  %v329_v19 = vld [vmem:[#allocation5 + $0x5e8] sm:$0xff]  ;;  %v299_v29 = vld [vmem:[#allocation5 + $0x4f8] sm:$0xff] }
  0x9b   :  { %4355 = vmatpush3.bf16.msra.mxu0 %v4354_v8  ;;  %v4406_v8 = vpack.c.bf16 %v277_v0, %v276_v63  ;;  %v312_v25 = vld [vmem:[#allocation5 + $0x560] sm:$0xff]  ;;  %v4444_v26 = vpack.c.bf16 %v329_v19, %v328_v18  ;;  %v313_v27 = vld [vmem:[#allocation5 + $0x568] sm:$0xff]  ;;  %v330_v30 = vld [vmem:[#allocation5 + $0x5f0] sm:$0xff] }
  0x9c   :  { %4389 = vmatprep.subr.bf16.mxu0 %v4388_v10  ;;  %v4408_v10 = vpack.c.bf16 %v295_v5, %v294_v4  ;;  %v331_v31 = vld [vmem:[#allocation5 + $0x5f8] sm:$0xff]  ;;  %v4446_v33 = vpack.c.bf16 %v313_v27, %v312_v25  ;;  %v348_v40 = vld [vmem:[#allocation5 + $0x680] sm:$0xff]  ;;  %v349_v41 = vld [vmem:[#allocation5 + $0x688] sm:$0xff] }
  0x9d   :  { %4387 = vmatpush3.bf16.msra.mxu1 %v4386_v9  ;;  %v4438_v9 = vpack.c.bf16 %v309_v3, %v308_v1  ;;  %v315_v39 = vld [vmem:[#allocation5 + $0x578] sm:$0xff]  ;;  %v381_v43 = vld [vmem:[#allocation5 + $0x788] sm:$0xff]  ;;  %v4452_v46 = vpack.c.bf16 %v349_v41, %v348_v40  ;;  %v332_v47 = vld [vmem:[#allocation5 + $0x600] sm:$0xff] }
  0x9e   :  { %4421 = vmatprep.subr.bf16.mxu1 %v4420_v14  ;;  %1260 = vmatmul.mubr.f32.vlgmr.msra.gmra.mrb[2].mxu0 %v87_v20  ;;  %v4440_v14 = vpack.c.bf16 %v327_v7, %v326_v6  ;;  %v4410_v20 = vpack.c.bf16 %v279_v12, %v278_v11  ;;  %v365_v51 = vld [vmem:[#allocation5 + $0x708] sm:$0xff]  ;;  %v350_v52 = vld [vmem:[#allocation5 + $0x690] sm:$0xff]  ;;  %v351_v53 = vld [vmem:[#allocation5 + $0x698] sm:$0xff] }
  0x9f   :  { %4391 = vmatpush3.bf16.msra.mxu0 %v4390_v21  ;;  %1399 = vmatprep.mubr.f32.mxu0 %v92_v34  ;;  %v4442_v21 = vpack.c.bf16 %v311_v15, %v310_v13  ;;  %v383_v55 = vld [vmem:[#allocation5 + $0x798] sm:$0xff]  ;;  %v93_v58 = vld [vmem:[#allocation2 + $0x50] sm:$0xff]  ;;  %v366_v63 = vld [vmem:[#allocation5 + $0x710] sm:$0xff] }
  0xa0   :  { %1330 = vmatmul.mubr.f32.vlgmr.msra.gmra.mrb[2].mxu1 %v89_v22  ;;  %4393 = vmatprep.subr.bf16.mxu0 %v4392_v24  ;;  %v4412_v22 = vpack.c.bf16 %v297_v17, %v296_v16  ;;  %v281_v24 = vld [vmem:[#allocation5 + $0x468] sm:$0xff]  ;;  %v91_v56 = vld [vmem:[#allocation2 + $0x40] sm:$0xff]  ;;  %v384_v4 = vld [vmem:[#allocation5 + $0x7a0] sm:$0xff] }
  0xa1   :  { %4423 = vmatpush3.bf16.msra.mxu1 %v4422_v23  ;;  %1469 = vmatprep.mubr.f32.mxu1 %v94_v36  ;;  %v280_v23 = vld [vmem:[#allocation5 + $0x460] sm:$0xff]  ;;  %v283_v36 = vld [vmem:[#allocation5 + $0x478] sm:$0xff]  ;;  %v353_v3 = vld [vmem:[#allocation5 + $0x6a8] sm:$0xff] }
  0xa2   :  { %4425 = vmatprep.subr.bf16.mxu1 %v4424_v28  ;;  %v298_v28 = vld [vmem:[#allocation5 + $0x4f0] sm:$0xff]  ;;  %v4414_v32 = vpack.c.bf16 %v281_v24, %v280_v23  ;;  %v367_v1 = vld [vmem:[#allocation5 + $0x718] sm:$0xff]  ;;  %v385_v5 = vld [vmem:[#allocation5 + $0x7a8] sm:$0xff] }
  0xa3   :  { %4395 = vmatpush3.bf16.msra.mxu0 %v4394_v35  ;;  %v4416_v34 = vpack.c.bf16 %v299_v29, %v298_v28  ;;  %v282_v35 = vld [vmem:[#allocation5 + $0x470] sm:$0xff]  ;;  %v96_v6 = vld [vmem:[#allocation2 + $0x68] sm:$0xff]  ;;  %v337_v12 = vld [vmem:[#allocation5 + $0x628] sm:$0xff] }
  0xa4   :  { %4397 = vmatprep.subr.bf16.mxu0 %v4396_v38  ;;  %v4448_v38 = vpack.c.bf16 %v331_v31, %v330_v30  ;;  %v4418_v44 = vpack.c.bf16 %v283_v36, %v282_v35  ;;  %v336_v11 = vld [vmem:[#allocation5 + $0x620] sm:$0xff]  ;;  %v369_v15 = vld [vmem:[#allocation5 + $0x728] sm:$0xff]  ;;  %v354_v16 = vld [vmem:[#allocation5 + $0x6b0] sm:$0xff] }
  0xa5   :  { %4427 = vmatpush3.bf16.msra.mxu1 %v4426_v37  ;;  %v314_v37 = vld [vmem:[#allocation5 + $0x570] sm:$0xff]  ;;  %v368_v13 = vld [vmem:[#allocation5 + $0x720] sm:$0xff]  ;;  %v355_v17 = vld [vmem:[#allocation5 + $0x6b8] sm:$0xff] }
  0xa6   :  { %4429 = vmatprep.subr.bf16.mxu1 %v4428_v42  ;;  %v380_v42 = vld [vmem:[#allocation5 + $0x780] sm:$0xff]  ;;  %v4450_v45 = vpack.c.bf16 %v315_v39, %v314_v37  ;;  %v386_v18 = vld [vmem:[#allocation5 + $0x7b0] sm:$0xff]  ;;  %v387_v19 = vld [vmem:[#allocation5 + $0x7b8] sm:$0xff] }
  0xa7   :  { %4399 = vmatpush3.bf16.msra.mxu0 %v4398_v48  ;;  %v333_v48 = vld [vmem:[#allocation5 + $0x608] sm:$0xff]  ;;  %v338_v23 = vld [vmem:[#allocation5 + $0x630] sm:$0xff]  ;;  %v339_v24 = vld [vmem:[#allocation5 + $0x638] sm:$0xff] }
  0xa8   :  { %4401 = vmatprep.subr.bf16.mxu0 %v4400_v50  ;;  %v4484_v50 = vpack.c.bf16 %v381_v43, %v380_v42  ;;  %v4454_v57 = vpack.c.bf16 %v333_v48, %v332_v47  ;;  %v370_v25 = vld [vmem:[#allocation5 + $0x730] sm:$0xff]  ;;  %v371_v27 = vld [vmem:[#allocation5 + $0x738] sm:$0xff]  ;;  %v356_v28 = vld [vmem:[#allocation5 + $0x6c0] sm:$0xff] }
  0xa9   :  { %4431 = vmatpush3.bf16.msra.mxu1 %v4430_v49  ;;  %v364_v49 = vld [vmem:[#allocation5 + $0x700] sm:$0xff]  ;;  %v357_v29 = vld [vmem:[#allocation5 + $0x6c8] sm:$0xff]  ;;  %v358_v40 = vld [vmem:[#allocation5 + $0x6d0] sm:$0xff] }
  0xaa   :  { %4433 = vmatprep.subr.bf16.mxu1 %v4432_v54  ;;  %v382_v54 = vld [vmem:[#allocation5 + $0x790] sm:$0xff]  ;;  %v4486_v59 = vpack.c.bf16 %v365_v51, %v364_v49  ;;  %v388_v30 = vld [vmem:[#allocation5 + $0x7c0] sm:$0xff]  ;;  %v389_v31 = vld [vmem:[#allocation5 + $0x7c8] sm:$0xff] }
  0xab   :  { %4403 = vmatpush3.bf16.msra.mxu0 %v4402_v60  ;;  %v4456_v60 = vpack.c.bf16 %v351_v53, %v350_v52  ;;  %v4488_v0 = vpack.c.bf16 %v383_v55, %v382_v54  ;;  %v340_v35 = vld [vmem:[#allocation5 + $0x640] sm:$0xff]  ;;  %v341_v36 = vld [vmem:[#allocation5 + $0x648] sm:$0xff]  ;;  %v359_v41 = vld [vmem:[#allocation5 + $0x6d8] sm:$0xff] }
  0xac   :  { %4405 = vmatprep.subr.bf16.mxu0 %v4404_v62  ;;  %v335_v62 = vld [vmem:[#allocation5 + $0x618] sm:$0xff]  ;;  %v372_v37 = vld [vmem:[#allocation5 + $0x740] sm:$0xff]  ;;  %v373_v39 = vld [vmem:[#allocation5 + $0x748] sm:$0xff] }
  0xad   :  { %4435 = vmatpush3.bf16.msra.mxu1 %v4434_v61  ;;  %v334_v61 = vld [vmem:[#allocation5 + $0x610] sm:$0xff]  ;;  %v391_v43 = vld [vmem:[#allocation5 + $0x7d8] sm:$0xff]  ;;  %v360_v52 = vld [vmem:[#allocation5 + $0x6e0] sm:$0xff] }
  0xae   :  { %4437 = vmatprep.subr.bf16.mxu1 %v4436_v2  ;;  %v352_v2 = vld [vmem:[#allocation5 + $0x6a0] sm:$0xff]  ;;  %v4458_v7 = vpack.c.bf16 %v335_v62, %v334_v61  ;;  %v390_v42 = vld [vmem:[#allocation5 + $0x7d0] sm:$0xff]  ;;  %v343_v48 = vld [vmem:[#allocation5 + $0x658] sm:$0xff] }
  0xaf   :  { %4407 = vmatpush3.bf16.msra.mxu0 %v4406_v8  ;;  %v98_v8 = vld [vmem:[#allocation2 + $0x78] sm:$0xff]  ;;  %v375_v51 = vld [vmem:[#allocation5 + $0x758] sm:$0xff]  ;;  %v361_v53 = vld [vmem:[#allocation5 + $0x6e8] sm:$0xff] }
  0xb0   :  { %4409 = vmatprep.subr.bf16.mxu0 %v4408_v10  ;;  %v4460_v10 = vpack.c.bf16 %v353_v3, %v352_v2  ;;  %v342_v47 = vld [vmem:[#allocation5 + $0x650] sm:$0xff]  ;;  %v392_v54 = vld [vmem:[#allocation5 + $0x7e0] sm:$0xff]  ;;  %v393_v55 = vld [vmem:[#allocation5 + $0x7e8] sm:$0xff] }
  0xb1   :  { %4439 = vmatpush3.bf16.msra.mxu1 %v4438_v9  ;;  %v4490_v9 = vpack.c.bf16 %v367_v1, %v366_v63  ;;  %v374_v49 = vld [vmem:[#allocation5 + $0x750] sm:$0xff]  ;;  %v376_v61 = vld [vmem:[#allocation5 + $0x760] sm:$0xff]  ;;  %v4508_v62 = vpack.c.bf16 %v393_v55, %v392_v54  ;;  %v377_v63 = vld [vmem:[#allocation5 + $0x768] sm:$0xff] }
  0xb2   :  { %4441 = vmatprep.subr.bf16.mxu1 %v4440_v14  ;;  %v4492_v14 = vpack.c.bf16 %v385_v5, %v384_v4  ;;  %v363_v1 = vld [vmem:[#allocation5 + $0x6f8] sm:$0xff]  ;;  %v394_v2 = vld [vmem:[#allocation5 + $0x7f0] sm:$0xff]  ;;  %v4510_v5 = vpack.c.bf16 %v377_v63, %v376_v61 }
  0xb3   :  { %4411 = vmatpush3.bf16.msra.mxu0 %v4410_v20  ;;  %v4462_v20 = vpack.c.bf16 %v337_v12, %v336_v11  ;;  %v395_v3 = vld [vmem:[#allocation5 + $0x7f8] sm:$0xff]  ;;  %v412_v12 = vld [vmem:[#allocation5 + $0x880] sm:$0xff]  ;;  %v450_v54 = vld [vmem:[#allocation5 + $0x9b0] sm:$0xff] }
  0xb4   :  { %4413 = vmatprep.subr.bf16.mxu0 %v4412_v22  ;;  %v4464_v22 = vpack.c.bf16 %v355_v17, %v354_v16  ;;  %v379_v11 = vld [vmem:[#allocation5 + $0x778] sm:$0xff]  ;;  %v434_v61 = vld [vmem:[#allocation5 + $0x930] sm:$0xff] }
  0xb5   :  { %4443 = vmatpush3.bf16.msra.mxu1 %v4442_v21  ;;  %v4494_v21 = vpack.c.bf16 %v369_v15, %v368_v13  ;;  %v413_v13 = vld [vmem:[#allocation5 + $0x888] sm:$0xff]  ;;  %v451_v55 = vld [vmem:[#allocation5 + $0x9b8] sm:$0xff] }
  0xb6   :  { %4445 = vmatprep.subr.bf16.mxu1 %v4444_v26  ;;  %v4496_v26 = vpack.c.bf16 %v387_v19, %v386_v18  ;;  %v445_v15 = vld [vmem:[#allocation5 + $0x988] sm:$0xff]  ;;  %v4516_v18 = vpack.c.bf16 %v413_v13, %v412_v12  ;;  %v396_v19 = vld [vmem:[#allocation5 + $0x800] sm:$0xff]  ;;  %v435_v63 = vld [vmem:[#allocation5 + $0x938] sm:$0xff] }
  0xb7   :  { %4415 = vmatpush3.bf16.msra.mxu0 %v4414_v32  ;;  %v4466_v32 = vpack.c.bf16 %v339_v24, %v338_v23  ;;  %v429_v23 = vld [vmem:[#allocation5 + $0x908] sm:$0xff]  ;;  %v414_v24 = vld [vmem:[#allocation5 + $0x890] sm:$0xff]  ;;  %v423_v13 = vld [vmem:[#allocation5 + $0x8d8] sm:$0xff] }
  0xb8   :  { %4417 = vmatprep.subr.bf16.mxu0 %v4416_v34  ;;  %v4468_v34 = vpack.c.bf16 %v357_v29, %v356_v28  ;;  %v95_v28 = vld [vmem:[#allocation2 + $0x60] sm:$0xff]  ;;  %v422_v12 = vld [vmem:[#allocation5 + $0x8d0] sm:$0xff] }
  0xb9   :  { %4447 = vmatpush3.bf16.msra.mxu1 %v4446_v33  ;;  %v4498_v33 = vpack.c.bf16 %v371_v27, %v370_v25  ;;  %v415_v25 = vld [vmem:[#allocation5 + $0x898] sm:$0xff] }
  0xba   :  { %4449 = vmatprep.subr.bf16.mxu1 %v4448_v38  ;;  %v4500_v38 = vpack.c.bf16 %v389_v31, %v388_v30  ;;  %v447_v27 = vld [vmem:[#allocation5 + $0x998] sm:$0xff]  ;;  %v97_v30 = vld [vmem:[#allocation2 + $0x70] sm:$0xff] }
  0xbb   :  { %4419 = vmatpush3.bf16.msra.mxu0 %v4418_v44  ;;  %v4470_v44 = vpack.c.bf16 %v341_v36, %v340_v35  ;;  %v430_v35 = vld [vmem:[#allocation5 + $0x910] sm:$0xff] }
  0xbc   :  { %4453 = vmatprep.subr.bf16.mxu0 %v4452_v46  ;;  %v4472_v46 = vpack.c.bf16 %v359_v41, %v358_v40  ;;  %v448_v40 = vld [vmem:[#allocation5 + $0x9a0] sm:$0xff]  ;;  %v449_v41 = vld [vmem:[#allocation5 + $0x9a8] sm:$0xff] }
  0xbd   :  { %4451 = vmatpush3.bf16.msra.mxu1 %v4450_v45  ;;  %v4502_v45 = vpack.c.bf16 %v373_v39, %v372_v37  ;;  %v431_v37 = vld [vmem:[#allocation5 + $0x918] sm:$0xff]  ;;  %v417_v39 = vld [vmem:[#allocation5 + $0x8a8] sm:$0xff] }
  0xbe   :  { %4485 = vmatprep.subr.bf16.mxu1 %v4484_v50  ;;  %1400 = vmatmul.mubr.f32.vlgmr.msra.gmra.mrb[4].mxu0 %v91_v56  ;;  %v4504_v50 = vpack.c.bf16 %v391_v43, %v390_v42  ;;  %v4474_v56 = vpack.c.bf16 %v343_v48, %v342_v47  ;;  %v100_v42 = vld [vmem:[#allocation2 + $0x88] sm:$0xff]  ;;  %v401_v48 = vld [vmem:[#allocation5 + $0x828] sm:$0xff] }
  0xbf   :  { %4455 = vmatpush3.bf16.msra.mxu0 %v4454_v57  ;;  %1539 = vmatprep.mubr.f32.mxu0 %v96_v6  ;;  %v4506_v57 = vpack.c.bf16 %v375_v51, %v374_v49  ;;  %v400_v47 = vld [vmem:[#allocation5 + $0x820] sm:$0xff]  ;;  %v433_v51 = vld [vmem:[#allocation5 + $0x928] sm:$0xff] }
  0xc0   :  { %1470 = vmatmul.mubr.f32.vlgmr.msra.gmra.mrb[4].mxu1 %v93_v58  ;;  %4457 = vmatprep.subr.bf16.mxu0 %v4456_v60  ;;  %v4476_v58 = vpack.c.bf16 %v361_v53, %v360_v52  ;;  %v345_v60 = vld [vmem:[#allocation5 + $0x668] sm:$0xff]  ;;  %v432_v49 = vld [vmem:[#allocation5 + $0x920] sm:$0xff]  ;;  %v418_v52 = vld [vmem:[#allocation5 + $0x8b0] sm:$0xff] }
  0xc1   :  { %4487 = vmatpush3.bf16.msra.mxu1 %v4486_v59  ;;  %1609 = vmatprep.mubr.f32.mxu1 %v98_v8  ;;  %v344_v59 = vld [vmem:[#allocation5 + $0x660] sm:$0xff]  ;;  %v347_v8 = vld [vmem:[#allocation5 + $0x678] sm:$0xff] }
  0xc2   :  { %4489 = vmatprep.subr.bf16.mxu1 %v4488_v0  ;;  %v362_v0 = vld [vmem:[#allocation5 + $0x6f0] sm:$0xff]  ;;  %v4478_v4 = vpack.c.bf16 %v345_v60, %v344_v59  ;;  %v419_v53 = vld [vmem:[#allocation5 + $0x8b8] sm:$0xff] }
  0xc3   :  { %4459 = vmatpush3.bf16.msra.mxu0 %v4458_v7  ;;  %v4480_v6 = vpack.c.bf16 %v363_v1, %v362_v0  ;;  %v346_v7 = vld [vmem:[#allocation5 + $0x670] sm:$0xff]  ;;  %v403_v60 = vld [vmem:[#allocation5 + $0x838] sm:$0xff]  ;;  %v420_v0 = vld [vmem:[#allocation5 + $0x8c0] sm:$0xff] }
  0xc4   :  { %4461 = vmatprep.subr.bf16.mxu0 %v4460_v10  ;;  %v4512_v10 = vpack.c.bf16 %v395_v3, %v394_v2  ;;  %v4482_v16 = vpack.c.bf16 %v347_v8, %v346_v7  ;;  %v402_v59 = vld [vmem:[#allocation5 + $0x830] sm:$0xff]  ;;  %v421_v1 = vld [vmem:[#allocation5 + $0x8c8] sm:$0xff]  ;;  %v452_v2 = vld [vmem:[#allocation5 + $0x9c0] sm:$0xff] }
  0xc5   :  { %4491 = vmatpush3.bf16.msra.mxu1 %v4490_v9  ;;  %v378_v9 = vld [vmem:[#allocation5 + $0x770] sm:$0xff]  ;;  %v453_v3 = vld [vmem:[#allocation5 + $0x9c8] sm:$0xff]  ;;  %v404_v7 = vld [vmem:[#allocation5 + $0x840] sm:$0xff] }
  0xc6   :  { %4493 = vmatprep.subr.bf16.mxu1 %v4492_v14  ;;  %v444_v14 = vld [vmem:[#allocation5 + $0x980] sm:$0xff]  ;;  %v4514_v17 = vpack.c.bf16 %v379_v11, %v378_v9  ;;  %v405_v8 = vld [vmem:[#allocation5 + $0x848] sm:$0xff] }
  0xc7   :  { %4463 = vmatpush3.bf16.msra.mxu0 %v4462_v20  ;;  %v397_v20 = vld [vmem:[#allocation5 + $0x808] sm:$0xff]  ;;  %v436_v9 = vld [vmem:[#allocation5 + $0x940] sm:$0xff] }
  0xc8   :  { %4465 = vmatprep.subr.bf16.mxu0 %v4464_v22  ;;  %v4548_v22 = vpack.c.bf16 %v445_v15, %v444_v14  ;;  %v4518_v29 = vpack.c.bf16 %v397_v20, %v396_v19  ;;  %v437_v11 = vld [vmem:[#allocation5 + $0x948] sm:$0xff]  ;;  %v454_v14 = vld [vmem:[#allocation5 + $0x9d0] sm:$0xff]  ;;  %v455_v15 = vld [vmem:[#allocation5 + $0x9d8] sm:$0xff] }
  0xc9   :  { %4495 = vmatpush3.bf16.msra.mxu1 %v4494_v21  ;;  %v428_v21 = vld [vmem:[#allocation5 + $0x900] sm:$0xff]  ;;  %v406_v19 = vld [vmem:[#allocation5 + $0x850] sm:$0xff]  ;;  %v407_v20 = vld [vmem:[#allocation5 + $0x858] sm:$0xff] }
  0xca   :  { %4497 = vmatprep.subr.bf16.mxu1 %v4496_v26  ;;  %v446_v26 = vld [vmem:[#allocation5 + $0x990] sm:$0xff]  ;;  %v4550_v31 = vpack.c.bf16 %v429_v23, %v428_v21  ;;  %v439_v23 = vld [vmem:[#allocation5 + $0x958] sm:$0xff] }
  0xcb   :  { %4467 = vmatpush3.bf16.msra.mxu0 %v4466_v32  ;;  %v4520_v32 = vpack.c.bf16 %v415_v25, %v414_v24  ;;  %v4552_v36 = vpack.c.bf16 %v447_v27, %v446_v26  ;;  %v438_v21 = vld [vmem:[#allocation5 + $0x950] sm:$0xff]  ;;  %v424_v24 = vld [vmem:[#allocation5 + $0x8e0] sm:$0xff]  ;;  %v425_v25 = vld [vmem:[#allocation5 + $0x8e8] sm:$0xff] }
  0xcc   :  { %4469 = vmatprep.subr.bf16.mxu0 %v4468_v34  ;;  %v399_v34 = vld [vmem:[#allocation5 + $0x818] sm:$0xff]  ;;  %v456_v26 = vld [vmem:[#allocation5 + $0x9e0] sm:$0xff]  ;;  %v457_v27 = vld [vmem:[#allocation5 + $0x9e8] sm:$0xff] }
  0xcd   :  { %4499 = vmatpush3.bf16.msra.mxu1 %v4498_v33  ;;  %v398_v33 = vld [vmem:[#allocation5 + $0x810] sm:$0xff] }
  0xce   :  { %4501 = vmatprep.subr.bf16.mxu1 %v4500_v38  ;;  %v416_v38 = vld [vmem:[#allocation5 + $0x8a0] sm:$0xff]  ;;  %v4522_v43 = vpack.c.bf16 %v399_v34, %v398_v33  ;;  %v4572_v34 = vpack.c.bf16 %v457_v27, %v456_v26  ;;  %v514_v26 = vld [vmem:[#allocation5 + $0xbb0] sm:$0xff]  ;;  %v515_v27 = vld [vmem:[#allocation5 + $0xbb8] sm:$0xff] }
  0xcf   :  { %4471 = vmatpush3.bf16.msra.mxu0 %v4470_v44  ;;  %v102_v44 = vld [vmem:[#allocation2 + $0x98] sm:$0xff]  ;;  %v440_v33 = vld [vmem:[#allocation5 + $0x960] sm:$0xff] }
  0xd0   :  { %4473 = vmatprep.subr.bf16.mxu0 %v4472_v46  ;;  %v4524_v46 = vpack.c.bf16 %v417_v39, %v416_v38  ;;  %v458_v38 = vld [vmem:[#allocation5 + $0x9f0] sm:$0xff]  ;;  %v459_v39 = vld [vmem:[#allocation5 + $0x9f8] sm:$0xff] }
  0xd1   :  { %4503 = vmatpush3.bf16.msra.mxu1 %v4502_v45  ;;  %v4554_v45 = vpack.c.bf16 %v431_v37, %v430_v35  ;;  %v441_v35 = vld [vmem:[#allocation5 + $0x968] sm:$0xff]  ;;  %v427_v37 = vld [vmem:[#allocation5 + $0x8f8] sm:$0xff] }
  0xd2   :  { %4505 = vmatprep.subr.bf16.mxu1 %v4504_v50  ;;  %v4556_v50 = vpack.c.bf16 %v449_v41, %v448_v40  ;;  %v4574_v41 = vpack.c.bf16 %v441_v35, %v440_v33  ;;  %v498_v33 = vld [vmem:[#allocation5 + $0xb30] sm:$0xff]  ;;  %v499_v35 = vld [vmem:[#allocation5 + $0xb38] sm:$0xff] }
  0xd3   :  { %4475 = vmatpush3.bf16.msra.mxu0 %v4474_v56  ;;  %v4526_v56 = vpack.c.bf16 %v401_v48, %v400_v47  ;;  %v443_v47 = vld [vmem:[#allocation5 + $0x978] sm:$0xff]  ;;  %v476_v48 = vld [vmem:[#allocation5 + $0xa80] sm:$0xff] }
  0xd4   :  { %4477 = vmatprep.subr.bf16.mxu0 %v4476_v58  ;;  %v4528_v58 = vpack.c.bf16 %v419_v53, %v418_v52 }
  0xd5   :  { %4507 = vmatpush3.bf16.msra.mxu1 %v4506_v57  ;;  %v4558_v57 = vpack.c.bf16 %v433_v51, %v432_v49  ;;  %v477_v49 = vld [vmem:[#allocation5 + $0xa88] sm:$0xff] }
  0xd6   :  { %4509 = vmatprep.subr.bf16.mxu1 %v4508_v62  ;;  %v4560_v62 = vpack.c.bf16 %v451_v55, %v450_v54  ;;  %v509_v51 = vld [vmem:[#allocation5 + $0xb88] sm:$0xff]  ;;  %v4580_v54 = vpack.c.bf16 %v477_v49, %v476_v48  ;;  %v460_v55 = vld [vmem:[#allocation5 + $0xa00] sm:$0xff]  ;;  %v486_v48 = vld [vmem:[#allocation5 + $0xad0] sm:$0xff] }
  0xd7   :  { %4479 = vmatpush3.bf16.msra.mxu0 %v4478_v4  ;;  %v4530_v4 = vpack.c.bf16 %v403_v60, %v402_v59  ;;  %v493_v59 = vld [vmem:[#allocation5 + $0xb08] sm:$0xff]  ;;  %v478_v60 = vld [vmem:[#allocation5 + $0xa90] sm:$0xff]  ;;  %v487_v49 = vld [vmem:[#allocation5 + $0xad8] sm:$0xff] }
  0xd8   :  { %4481 = vmatprep.subr.bf16.mxu0 %v4480_v6  ;;  %v4532_v6 = vpack.c.bf16 %v421_v1, %v420_v0  ;;  %v99_v0 = vld [vmem:[#allocation2 + $0x80] sm:$0xff] }
  0xd9   :  { %4511 = vmatpush3.bf16.msra.mxu1 %v4510_v5  ;;  %v4562_v5 = vpack.c.bf16 %v435_v63, %v434_v61  ;;  %v479_v61 = vld [vmem:[#allocation5 + $0xa98] sm:$0xff] }
  0xda   :  { %4513 = vmatprep.subr.bf16.mxu1 %v4512_v10  ;;  %v4564_v10 = vpack.c.bf16 %v453_v3, %v452_v2  ;;  %v511_v63 = vld [vmem:[#allocation5 + $0xb98] sm:$0xff]  ;;  %v101_v2 = vld [vmem:[#allocation2 + $0x90] sm:$0xff] }
  0xdb   :  { %4483 = vmatpush3.bf16.msra.mxu0 %v4482_v16  ;;  %v4534_v16 = vpack.c.bf16 %v405_v8, %v404_v7  ;;  %v494_v7 = vld [vmem:[#allocation5 + $0xb10] sm:$0xff] }
  0xdc   :  { %4517 = vmatprep.subr.bf16.mxu0 %v4516_v18  ;;  %v4536_v18 = vpack.c.bf16 %v423_v13, %v422_v12  ;;  %v512_v12 = vld [vmem:[#allocation5 + $0xba0] sm:$0xff]  ;;  %v513_v13 = vld [vmem:[#allocation5 + $0xba8] sm:$0xff] }
  0xdd   :  { %4515 = vmatpush3.bf16.msra.mxu1 %v4514_v17  ;;  %v4566_v17 = vpack.c.bf16 %v437_v11, %v436_v9  ;;  %v495_v9 = vld [vmem:[#allocation5 + $0xb18] sm:$0xff]  ;;  %v481_v11 = vld [vmem:[#allocation5 + $0xaa8] sm:$0xff] }
  0xde   :  { %4549 = vmatprep.subr.bf16.mxu1 %v4548_v22  ;;  %1540 = vmatmul.mubr.f32.vlgmr.msra.gmra.mrb[6].mxu0 %v95_v28  ;;  %v4568_v22 = vpack.c.bf16 %v455_v15, %v454_v14  ;;  %v4538_v28 = vpack.c.bf16 %v407_v20, %v406_v19  ;;  %v104_v14 = vld [vmem:[#allocation2 + $0xa8] sm:$0xff]  ;;  %v465_v20 = vld [vmem:[#allocation5 + $0xa28] sm:$0xff] }
  0xdf   :  { %4519 = vmatpush3.bf16.msra.mxu0 %v4518_v29  ;;  %1679 = vmatprep.mubr.f32.mxu0 %v100_v42  ;;  %v4570_v29 = vpack.c.bf16 %v439_v23, %v438_v21  ;;  %v464_v19 = vld [vmem:[#allocation5 + $0xa20] sm:$0xff]  ;;  %v497_v23 = vld [vmem:[#allocation5 + $0xb28] sm:$0xff] }
  0xe0   :  { %1610 = vmatmul.mubr.f32.vlgmr.msra.gmra.mrb[6].mxu1 %v97_v30  ;;  %4521 = vmatprep.subr.bf16.mxu0 %v4520_v32  ;;  %v4540_v30 = vpack.c.bf16 %v425_v25, %v424_v24  ;;  %v409_v32 = vld [vmem:[#allocation5 + $0x868] sm:$0xff]  ;;  %v496_v21 = vld [vmem:[#allocation5 + $0xb20] sm:$0xff]  ;;  %v482_v24 = vld [vmem:[#allocation5 + $0xab0] sm:$0xff] }
  0xe1   :  { %4551 = vmatpush3.bf16.msra.mxu1 %v4550_v31  ;;  %1749 = vmatprep.mubr.f32.mxu1 %v102_v44  ;;  %v408_v31 = vld [vmem:[#allocation5 + $0x860] sm:$0xff]  ;;  %v411_v44 = vld [vmem:[#allocation5 + $0x878] sm:$0xff] }
  0xe2   :  { %4553 = vmatprep.subr.bf16.mxu1 %v4552_v36  ;;  %v426_v36 = vld [vmem:[#allocation5 + $0x8f0] sm:$0xff]  ;;  %v4542_v40 = vpack.c.bf16 %v409_v32, %v408_v31  ;;  %v483_v25 = vld [vmem:[#allocation5 + $0xab8] sm:$0xff] }
  0xe3   :  { %4523 = vmatpush3.bf16.msra.mxu0 %v4522_v43  ;;  %v4544_v42 = vpack.c.bf16 %v427_v37, %v426_v36  ;;  %v410_v43 = vld [vmem:[#allocation5 + $0x870] sm:$0xff]  ;;  %v467_v32 = vld [vmem:[#allocation5 + $0xa38] sm:$0xff]  ;;  %v484_v36 = vld [vmem:[#allocation5 + $0xac0] sm:$0xff] }
  0xe4   :  { %4525 = vmatprep.subr.bf16.mxu0 %v4524_v46  ;;  %v4576_v46 = vpack.c.bf16 %v459_v39, %v458_v38  ;;  %v4546_v52 = vpack.c.bf16 %v411_v44, %v410_v43  ;;  %v466_v31 = vld [vmem:[#allocation5 + $0xa30] sm:$0xff]  ;;  %v485_v37 = vld [vmem:[#allocation5 + $0xac8] sm:$0xff]  ;;  %v516_v38 = vld [vmem:[#allocation5 + $0xbc0] sm:$0xff] }
  0xe5   :  { %4555 = vmatpush3.bf16.msra.mxu1 %v4554_v45  ;;  %v442_v45 = vld [vmem:[#allocation5 + $0x970] sm:$0xff]  ;;  %v517_v39 = vld [vmem:[#allocation5 + $0xbc8] sm:$0xff]  ;;  %v468_v43 = vld [vmem:[#allocation5 + $0xa40] sm:$0xff] }
  0xe6   :  { %4557 = vmatprep.subr.bf16.mxu1 %v4556_v50  ;;  %v508_v50 = vld [vmem:[#allocation5 + $0xb80] sm:$0xff]  ;;  %v4578_v53 = vpack.c.bf16 %v443_v47, %v442_v45  ;;  %v469_v44 = vld [vmem:[#allocation5 + $0xa48] sm:$0xff] }
  0xe7   :  { %4527 = vmatpush3.bf16.msra.mxu0 %v4526_v56  ;;  %v461_v56 = vld [vmem:[#allocation5 + $0xa08] sm:$0xff]  ;;  %v500_v45 = vld [vmem:[#allocation5 + $0xb40] sm:$0xff] }
  0xe8   :  { %4529 = vmatprep.subr.bf16.mxu0 %v4528_v58  ;;  %v4612_v58 = vpack.c.bf16 %v509_v51, %v508_v50  ;;  %v4582_v1 = vpack.c.bf16 %v461_v56, %v460_v55  ;;  %v501_v47 = vld [vmem:[#allocation5 + $0xb48] sm:$0xff]  ;;  %v518_v50 = vld [vmem:[#allocation5 + $0xbd0] sm:$0xff]  ;;  %v519_v51 = vld [vmem:[#allocation5 + $0xbd8] sm:$0xff] }
  0xe9   :  { %4559 = vmatpush3.bf16.msra.mxu1 %v4558_v57  ;;  %v492_v57 = vld [vmem:[#allocation5 + $0xb00] sm:$0xff]  ;;  %v470_v55 = vld [vmem:[#allocation5 + $0xa50] sm:$0xff]  ;;  %v471_v56 = vld [vmem:[#allocation5 + $0xa58] sm:$0xff] }
  0xea   :  { %4561 = vmatprep.subr.bf16.mxu1 %v4560_v62  ;;  %v510_v62 = vld [vmem:[#allocation5 + $0xb90] sm:$0xff]  ;;  %v4614_v3 = vpack.c.bf16 %v493_v59, %v492_v57  ;;  %v503_v59 = vld [vmem:[#allocation5 + $0xb58] sm:$0xff] }
  0xeb   :  { %4531 = vmatpush3.bf16.msra.mxu0 %v4530_v4  ;;  %v4584_v4 = vpack.c.bf16 %v479_v61, %v478_v60  ;;  %v4616_v8 = vpack.c.bf16 %v511_v63, %v510_v62  ;;  %v502_v57 = vld [vmem:[#allocation5 + $0xb50] sm:$0xff]  ;;  %v488_v60 = vld [vmem:[#allocation5 + $0xae0] sm:$0xff]  ;;  %v489_v61 = vld [vmem:[#allocation5 + $0xae8] sm:$0xff] }
  0xec   :  { %4533 = vmatprep.subr.bf16.mxu0 %v4532_v6  ;;  %v463_v6 = vld [vmem:[#allocation5 + $0xa18] sm:$0xff]  ;;  %v520_v62 = vld [vmem:[#allocation5 + $0xbe0] sm:$0xff]  ;;  %v521_v63 = vld [vmem:[#allocation5 + $0xbe8] sm:$0xff] }
  0xed   :  { %4563 = vmatpush3.bf16.msra.mxu1 %v4562_v5  ;;  %v462_v5 = vld [vmem:[#allocation5 + $0xa10] sm:$0xff] }
  0xee   :  { %4565 = vmatprep.subr.bf16.mxu1 %v4564_v10  ;;  %v480_v10 = vld [vmem:[#allocation5 + $0xaa0] sm:$0xff]  ;;  %v4586_v15 = vpack.c.bf16 %v463_v6, %v462_v5  ;;  %v4636_v6 = vpack.c.bf16 %v521_v63, %v520_v62  ;;  %v578_v62 = vld [vmem:[#allocation5 + $0xdb0] sm:$0xff]  ;;  %v579_v63 = vld [vmem:[#allocation5 + $0xdb8] sm:$0xff] }
  0xef   :  { %4535 = vmatpush3.bf16.msra.mxu0 %v4534_v16  ;;  %v106_v16 = vld [vmem:[#allocation2 + $0xb8] sm:$0xff]  ;;  %v504_v5 = vld [vmem:[#allocation5 + $0xb60] sm:$0xff] }
  0xf0   :  { %4537 = vmatprep.subr.bf16.mxu0 %v4536_v18  ;;  %v4588_v18 = vpack.c.bf16 %v481_v11, %v480_v10  ;;  %v522_v10 = vld [vmem:[#allocation5 + $0xbf0] sm:$0xff]  ;;  %v523_v11 = vld [vmem:[#allocation5 + $0xbf8] sm:$0xff] }
  0xf1   :  { %4567 = vmatpush3.bf16.msra.mxu1 %v4566_v17  ;;  %v4618_v17 = vpack.c.bf16 %v495_v9, %v494_v7  ;;  %v505_v7 = vld [vmem:[#allocation5 + $0xb68] sm:$0xff]  ;;  %v491_v9 = vld [vmem:[#allocation5 + $0xaf8] sm:$0xff] }
  0xf2   :  { %4569 = vmatprep.subr.bf16.mxu1 %v4568_v22  ;;  %v4620_v22 = vpack.c.bf16 %v513_v13, %v512_v12  ;;  %v4638_v13 = vpack.c.bf16 %v505_v7, %v504_v5  ;;  %v562_v5 = vld [vmem:[#allocation5 + $0xd30] sm:$0xff]  ;;  %v563_v7 = vld [vmem:[#allocation5 + $0xd38] sm:$0xff] }
  0xf3   :  { %4539 = vmatpush3.bf16.msra.mxu0 %v4538_v28  ;;  %v4590_v28 = vpack.c.bf16 %v465_v20, %v464_v19  ;;  %v507_v19 = vld [vmem:[#allocation5 + $0xb78] sm:$0xff]  ;;  %v540_v20 = vld [vmem:[#allocation5 + $0xc80] sm:$0xff] }
  0xf4   :  { %4541 = vmatprep.subr.bf16.mxu0 %v4540_v30  ;;  %v4592_v30 = vpack.c.bf16 %v483_v25, %v482_v24 }
  0xf5   :  { %4571 = vmatpush3.bf16.msra.mxu1 %v4570_v29  ;;  %v4622_v29 = vpack.c.bf16 %v497_v23, %v496_v21  ;;  %v541_v21 = vld [vmem:[#allocation5 + $0xc88] sm:$0xff] }
  0xf6   :  { %4573 = vmatprep.subr.bf16.mxu1 %v4572_v34  ;;  %v4624_v34 = vpack.c.bf16 %v515_v27, %v514_v26  ;;  %v573_v23 = vld [vmem:[#allocation5 + $0xd88] sm:$0xff]  ;;  %v4644_v26 = vpack.c.bf16 %v541_v21, %v540_v20  ;;  %v524_v27 = vld [vmem:[#allocation5 + $0xc00] sm:$0xff]  ;;  %v550_v20 = vld [vmem:[#allocation5 + $0xcd0] sm:$0xff] }
  0xf7   :  { %4543 = vmatpush3.bf16.msra.mxu0 %v4542_v40  ;;  %v4594_v40 = vpack.c.bf16 %v467_v32, %v466_v31  ;;  %v557_v31 = vld [vmem:[#allocation5 + $0xd08] sm:$0xff]  ;;  %v542_v32 = vld [vmem:[#allocation5 + $0xc90] sm:$0xff]  ;;  %v551_v21 = vld [vmem:[#allocation5 + $0xcd8] sm:$0xff] }
  0xf8   :  { %4545 = vmatprep.subr.bf16.mxu0 %v4544_v42  ;;  %v4596_v42 = vpack.c.bf16 %v485_v37, %v484_v36  ;;  %v103_v36 = vld [vmem:[#allocation2 + $0xa0] sm:$0xff] }
  0xf9   :  { %4575 = vmatpush3.bf16.msra.mxu1 %v4574_v41  ;;  %v4626_v41 = vpack.c.bf16 %v499_v35, %v498_v33  ;;  %v543_v33 = vld [vmem:[#allocation5 + $0xc98] sm:$0xff] }
  0xfa   :  { %4577 = vmatprep.subr.bf16.mxu1 %v4576_v46  ;;  %v4628_v46 = vpack.c.bf16 %v517_v39, %v516_v38  ;;  %v575_v35 = vld [vmem:[#allocation5 + $0xd98] sm:$0xff]  ;;  %v105_v38 = vld [vmem:[#allocation2 + $0xb0] sm:$0xff] }
  0xfb   :  { %4547 = vmatpush3.bf16.msra.mxu0 %v4546_v52  ;;  %v4598_v52 = vpack.c.bf16 %v469_v44, %v468_v43  ;;  %v558_v43 = vld [vmem:[#allocation5 + $0xd10] sm:$0xff] }
  0xfc   :  { %4581 = vmatprep.subr.bf16.mxu0 %v4580_v54  ;;  %v4600_v54 = vpack.c.bf16 %v487_v49, %v486_v48  ;;  %v576_v48 = vld [vmem:[#allocation5 + $0xda0] sm:$0xff]  ;;  %v577_v49 = vld [vmem:[#allocation5 + $0xda8] sm:$0xff] }
  0xfd   :  { %4579 = vmatpush3.bf16.msra.mxu1 %v4578_v53  ;;  %v4630_v53 = vpack.c.bf16 %v501_v47, %v500_v45  ;;  %v559_v45 = vld [vmem:[#allocation5 + $0xd18] sm:$0xff]  ;;  %v545_v47 = vld [vmem:[#allocation5 + $0xca8] sm:$0xff] }
  0xfe   :  { %4613 = vmatprep.subr.bf16.mxu1 %v4612_v58  ;;  %1680 = vmatmul.mubr.f32.vlgmr.msra.gmra.mrb[8].mxu0 %v99_v0  ;;  %v4632_v58 = vpack.c.bf16 %v519_v51, %v518_v50  ;;  %v4602_v0 = vpack.c.bf16 %v471_v56, %v470_v55  ;;  %v108_v50 = vld [vmem:[#allocation2 + $0xc8] sm:$0xff]  ;;  %v529_v56 = vld [vmem:[#allocation5 + $0xc28] sm:$0xff] }
  0xff   :  { %4583 = vmatpush3.bf16.msra.mxu0 %v4582_v1  ;;  %1819 = vmatprep.mubr.f32.mxu0 %v104_v14  ;;  %v4634_v1 = vpack.c.bf16 %v503_v59, %v502_v57  ;;  %v528_v55 = vld [vmem:[#allocation5 + $0xc20] sm:$0xff]  ;;  %v561_v59 = vld [vmem:[#allocation5 + $0xd28] sm:$0xff] }
 0x100   :  { %1750 = vmatmul.mubr.f32.vlgmr.msra.gmra.mrb[8].mxu1 %v101_v2  ;;  %4585 = vmatprep.subr.bf16.mxu0 %v4584_v4  ;;  %v4604_v2 = vpack.c.bf16 %v489_v61, %v488_v60  ;;  %v473_v4 = vld [vmem:[#allocation5 + $0xa68] sm:$0xff]  ;;  %v560_v57 = vld [vmem:[#allocation5 + $0xd20] sm:$0xff]  ;;  %v546_v60 = vld [vmem:[#allocation5 + $0xcb0] sm:$0xff] }
 0x101   :  { %4615 = vmatpush3.bf16.msra.mxu1 %v4614_v3  ;;  %1889 = vmatprep.mubr.f32.mxu1 %v106_v16  ;;  %v472_v3 = vld [vmem:[#allocation5 + $0xa60] sm:$0xff]  ;;  %v475_v16 = vld [vmem:[#allocation5 + $0xa78] sm:$0xff] }
 0x102   :  { %4617 = vmatprep.subr.bf16.mxu1 %v4616_v8  ;;  %v490_v8 = vld [vmem:[#allocation5 + $0xaf0] sm:$0xff]  ;;  %v4606_v12 = vpack.c.bf16 %v473_v4, %v472_v3  ;;  %v547_v61 = vld [vmem:[#allocation5 + $0xcb8] sm:$0xff] }
 0x103   :  { %4587 = vmatpush3.bf16.msra.mxu0 %v4586_v15  ;;  %v4608_v14 = vpack.c.bf16 %v491_v9, %v490_v8  ;;  %v474_v15 = vld [vmem:[#allocation5 + $0xa70] sm:$0xff]  ;;  %v531_v4 = vld [vmem:[#allocation5 + $0xc38] sm:$0xff]  ;;  %v548_v8 = vld [vmem:[#allocation5 + $0xcc0] sm:$0xff] }
 0x104   :  { %4589 = vmatprep.subr.bf16.mxu0 %v4588_v18  ;;  %v4640_v18 = vpack.c.bf16 %v523_v11, %v522_v10  ;;  %v4610_v24 = vpack.c.bf16 %v475_v16, %v474_v15  ;;  %v530_v3 = vld [vmem:[#allocation5 + $0xc30] sm:$0xff]  ;;  %v549_v9 = vld [vmem:[#allocation5 + $0xcc8] sm:$0xff]  ;;  %v580_v10 = vld [vmem:[#allocation5 + $0xdc0] sm:$0xff] }
 0x105   :  { %4619 = vmatpush3.bf16.msra.mxu1 %v4618_v17  ;;  %v506_v17 = vld [vmem:[#allocation5 + $0xb70] sm:$0xff]  ;;  %v581_v11 = vld [vmem:[#allocation5 + $0xdc8] sm:$0xff]  ;;  %v532_v15 = vld [vmem:[#allocation5 + $0xc40] sm:$0xff] }
 0x106   :  { %4621 = vmatprep.subr.bf16.mxu1 %v4620_v22  ;;  %v572_v22 = vld [vmem:[#allocation5 + $0xd80] sm:$0xff]  ;;  %v4642_v25 = vpack.c.bf16 %v507_v19, %v506_v17  ;;  %v533_v16 = vld [vmem:[#allocation5 + $0xc48] sm:$0xff] }
 0x107   :  { %4591 = vmatpush3.bf16.msra.mxu0 %v4590_v28  ;;  %v525_v28 = vld [vmem:[#allocation5 + $0xc08] sm:$0xff]  ;;  %v564_v17 = vld [vmem:[#allocation5 + $0xd40] sm:$0xff] }
 0x108   :  { %4593 = vmatprep.subr.bf16.mxu0 %v4592_v30  ;;  %v4676_v30 = vpack.c.bf16 %v573_v23, %v572_v22  ;;  %v4646_v37 = vpack.c.bf16 %v525_v28, %v524_v27  ;;  %v565_v19 = vld [vmem:[#allocation5 + $0xd48] sm:$0xff]  ;;  %v582_v22 = vld [vmem:[#allocation5 + $0xdd0] sm:$0xff]  ;;  %v583_v23 = vld [vmem:[#allocation5 + $0xdd8] sm:$0xff] }
 0x109   :  { %4623 = vmatpush3.bf16.msra.mxu1 %v4622_v29  ;;  %v556_v29 = vld [vmem:[#allocation5 + $0xd00] sm:$0xff]  ;;  %v534_v27 = vld [vmem:[#allocation5 + $0xc50] sm:$0xff]  ;;  %v535_v28 = vld [vmem:[#allocation5 + $0xc58] sm:$0xff] }
 0x10a   :  { %4625 = vmatprep.subr.bf16.mxu1 %v4624_v34  ;;  %v574_v34 = vld [vmem:[#allocation5 + $0xd90] sm:$0xff]  ;;  %v4678_v39 = vpack.c.bf16 %v557_v31, %v556_v29  ;;  %v567_v31 = vld [vmem:[#allocation5 + $0xd58] sm:$0xff] }
 0x10b   :  { %4595 = vmatpush3.bf16.msra.mxu0 %v4594_v40  ;;  %v4648_v40 = vpack.c.bf16 %v543_v33, %v542_v32  ;;  %v4680_v44 = vpack.c.bf16 %v575_v35, %v574_v34  ;;  %v566_v29 = vld [vmem:[#allocation5 + $0xd50] sm:$0xff]  ;;  %v552_v32 = vld [vmem:[#allocation5 + $0xce0] sm:$0xff]  ;;  %v553_v33 = vld [vmem:[#allocation5 + $0xce8] sm:$0xff] }
 0x10c   :  { %4597 = vmatprep.subr.bf16.mxu0 %v4596_v42  ;;  %v527_v42 = vld [vmem:[#allocation5 + $0xc18] sm:$0xff]  ;;  %v584_v34 = vld [vmem:[#allocation5 + $0xde0] sm:$0xff]  ;;  %v585_v35 = vld [vmem:[#allocation5 + $0xde8] sm:$0xff] }
 0x10d   :  { %4627 = vmatpush3.bf16.msra.mxu1 %v4626_v41  ;;  %v526_v41 = vld [vmem:[#allocation5 + $0xc10] sm:$0xff] }
 0x10e   :  { %4629 = vmatprep.subr.bf16.mxu1 %v4628_v46  ;;  %v544_v46 = vld [vmem:[#allocation5 + $0xca0] sm:$0xff]  ;;  %v4650_v51 = vpack.c.bf16 %v527_v42, %v526_v41  ;;  %v4700_v42 = vpack.c.bf16 %v585_v35, %v584_v34  ;;  %v642_v34 = vld [vmem:[#allocation5 + $0xfb0] sm:$0xff]  ;;  %v643_v35 = vld [vmem:[#allocation5 + $0xfb8] sm:$0xff] }
 0x10f   :  { %4599 = vmatpush3.bf16.msra.mxu0 %v4598_v52  ;;  %v110_v52 = vld [vmem:[#allocation2 + $0xd8] sm:$0xff]  ;;  %v568_v41 = vld [vmem:[#allocation5 + $0xd60] sm:$0xff] }
 0x110   :  { %4601 = vmatprep.subr.bf16.mxu0 %v4600_v54  ;;  %v4652_v54 = vpack.c.bf16 %v545_v47, %v544_v46  ;;  %v586_v46 = vld [vmem:[#allocation5 + $0xdf0] sm:$0xff]  ;;  %v587_v47 = vld [vmem:[#allocation5 + $0xdf8] sm:$0xff] }
 0x111   :  { %4631 = vmatpush3.bf16.msra.mxu1 %v4630_v53  ;;  %v4682_v53 = vpack.c.bf16 %v559_v45, %v558_v43  ;;  %v569_v43 = vld [vmem:[#allocation5 + $0xd68] sm:$0xff]  ;;  %v555_v45 = vld [vmem:[#allocation5 + $0xcf8] sm:$0xff] }
 0x112   :  { %4633 = vmatprep.subr.bf16.mxu1 %v4632_v58  ;;  %v4684_v58 = vpack.c.bf16 %v577_v49, %v576_v48  ;;  %v4702_v49 = vpack.c.bf16 %v569_v43, %v568_v41  ;;  %v626_v41 = vld [vmem:[#allocation5 + $0xf30] sm:$0xff]  ;;  %v627_v43 = vld [vmem:[#allocation5 + $0xf38] sm:$0xff] }
 0x113   :  { %4603 = vmatpush3.bf16.msra.mxu0 %v4602_v0  ;;  %v4654_v0 = vpack.c.bf16 %v529_v56, %v528_v55  ;;  %v571_v55 = vld [vmem:[#allocation5 + $0xd78] sm:$0xff]  ;;  %v604_v56 = vld [vmem:[#allocation5 + $0xe80] sm:$0xff] }
 0x114   :  { %4605 = vmatprep.subr.bf16.mxu0 %v4604_v2  ;;  %v4656_v2 = vpack.c.bf16 %v547_v61, %v546_v60 }
 0x115   :  { %4635 = vmatpush3.bf16.msra.mxu1 %v4634_v1  ;;  %v4686_v1 = vpack.c.bf16 %v561_v59, %v560_v57  ;;  %v605_v57 = vld [vmem:[#allocation5 + $0xe88] sm:$0xff] }
 0x116   :  { %4637 = vmatprep.subr.bf16.mxu1 %v4636_v6  ;;  %v4688_v6 = vpack.c.bf16 %v579_v63, %v578_v62  ;;  %v637_v59 = vld [vmem:[#allocation5 + $0xf88] sm:$0xff]  ;;  %v4708_v62 = vpack.c.bf16 %v605_v57, %v604_v56  ;;  %v588_v63 = vld [vmem:[#allocation5 + $0xe00] sm:$0xff]  ;;  %v614_v56 = vld [vmem:[#allocation5 + $0xed0] sm:$0xff] }
 0x117   :  { %4607 = vmatpush3.bf16.msra.mxu0 %v4606_v12  ;;  %v4658_v12 = vpack.c.bf16 %v531_v4, %v530_v3  ;;  %v621_v3 = vld [vmem:[#allocation5 + $0xf08] sm:$0xff]  ;;  %v606_v4 = vld [vmem:[#allocation5 + $0xe90] sm:$0xff]  ;;  %v615_v57 = vld [vmem:[#allocation5 + $0xed8] sm:$0xff] }
 0x118   :  { %4609 = vmatprep.subr.bf16.mxu0 %v4608_v14  ;;  %v4660_v14 = vpack.c.bf16 %v549_v9, %v548_v8  ;;  %v107_v8 = vld [vmem:[#allocation2 + $0xc0] sm:$0xff] }
 0x119   :  { %4639 = vmatpush3.bf16.msra.mxu1 %v4638_v13  ;;  %v4690_v13 = vpack.c.bf16 %v563_v7, %v562_v5  ;;  %v607_v5 = vld [vmem:[#allocation5 + $0xe98] sm:$0xff] }
 0x11a   :  { %4641 = vmatprep.subr.bf16.mxu1 %v4640_v18  ;;  %v4692_v18 = vpack.c.bf16 %v581_v11, %v580_v10  ;;  %v639_v7 = vld [vmem:[#allocation5 + $0xf98] sm:$0xff]  ;;  %v109_v10 = vld [vmem:[#allocation2 + $0xd0] sm:$0xff] }
 0x11b   :  { %4611 = vmatpush3.bf16.msra.mxu0 %v4610_v24  ;;  %v4662_v24 = vpack.c.bf16 %v533_v16, %v532_v15  ;;  %v622_v15 = vld [vmem:[#allocation5 + $0xf10] sm:$0xff] }
 0x11c   :  { %4645 = vmatprep.subr.bf16.mxu0 %v4644_v26  ;;  %v4664_v26 = vpack.c.bf16 %v551_v21, %v550_v20  ;;  %v640_v20 = vld [vmem:[#allocation5 + $0xfa0] sm:$0xff]  ;;  %v641_v21 = vld [vmem:[#allocation5 + $0xfa8] sm:$0xff] }
 0x11d   :  { %4643 = vmatpush3.bf16.msra.mxu1 %v4642_v25  ;;  %v4694_v25 = vpack.c.bf16 %v565_v19, %v564_v17  ;;  %v623_v17 = vld [vmem:[#allocation5 + $0xf18] sm:$0xff]  ;;  %v609_v19 = vld [vmem:[#allocation5 + $0xea8] sm:$0xff] }
 0x11e   :  { %4677 = vmatprep.subr.bf16.mxu1 %v4676_v30  ;;  %1820 = vmatmul.mubr.f32.vlgmr.msra.gmra.mrb[10].mxu0 %v103_v36  ;;  %v4696_v30 = vpack.c.bf16 %v583_v23, %v582_v22  ;;  %v4666_v36 = vpack.c.bf16 %v535_v28, %v534_v27  ;;  %v112_v22 = vld [vmem:[#allocation2 + $0xe8] sm:$0xff]  ;;  %v593_v28 = vld [vmem:[#allocation5 + $0xe28] sm:$0xff] }
 0x11f   :  { %4647 = vmatpush3.bf16.msra.mxu0 %v4646_v37  ;;  %1959 = vmatprep.mubr.f32.mxu0 %v108_v50  ;;  %v4698_v37 = vpack.c.bf16 %v567_v31, %v566_v29  ;;  %v592_v27 = vld [vmem:[#allocation5 + $0xe20] sm:$0xff]  ;;  %v625_v31 = vld [vmem:[#allocation5 + $0xf28] sm:$0xff] }
 0x120   :  { %1890 = vmatmul.mubr.f32.vlgmr.msra.gmra.mrb[10].mxu1 %v105_v38  ;;  %4649 = vmatprep.subr.bf16.mxu0 %v4648_v40  ;;  %v4668_v38 = vpack.c.bf16 %v553_v33, %v552_v32  ;;  %v537_v40 = vld [vmem:[#allocation5 + $0xc68] sm:$0xff]  ;;  %v624_v29 = vld [vmem:[#allocation5 + $0xf20] sm:$0xff]  ;;  %v610_v32 = vld [vmem:[#allocation5 + $0xeb0] sm:$0xff] }
 0x121   :  { %4679 = vmatpush3.bf16.msra.mxu1 %v4678_v39  ;;  %2029 = vmatprep.mubr.f32.mxu1 %v110_v52  ;;  %v536_v39 = vld [vmem:[#allocation5 + $0xc60] sm:$0xff]  ;;  %v539_v52 = vld [vmem:[#allocation5 + $0xc78] sm:$0xff] }
 0x122   :  { %4681 = vmatprep.subr.bf16.mxu1 %v4680_v44  ;;  %v554_v44 = vld [vmem:[#allocation5 + $0xcf0] sm:$0xff]  ;;  %v4670_v48 = vpack.c.bf16 %v537_v40, %v536_v39  ;;  %v611_v33 = vld [vmem:[#allocation5 + $0xeb8] sm:$0xff] }
 0x123   :  { %4651 = vmatpush3.bf16.msra.mxu0 %v4650_v51  ;;  %v4672_v50 = vpack.c.bf16 %v555_v45, %v554_v44  ;;  %v538_v51 = vld [vmem:[#allocation5 + $0xc70] sm:$0xff]  ;;  %v595_v40 = vld [vmem:[#allocation5 + $0xe38] sm:$0xff]  ;;  %v612_v44 = vld [vmem:[#allocation5 + $0xec0] sm:$0xff] }
 0x124   :  { %4653 = vmatprep.subr.bf16.mxu0 %v4652_v54  ;;  %v4704_v54 = vpack.c.bf16 %v587_v47, %v586_v46  ;;  %v4674_v60 = vpack.c.bf16 %v539_v52, %v538_v51  ;;  %v594_v39 = vld [vmem:[#allocation5 + $0xe30] sm:$0xff]  ;;  %v613_v45 = vld [vmem:[#allocation5 + $0xec8] sm:$0xff]  ;;  %v644_v46 = vld [vmem:[#allocation5 + $0xfc0] sm:$0xff] }
 0x125   :  { %4683 = vmatpush3.bf16.msra.mxu1 %v4682_v53  ;;  %v570_v53 = vld [vmem:[#allocation5 + $0xd70] sm:$0xff]  ;;  %v645_v47 = vld [vmem:[#allocation5 + $0xfc8] sm:$0xff]  ;;  %v596_v51 = vld [vmem:[#allocation5 + $0xe40] sm:$0xff] }
 0x126   :  { %4685 = vmatprep.subr.bf16.mxu1 %v4684_v58  ;;  %v636_v58 = vld [vmem:[#allocation5 + $0xf80] sm:$0xff]  ;;  %v4706_v61 = vpack.c.bf16 %v571_v55, %v570_v53  ;;  %v597_v52 = vld [vmem:[#allocation5 + $0xe48] sm:$0xff] }
 0x127   :  { %4655 = vmatpush3.bf16.msra.mxu0 %v4654_v0  ;;  %v589_v0 = vld [vmem:[#allocation5 + $0xe08] sm:$0xff]  ;;  %v628_v53 = vld [vmem:[#allocation5 + $0xf40] sm:$0xff] }
 0x128   :  { %4657 = vmatprep.subr.bf16.mxu0 %v4656_v2  ;;  %v4740_v2 = vpack.c.bf16 %v637_v59, %v636_v58  ;;  %v4710_v9 = vpack.c.bf16 %v589_v0, %v588_v63  ;;  %v629_v55 = vld [vmem:[#allocation5 + $0xf48] sm:$0xff]  ;;  %v646_v58 = vld [vmem:[#allocation5 + $0xfd0] sm:$0xff]  ;;  %v647_v59 = vld [vmem:[#allocation5 + $0xfd8] sm:$0xff] }
 0x129   :  { %4687 = vmatpush3.bf16.msra.mxu1 %v4686_v1  ;;  %v620_v1 = vld [vmem:[#allocation5 + $0xf00] sm:$0xff]  ;;  %v598_v63 = vld [vmem:[#allocation5 + $0xe50] sm:$0xff]  ;;  %v599_v0 = vld [vmem:[#allocation5 + $0xe58] sm:$0xff] }
 0x12a   :  { %4689 = vmatprep.subr.bf16.mxu1 %v4688_v6  ;;  %v638_v6 = vld [vmem:[#allocation5 + $0xf90] sm:$0xff]  ;;  %v4742_v11 = vpack.c.bf16 %v621_v3, %v620_v1  ;;  %v631_v3 = vld [vmem:[#allocation5 + $0xf58] sm:$0xff] }
 0x12b   :  { %4659 = vmatpush3.bf16.msra.mxu0 %v4658_v12  ;;  %v4712_v12 = vpack.c.bf16 %v607_v5, %v606_v4  ;;  %v4744_v16 = vpack.c.bf16 %v639_v7, %v638_v6  ;;  %v630_v1 = vld [vmem:[#allocation5 + $0xf50] sm:$0xff]  ;;  %v616_v4 = vld [vmem:[#allocation5 + $0xee0] sm:$0xff]  ;;  %v617_v5 = vld [vmem:[#allocation5 + $0xee8] sm:$0xff] }
 0x12c   :  { %4661 = vmatprep.subr.bf16.mxu0 %v4660_v14  ;;  %v591_v14 = vld [vmem:[#allocation5 + $0xe18] sm:$0xff]  ;;  %v648_v6 = vld [vmem:[#allocation5 + $0xfe0] sm:$0xff]  ;;  %v649_v7 = vld [vmem:[#allocation5 + $0xfe8] sm:$0xff] }
 0x12d   :  { %4691 = vmatpush3.bf16.msra.mxu1 %v4690_v13  ;;  %v590_v13 = vld [vmem:[#allocation5 + $0xe10] sm:$0xff] }
 0x12e   :  { %4693 = vmatprep.subr.bf16.mxu1 %v4692_v18  ;;  %v608_v18 = vld [vmem:[#allocation5 + $0xea0] sm:$0xff]  ;;  %v4714_v23 = vpack.c.bf16 %v591_v14, %v590_v13 }
 0x12f   :  { %4663 = vmatpush3.bf16.msra.mxu0 %v4662_v24  ;;  %v114_v24 = vld [vmem:[#allocation2 + $0xf8] sm:$0xff]  ;;  %v632_v13 = vld [vmem:[#allocation5 + $0xf60] sm:$0xff] }
 0x130   :  { %4665 = vmatprep.subr.bf16.mxu0 %v4664_v26  ;;  %v4716_v26 = vpack.c.bf16 %v609_v19, %v608_v18  ;;  %v619_v18 = vld [vmem:[#allocation5 + $0xef8] sm:$0xff]  ;;  %v3197_v19 = vld [vmem:[#allocation7] ss:$0 sm:$0xff] }
 0x131   :  { %4695 = vmatpush3.bf16.msra.mxu1 %v4694_v25  ;;  %v4746_v25 = vpack.c.bf16 %v623_v17, %v622_v15  ;;  %v4764_v15 = vpack.c.bf16 %v649_v7, %v648_v6  ;;  %v618_v17 = vld [vmem:[#allocation5 + $0xef0] sm:$0xff] }
 0x132   :  { %4697 = vmatprep.subr.bf16.mxu1 %v4696_v30  ;;  %v4748_v30 = vpack.c.bf16 %v641_v21, %v640_v20 }
 0x133   :  { %4667 = vmatpush3.bf16.msra.mxu0 %v4666_v36  ;;  %v4718_v36 = vpack.c.bf16 %v593_v28, %v592_v27 }
 0x134   :  { %4669 = vmatprep.subr.bf16.mxu0 %v4668_v38  ;;  %v4720_v38 = vpack.c.bf16 %v611_v33, %v610_v32  ;;  %v634_v32 = vld [vmem:[#allocation5 + $0xf70] sm:$0xff] }
 0x135   :  { %4699 = vmatpush3.bf16.msra.mxu1 %v4698_v37  ;;  %v4750_v37 = vpack.c.bf16 %v625_v31, %v624_v29  ;;  %v4736_v29 = vpack.c.bf16 %v619_v18, %v618_v17  ;;  %v603_v31 = vld [vmem:[#allocation5 + $0xe78] sm:$0xff] }
 0x136   :  { %4701 = vmatprep.subr.bf16.mxu1 %v4700_v42  ;;  %v4752_v42 = vpack.c.bf16 %v643_v35, %v642_v34  ;;  %v635_v35 = vld [vmem:[#allocation5 + $0xf78] sm:$0xff] }
 0x137   :  { %4671 = vmatpush3.bf16.msra.mxu0 %v4670_v48  ;;  %v4722_v48 = vpack.c.bf16 %v595_v40, %v594_v39  ;;  %v701_v39 = vld [vmem:[#allocation5 + $0x1188] sm:$0xff] }
 0x138   :  { %4673 = vmatprep.subr.bf16.mxu0 %v4672_v50  ;;  %v4724_v50 = vpack.c.bf16 %v613_v45, %v612_v44  ;;  %v652_v44 = vld [vmem:[#allocation5 + $0x1000] sm:$0xff]  ;;  %v653_v45 = vld [vmem:[#allocation5 + $0x1008] sm:$0xff] }
 0x139   :  { %4703 = vmatpush3.bf16.msra.mxu1 %v4702_v49  ;;  %v4754_v49 = vpack.c.bf16 %v627_v43, %v626_v41 }
 0x13a   :  { %4705 = vmatprep.subr.bf16.mxu1 %v4704_v54  ;;  %v4756_v54 = vpack.c.bf16 %v645_v47, %v644_v46  ;;  %v684_v46 = vld [vmem:[#allocation5 + $0x1100] sm:$0xff] }
 0x13b   :  { %4675 = vmatpush3.bf16.msra.mxu0 %v4674_v60  ;;  %v4726_v60 = vpack.c.bf16 %v597_v52, %v596_v51  ;;  %v702_v51 = vld [vmem:[#allocation5 + $0x1190] sm:$0xff]  ;;  %v703_v52 = vld [vmem:[#allocation5 + $0x1198] sm:$0xff] }
 0x13c   :  { %4709 = vmatprep.subr.bf16.mxu0 %v4708_v62  ;;  %v4728_v62 = vpack.c.bf16 %v615_v57, %v614_v56 }
 0x13d   :  { %4707 = vmatpush3.bf16.msra.mxu1 %v4706_v61  ;;  %v4758_v61 = vpack.c.bf16 %v629_v55, %v628_v53  ;;  %v111_v53 = vld [vmem:[#allocation2 + $0xe0] sm:$0xff]  ;;  %v113_v55 = vld [vmem:[#allocation2 + $0xf0] sm:$0xff] }
 0x13e   :  { %4741 = vmatprep.subr.bf16.mxu1 %v4740_v2  ;;  %1960 = vmatmul.mubr.f32.vlgmr.msra.gmra.mrb[12].mxu0 %v107_v8  ;;  %v4760_v2 = vpack.c.bf16 %v647_v59, %v646_v58  ;;  %v4730_v8 = vpack.c.bf16 %v599_v0, %v598_v63  ;;  %v654_v58 = vld [vmem:[#allocation5 + $0x1010] sm:$0xff]  ;;  %v655_v59 = vld [vmem:[#allocation5 + $0x1018] sm:$0xff]  ;;  %v672_v63 = vld [vmem:[#allocation5 + $0x10a0] sm:$0xff] }
 0x13f   :  { %4711 = vmatpush3.bf16.msra.mxu0 %v4710_v9  ;;  %2099 = vmatprep.mubr.f32.mxu0 %v112_v22  ;;  %v4762_v9 = vpack.c.bf16 %v631_v3, %v630_v1  ;;  %v650_v22 = vld [vmem:[#allocation5 + $0xff0] sm:$0xff]  ;;  %v673_v0 = vld [vmem:[#allocation5 + $0x10a8] sm:$0xff]  ;;  %v704_v1 = vld [vmem:[#allocation5 + $0x11a0] sm:$0xff] }
 0x140   :  { %2030 = vmatmul.mubr.f32.vlgmr.msra.gmra.mrb[12].mxu1 %v109_v10  ;;  %4713 = vmatprep.subr.bf16.mxu0 %v4712_v12  ;;  %v4732_v10 = vpack.c.bf16 %v617_v5, %v616_v4  ;;  %v601_v12 = vld [vmem:[#allocation5 + $0xe68] sm:$0xff]  ;;  %v116_v3 = vld [vmem:[#allocation2 + $0x108] sm:$0xff]  ;;  %v4778_v4 = vpack.c.bf16 %v655_v59, %v654_v58  ;;  %v118_v5 = vld [vmem:[#allocation2 + $0x118] sm:$0xff]  ;;  %v4780_v7 = vpack.c.bf16 %v673_v0, %v672_v63 }
 0x141   :  { %4743 = vmatpush3.bf16.msra.mxu1 %v4742_v11  ;;  %2169 = vmatprep.mubr.f32.mxu1 %v114_v24  ;;  %v600_v11 = vld [vmem:[#allocation5 + $0xe60] sm:$0xff]  ;;  %v665_v58 = vld [vmem:[#allocation5 + $0x1068] sm:$0xff]  ;;  %v682_v63 = vld [vmem:[#allocation5 + $0x10f0] sm:$0xff] }
 0x142   :  { %4745 = vmatprep.subr.bf16.mxu1 %v4744_v16  ;;  %v633_v16 = vld [vmem:[#allocation5 + $0xf68] sm:$0xff]  ;;  %v696_v59 = vld [vmem:[#allocation5 + $0x1160] sm:$0xff]  ;;  %v683_v0 = vld [vmem:[#allocation5 + $0x10f8] sm:$0xff] }
 0x143   :  { %4715 = vmatpush3.bf16.msra.mxu0 %v4714_v23  ;;  %v651_v23 = vld [vmem:[#allocation5 + $0xff8] sm:$0xff]  ;;  %v4766_v28 = vpack.c.bf16 %v633_v16, %v632_v13  ;;  %v674_v13 = vld [vmem:[#allocation5 + $0x10b0] sm:$0xff] }
 0x144   :  { %4717 = vmatprep.subr.bf16.mxu0 %v4716_v26  ;;  %v4734_v26 = vpack.c.bf16 %v601_v12, %v600_v11  ;;  %v4768_v34 = vpack.c.bf16 %v651_v23, %v650_v22  ;;  %v689_v12 = vld [vmem:[#allocation5 + $0x1128] sm:$0xff]  ;;  %v707_v16 = vld [vmem:[#allocation5 + $0x11b8] sm:$0xff]  ;;  %v690_v22 = vld [vmem:[#allocation5 + $0x1130] sm:$0xff] }
 0x145   :  { %4747 = vmatpush3.bf16.msra.mxu1 %v4746_v25 }
 0x146   :  { %4749 = vmatprep.subr.bf16.mxu1 %v4748_v30  ;;  %v602_v30 = vld [vmem:[#allocation5 + $0xe70] sm:$0xff] }
 0x147   :  { %4719 = vmatpush3.bf16.msra.mxu0 %v4718_v36  ;;  %v668_v36 = vld [vmem:[#allocation5 + $0x1080] sm:$0xff]  ;;  %v4738_v41 = vpack.c.bf16 %v603_v31, %v602_v30 }
 0x148   :  { %4721 = vmatprep.subr.bf16.mxu0 %v4720_v38  ;;  %v700_v38 = vld [vmem:[#allocation5 + $0x1180] sm:$0xff] }
 0x149   :  { %4751 = vmatpush3.bf16.msra.mxu1 %v4750_v37  ;;  %v669_v37 = vld [vmem:[#allocation5 + $0x1088] sm:$0xff]  ;;  %v4804_v47 = vpack.c.bf16 %v701_v39, %v700_v38  ;;  %v679_v38 = vld [vmem:[#allocation5 + $0x10d8] sm:$0xff]  ;;  %v710_v39 = vld [vmem:[#allocation5 + $0x11d0] sm:$0xff] }
 0x14a   :  { %4753 = vmatprep.subr.bf16.mxu1 %v4752_v42  ;;  %v4770_v42 = vpack.c.bf16 %v635_v35, %v634_v32  ;;  %v4772_v43 = vpack.c.bf16 %v669_v37, %v668_v36  ;;  %v660_v32 = vld [vmem:[#allocation5 + $0x1040] sm:$0xff]  ;;  %v693_v36 = vld [vmem:[#allocation5 + $0x1148] sm:$0xff]  ;;  %v678_v37 = vld [vmem:[#allocation5 + $0x10d0] sm:$0xff] }
 0x14b   :  { %4723 = vmatpush3.bf16.msra.mxu0 %v4722_v48  ;;  %v685_v48 = vld [vmem:[#allocation5 + $0x1108] sm:$0xff] }
 0x14c   :  { %4725 = vmatprep.subr.bf16.mxu0 %v4724_v50  ;;  %v671_v50 = vld [vmem:[#allocation5 + $0x1098] sm:$0xff]  ;;  %v4806_v56 = vpack.c.bf16 %v685_v48, %v684_v46 }
 0x14d   :  { %4755 = vmatpush3.bf16.msra.mxu1 %v4754_v49  ;;  %v670_v49 = vld [vmem:[#allocation5 + $0x1090] sm:$0xff]  ;;  %v663_v46 = vld [vmem:[#allocation5 + $0x1058] sm:$0xff] }
 0x14e   :  { %4757 = vmatprep.subr.bf16.mxu1 %v4756_v54  ;;  %v4774_v54 = vpack.c.bf16 %v653_v45, %v652_v44  ;;  %v4776_v57 = vpack.c.bf16 %v671_v50, %v670_v49  ;;  %v4792_v44 = vpack.c.bf16 %v679_v38, %v678_v37  ;;  %v662_v45 = vld [vmem:[#allocation5 + $0x1050] sm:$0xff]  ;;  %v695_v49 = vld [vmem:[#allocation5 + $0x1158] sm:$0xff]  ;;  %v680_v50 = vld [vmem:[#allocation5 + $0x10e0] sm:$0xff] }
 0x14f   :  { %4727 = vmatpush3.bf16.msra.mxu0 %v4726_v60  ;;  %v686_v60 = vld [vmem:[#allocation5 + $0x1110] sm:$0xff] }
 0x150   :  { %4729 = vmatprep.subr.bf16.mxu0 %v4728_v62  ;;  %v687_v62 = vld [vmem:[#allocation5 + $0x1118] sm:$0xff]  ;;  %v718_v38 = vld [vmem:[#allocation5 + $0x1210] sm:$0xff] }
 0x151   :  { %4759 = vmatpush3.bf16.msra.mxu1 %v4758_v61  ;;  %v3232_v14 = vpop.f32.mrb[0].mxu0  ;;  %v4808_v61 = vpack.c.bf16 %v703_v52, %v702_v51  ;;  %v4810_v6 = vpack.c.bf16 %v687_v62, %v686_v60  ;;  %v681_v51 = vld [vmem:[#allocation5 + $0x10e8] sm:$0xff]  ;;  %v712_v52 = vld [vmem:[#allocation5 + $0x11e0] sm:$0xff] }
 0x152   :  { %4761 = vmatprep.subr.bf16.mxu1 %v4760_v2  ;;  %v3233_v20 = vpop.f32.mrb[1].mxu0  ;;  %v705_v2 = vld [vmem:[#allocation5 + $0x11a8] sm:$0xff] }
 0x153   :  { %v3267_v21 = vpop.f32.mrb[0].mxu1  ;;  %v3234_v24 = vadd.f32 %v3233_v20, %v3232_v14  ;;  %4731 = vmatpush3.bf16.msra.mxu0 %v4730_v8  ;;  %v656_v8 = vld [vmem:[#allocation5 + $0x1020] sm:$0xff]  ;;  %v4812_v11 = vpack.c.bf16 %v705_v2, %v704_v1  ;;  %v675_v14 = vld [vmem:[#allocation5 + $0x10b8] sm:$0xff]  ;;  %v658_v20 = vld [vmem:[#allocation5 + $0x1030] sm:$0xff] }
 0x154   :  { %v3268_v25 = vpop.f32.mrb[1].mxu1  ;;  %4733 = vmatprep.subr.bf16.mxu0 %v4732_v10  ;;  %v688_v10 = vld [vmem:[#allocation5 + $0x1120] sm:$0xff]  ;;  %v697_v62 = vld [vmem:[#allocation5 + $0x1168] sm:$0xff] }
 0x155   :  { %v3269_v27 = vadd.f32 %v3268_v25, %v3267_v21  ;;  %4763 = vmatpush3.bf16.msra.mxu1 %v4762_v9  ;;  %v1122_v33 = vadd.f32 %v3234_v24, %v3197_v19  ;;  %v657_v9 = vld [vmem:[#allocation5 + $0x1028] sm:$0xff]  ;;  %v4814_v18 = vpack.c.bf16 %v689_v12, %v688_v10  ;;  %v4784_v19 = vpack.c.bf16 %v675_v14, %v674_v13  ;;  %v659_v21 = vld [vmem:[#allocation5 + $0x1038] sm:$0xff]  ;;  %v676_v25 = vld [vmem:[#allocation5 + $0x10c0] sm:$0xff] }
 0x156   :  { %4765 = vmatprep.subr.bf16.mxu1 %v4764_v15  ;;  %v706_v15 = vld [vmem:[#allocation5 + $0x11b0] sm:$0xff]  ;;  %v4782_v17 = vpack.c.bf16 %v657_v9, %v656_v8  ;;  %v691_v24 = vld [vmem:[#allocation5 + $0x1138] sm:$0xff]  ;;  %v4830_v9 = vpack.c.bf16 %v697_v62, %v696_v59  ;;  %v4800_v10 = vpack.c.bf16 %v683_v0, %v682_v63 }
 0x157   :  { %v5444_v40 = vadd.f32 %v3269_v27, %v1122_v33  ;;  %4735 = vmatpush3.bf16.msra.mxu0 %v4734_v26  ;;  %v4816_v23 = vpack.c.bf16 %v707_v16, %v706_v15  ;;  %v677_v26 = vld [vmem:[#allocation5 + $0x10c8] sm:$0xff]  ;;  %v708_v27 = vld [vmem:[#allocation5 + $0x11c0] sm:$0xff]  ;;  %v4818_v30 = vpack.c.bf16 %v691_v24, %v690_v22  ;;  %v667_v12 = vld [vmem:[#allocation5 + $0x1078] sm:$0xff] }
 0x158   :  { %4737 = vmatprep.subr.bf16.mxu0 %v4736_v29  ;;  %v4786_v29 = vpack.c.bf16 %v659_v21, %v658_v20  ;;  %v4788_v31 = vpack.c.bf16 %v677_v26, %v676_v25  ;;  %v661_v33 = vld [vmem:[#allocation5 + $0x1048] sm:$0xff]  ;;  %v698_v13 = vld [vmem:[#allocation5 + $0x1170] sm:$0xff]  ;;  %v699_v16 = vld [vmem:[#allocation5 + $0x1178] sm:$0xff] }
 0x159   :  { %4767 = vmatpush3.bf16.msra.mxu1 %v4766_v28  ;;  %v709_v28 = vld [vmem:[#allocation5 + $0x11c8] sm:$0xff]  ;;  %v716_v25 = vld [vmem:[#allocation5 + $0x1200] sm:$0xff]  ;;  %v739_v59 = vld [vmem:[#allocation5 + $0x12b8] sm:$0xff] }
 0x15a   :  { %4769 = vmatprep.subr.bf16.mxu1 %v4768_v34  ;;  %v692_v34 = vld [vmem:[#allocation5 + $0x1140] sm:$0xff]  ;;  %v4820_v35 = vpack.c.bf16 %v709_v28, %v708_v27  ;;  %v765_v20 = vld [vmem:[#allocation5 + $0x1388] sm:$0xff] }
 0x15b   :  { %4739 = vmatpush3.bf16.msra.mxu0 %v4738_v41  ;;  %v711_v41 = vld [vmem:[#allocation5 + $0x11d8] sm:$0xff]  ;;  %v717_v26 = vld [vmem:[#allocation5 + $0x1208] sm:$0xff]  ;;  %v748_v27 = vld [vmem:[#allocation5 + $0x1300] sm:$0xff] }
 0x15c   :  { %4773 = vmatprep.subr.bf16.mxu0 %v4772_v43  ;;  %v4822_v43 = vpack.c.bf16 %v693_v36, %v692_v34  ;;  %v4824_v48 = vpack.c.bf16 %v711_v41, %v710_v39  ;;  %v749_v28 = vld [vmem:[#allocation5 + $0x1308] sm:$0xff]  ;;  %v4838_v34 = vpack.c.bf16 %v717_v26, %v716_v25  ;;  %v719_v39 = vld [vmem:[#allocation5 + $0x1218] sm:$0xff]  ;;  %v750_v41 = vld [vmem:[#allocation5 + $0x1310] sm:$0xff] }
 0x15d   :  { %4771 = vmatpush3.bf16.msra.mxu1 %v4770_v42  ;;  %v4790_v42 = vpack.c.bf16 %v661_v33, %v660_v32  ;;  %v767_v32 = vld [vmem:[#allocation5 + $0x1398] sm:$0xff]  ;;  %v4870_v36 = vpack.c.bf16 %v749_v28, %v748_v27  ;;  %v726_v26 = vld [vmem:[#allocation5 + $0x1250] sm:$0xff] }
 0x15e   :  { %4805 = vmatprep.subr.bf16.mxu1 %v4804_v47  ;;  %2100 = vmatmul.mubr.f32.vlgmr.msra.gmra.mrb[14].mxu0 %v111_v53  ;;  %v694_v47 = vld [vmem:[#allocation5 + $0x1150] sm:$0xff]  ;;  %v713_v53 = vld [vmem:[#allocation5 + $0x11e8] sm:$0xff]  ;;  %v115_v33 = vld [vmem:[#allocation2 + $0x100] sm:$0xff] }
 0x15f   :  { %4775 = vmatpush3.bf16.msra.mxu0 %v4774_v54  ;;  %2239 = vmatprep.mubr.f32.mxu0 %v116_v3  ;;  %v4794_v54 = vpack.c.bf16 %v663_v46, %v662_v45  ;;  %v714_v3 = vld [vmem:[#allocation5 + $0x11f0] sm:$0xff]  ;;  %v737_v45 = vld [vmem:[#allocation5 + $0x12a8] sm:$0xff]  ;;  %v768_v46 = vld [vmem:[#allocation5 + $0x13a0] sm:$0xff] }
 0x160   :  { %2170 = vmatmul.mubr.f32.vlgmr.msra.gmra.mrb[14].mxu1 %v113_v55  ;;  %4777 = vmatprep.subr.bf16.mxu0 %v4776_v57  ;;  %v4826_v55 = vpack.c.bf16 %v695_v49, %v694_v47  ;;  %v664_v57 = vld [vmem:[#allocation5 + $0x1060] sm:$0xff]  ;;  %v769_v47 = vld [vmem:[#allocation5 + $0x13a8] sm:$0xff]  ;;  %v4842_v49 = vpack.c.bf16 %v719_v39, %v718_v38  ;;  %v727_v27 = vld [vmem:[#allocation5 + $0x1258] sm:$0xff] }
 0x161   :  { %4807 = vmatpush3.bf16.msra.mxu1 %v4806_v56  ;;  %2309 = vmatprep.mubr.f32.mxu1 %v118_v5  ;;  %v4796_v56 = vpack.c.bf16 %v681_v51, %v680_v50  ;;  %v122_v50 = vld [vmem:[#allocation2 + $0x138] sm:$0xff]  ;;  %v729_v38 = vld [vmem:[#allocation5 + $0x1268] sm:$0xff]  ;;  %v760_v39 = vld [vmem:[#allocation5 + $0x1360] sm:$0xff] }
 0x162   :  { %4809 = vmatprep.subr.bf16.mxu1 %v4808_v61  ;;  %v4828_v61 = vpack.c.bf16 %v713_v53, %v712_v52  ;;  %v720_v53 = vld [vmem:[#allocation5 + $0x1220] sm:$0xff] }
 0x163   :  { %4779 = vmatpush3.bf16.msra.mxu0 %v4778_v4  ;;  %v715_v4 = vld [vmem:[#allocation5 + $0x11f8] sm:$0xff] }
 0x164   :  { %4781 = vmatprep.subr.bf16.mxu0 %v4780_v7  ;;  %v4798_v7 = vpack.c.bf16 %v665_v58, %v664_v57  ;;  %v4832_v15 = vpack.c.bf16 %v715_v4, %v714_v3  ;;  %v753_v57 = vld [vmem:[#allocation5 + $0x1328] sm:$0xff]  ;;  %v738_v58 = vld [vmem:[#allocation5 + $0x12b0] sm:$0xff] }
 0x165   :  { %4811 = vmatpush3.bf16.msra.mxu1 %v4810_v6  ;;  %v4848_v0 = vpack.c.bf16 %v739_v59, %v738_v58  ;;  %v754_v3 = vld [vmem:[#allocation5 + $0x1330] sm:$0xff] }
 0x166   :  { %4813 = vmatprep.subr.bf16.mxu1 %v4812_v11  ;;  %v666_v11 = vld [vmem:[#allocation5 + $0x1070] sm:$0xff] }
 0x167   :  { %4783 = vmatpush3.bf16.msra.mxu0 %v4782_v17  ;;  %v732_v17 = vld [vmem:[#allocation5 + $0x1280] sm:$0xff]  ;;  %v4802_v22 = vpack.c.bf16 %v667_v12, %v666_v11  ;;  %v762_v58 = vld [vmem:[#allocation5 + $0x1370] sm:$0xff] }
 0x168   :  { %4785 = vmatprep.subr.bf16.mxu0 %v4784_v19  ;;  %v764_v19 = vld [vmem:[#allocation5 + $0x1380] sm:$0xff] }
 0x169   :  { %4815 = vmatpush3.bf16.msra.mxu1 %v4814_v18  ;;  %v733_v18 = vld [vmem:[#allocation5 + $0x1288] sm:$0xff] }
 0x16a   :  { %4817 = vmatprep.subr.bf16.mxu1 %v4816_v23  ;;  %v4834_v23 = vpack.c.bf16 %v699_v16, %v698_v13  ;;  %v4836_v24 = vpack.c.bf16 %v733_v18, %v732_v17  ;;  %v724_v13 = vld [vmem:[#allocation5 + $0x1240] sm:$0xff]  ;;  %v757_v17 = vld [vmem:[#allocation5 + $0x1348] sm:$0xff]  ;;  %v742_v18 = vld [vmem:[#allocation5 + $0x12d0] sm:$0xff] }
 0x16b   :  { %4787 = vmatpush3.bf16.msra.mxu0 %v4786_v29  ;;  %v734_v29 = vld [vmem:[#allocation5 + $0x1290] sm:$0xff] }
 0x16c   :  { %4789 = vmatprep.subr.bf16.mxu0 %v4788_v31  ;;  %v766_v31 = vld [vmem:[#allocation5 + $0x1390] sm:$0xff] }
 0x16d   :  { %4819 = vmatpush3.bf16.msra.mxu1 %v4818_v30  ;;  %v735_v30 = vld [vmem:[#allocation5 + $0x1298] sm:$0xff] }
 0x16e   :  { %4821 = vmatprep.subr.bf16.mxu1 %v4820_v35  ;;  %v117_v35 = vld [vmem:[#allocation2 + $0x110] sm:$0xff]  ;;  %v4840_v37 = vpack.c.bf16 %v735_v30, %v734_v29  ;;  %v759_v29 = vld [vmem:[#allocation5 + $0x1358] sm:$0xff]  ;;  %v744_v30 = vld [vmem:[#allocation5 + $0x12e0] sm:$0xff] }
 0x16f   :  { %4791 = vmatpush3.bf16.msra.mxu0 %v4790_v42  ;;  %v4872_v42 = vpack.c.bf16 %v767_v32, %v766_v31  ;;  %v745_v31 = vld [vmem:[#allocation5 + $0x12e8] sm:$0xff]  ;;  %v776_v32 = vld [vmem:[#allocation5 + $0x13e0] sm:$0xff] }
 0x170   :  { %4793 = vmatprep.subr.bf16.mxu0 %v4792_v44  ;;  %v736_v44 = vld [vmem:[#allocation5 + $0x12a0] sm:$0xff] }
 0x171   :  { %4823 = vmatpush3.bf16.msra.mxu1 %v4822_v43  ;;  %v3302_v60 = vpop.f32.mrb[2].mxu0  ;;  %v751_v43 = vld [vmem:[#allocation5 + $0x1318] sm:$0xff]  ;;  %v4844_v52 = vpack.c.bf16 %v737_v45, %v736_v44  ;;  %v746_v44 = vld [vmem:[#allocation5 + $0x12f0] sm:$0xff] }
 0x172   :  { %4825 = vmatprep.subr.bf16.mxu1 %v4824_v48  ;;  %v3303_v1 = vpop.f32.mrb[3].mxu0  ;;  %v120_v48 = vld [vmem:[#allocation2 + $0x128] sm:$0xff]  ;;  %v4874_v51 = vpack.c.bf16 %v751_v43, %v750_v41  ;;  %v761_v43 = vld [vmem:[#allocation5 + $0x1368] sm:$0xff]  ;;  %v747_v45 = vld [vmem:[#allocation5 + $0x12f8] sm:$0xff] }
 0x173   :  { %v3337_v2 = vpop.f32.mrb[2].mxu1  ;;  %v3304_v5 = vadd.f32 %v3303_v1, %v3302_v60  ;;  %4795 = vmatpush3.bf16.msra.mxu0 %v4794_v54  ;;  %v721_v54 = vld [vmem:[#allocation5 + $0x1228] sm:$0xff]  ;;  %v770_v60 = vld [vmem:[#allocation5 + $0x13b0] sm:$0xff] }
 0x174   :  { %v3338_v6 = vpop.f32.mrb[3].mxu1  ;;  %4797 = vmatprep.subr.bf16.mxu0 %v4796_v56  ;;  %v4876_v56 = vpack.c.bf16 %v769_v47, %v768_v46  ;;  %v4846_v62 = vpack.c.bf16 %v721_v54, %v720_v53  ;;  %v722_v1 = vld [vmem:[#allocation5 + $0x1230] sm:$0xff]  ;;  %v4894_v54 = vpack.c.bf16 %v761_v43, %v760_v39  ;;  %v803_v39 = vld [vmem:[#allocation5 + $0x14b8] sm:$0xff] }
 0x175   :  { %v3339_v8 = vadd.f32 %v3338_v6, %v3337_v2  ;;  %4827 = vmatpush3.bf16.msra.mxu1 %v4826_v55  ;;  %v1262_v14 = vadd.f32 %v3304_v5, %v5444_v40  ;;  %v4868_v40 = vpack.c.bf16 %v765_v20, %v764_v19  ;;  %v752_v55 = vld [vmem:[#allocation5 + $0x1320] sm:$0xff]  ;;  %v723_v2 = vld [vmem:[#allocation5 + $0x1238] sm:$0xff]  ;;  %v774_v20 = vld [vmem:[#allocation5 + $0x13d0] sm:$0xff] }
 0x176   :  { %4829 = vmatprep.subr.bf16.mxu1 %v4828_v61  ;;  %v771_v61 = vld [vmem:[#allocation5 + $0x13b8] sm:$0xff]  ;;  %v4878_v63 = vpack.c.bf16 %v753_v57, %v752_v55  ;;  %v740_v6 = vld [vmem:[#allocation5 + $0x12c0] sm:$0xff]  ;;  %v4864_v55 = vpack.c.bf16 %v747_v45, %v746_v44 }
 0x177   :  { %v5447_v21 = vadd.f32 %v3339_v8, %v1262_v14  ;;  %4799 = vmatpush3.bf16.msra.mxu0 %v4798_v7  ;;  %v4880_v4 = vpack.c.bf16 %v771_v61, %v770_v60  ;;  %v755_v5 = vld [vmem:[#allocation5 + $0x1338] sm:$0xff]  ;;  %v741_v7 = vld [vmem:[#allocation5 + $0x12c8] sm:$0xff]  ;;  %v772_v8 = vld [vmem:[#allocation5 + $0x13c0] sm:$0xff] }
 0x178   :  { %4801 = vmatprep.subr.bf16.mxu0 %v4800_v10  ;;  %v4850_v10 = vpack.c.bf16 %v723_v2, %v722_v1  ;;  %v4882_v11 = vpack.c.bf16 %v755_v5, %v754_v3  ;;  %v4852_v12 = vpack.c.bf16 %v741_v7, %v740_v6  ;;  %v725_v14 = vld [vmem:[#allocation5 + $0x1248] sm:$0xff]  ;;  %v743_v19 = vld [vmem:[#allocation5 + $0x12d8] sm:$0xff]  ;;  %v780_v6 = vld [vmem:[#allocation5 + $0x1400] sm:$0xff] }
 0x179   :  { %4831 = vmatpush3.bf16.msra.mxu1 %v4830_v9  ;;  %v773_v9 = vld [vmem:[#allocation5 + $0x13c8] sm:$0xff]  ;;  %v4856_v25 = vpack.c.bf16 %v743_v19, %v742_v18  ;;  %v731_v57 = vld [vmem:[#allocation5 + $0x1278] sm:$0xff]  ;;  %v782_v19 = vld [vmem:[#allocation5 + $0x1410] sm:$0xff] }
 0x17a   :  { %4833 = vmatprep.subr.bf16.mxu1 %v4832_v15  ;;  %v756_v15 = vld [vmem:[#allocation5 + $0x1340] sm:$0xff]  ;;  %v4884_v16 = vpack.c.bf16 %v773_v9, %v772_v8  ;;  %v763_v61 = vld [vmem:[#allocation5 + $0x1378] sm:$0xff]  ;;  %v829_v1 = vld [vmem:[#allocation5 + $0x1588] sm:$0xff] }
 0x17b   :  { %4803 = vmatpush3.bf16.msra.mxu0 %v4802_v22  ;;  %v775_v22 = vld [vmem:[#allocation5 + $0x13d8] sm:$0xff]  ;;  %v781_v7 = vld [vmem:[#allocation5 + $0x1408] sm:$0xff]  ;;  %v812_v8 = vld [vmem:[#allocation5 + $0x1500] sm:$0xff] }
 0x17c   :  { %4837 = vmatprep.subr.bf16.mxu0 %v4836_v24  ;;  %v4886_v24 = vpack.c.bf16 %v757_v17, %v756_v15  ;;  %v4888_v28 = vpack.c.bf16 %v775_v22, %v774_v20  ;;  %v813_v9 = vld [vmem:[#allocation5 + $0x1508] sm:$0xff]  ;;  %v4902_v15 = vpack.c.bf16 %v781_v7, %v780_v6  ;;  %v783_v20 = vld [vmem:[#allocation5 + $0x1418] sm:$0xff]  ;;  %v814_v22 = vld [vmem:[#allocation5 + $0x1510] sm:$0xff] }
 0x17d   :  { %4835 = vmatpush3.bf16.msra.mxu1 %v4834_v23  ;;  %v4854_v23 = vpack.c.bf16 %v725_v14, %v724_v13  ;;  %v831_v13 = vld [vmem:[#allocation5 + $0x1598] sm:$0xff]  ;;  %v4934_v17 = vpack.c.bf16 %v813_v9, %v812_v8  ;;  %v790_v7 = vld [vmem:[#allocation5 + $0x1450] sm:$0xff] }
 0x17e   :  { %4869 = vmatprep.subr.bf16.mxu1 %v4868_v40  ;;  %2240 = vmatmul.mubr.f32.vlgmr.msra.gmra.mrb[16].mxu0 %v115_v33  ;;  %v758_v40 = vld [vmem:[#allocation5 + $0x1350] sm:$0xff]  ;;  %v777_v33 = vld [vmem:[#allocation5 + $0x13e8] sm:$0xff]  ;;  %v119_v14 = vld [vmem:[#allocation2 + $0x120] sm:$0xff] }
 0x17f   :  { %4839 = vmatpush3.bf16.msra.mxu0 %v4838_v34  ;;  %2379 = vmatprep.mubr.f32.mxu0 %v120_v48  ;;  %v4858_v34 = vpack.c.bf16 %v727_v27, %v726_v26  ;;  %v778_v48 = vld [vmem:[#allocation5 + $0x13f0] sm:$0xff]  ;;  %v801_v26 = vld [vmem:[#allocation5 + $0x14a8] sm:$0xff]  ;;  %v832_v27 = vld [vmem:[#allocation5 + $0x15a0] sm:$0xff] }
 0x180   :  { %2310 = vmatmul.mubr.f32.vlgmr.msra.gmra.mrb[16].mxu1 %v117_v35  ;;  %4841 = vmatprep.subr.bf16.mxu0 %v4840_v37  ;;  %v4890_v35 = vpack.c.bf16 %v759_v29, %v758_v40  ;;  %v728_v37 = vld [vmem:[#allocation5 + $0x1260] sm:$0xff]  ;;  %v833_v40 = vld [vmem:[#allocation5 + $0x15a8] sm:$0xff]  ;;  %v4906_v29 = vpack.c.bf16 %v783_v20, %v782_v19  ;;  %v791_v8 = vld [vmem:[#allocation5 + $0x1458] sm:$0xff] }
 0x181   :  { %4871 = vmatpush3.bf16.msra.mxu1 %v4870_v36  ;;  %2449 = vmatprep.mubr.f32.mxu1 %v122_v50  ;;  %v4860_v36 = vpack.c.bf16 %v745_v31, %v744_v30  ;;  %v126_v30 = vld [vmem:[#allocation2 + $0x158] sm:$0xff]  ;;  %v793_v19 = vld [vmem:[#allocation5 + $0x1468] sm:$0xff]  ;;  %v824_v20 = vld [vmem:[#allocation5 + $0x1560] sm:$0xff] }
 0x182   :  { %4873 = vmatprep.subr.bf16.mxu1 %v4872_v42  ;;  %v4892_v42 = vpack.c.bf16 %v777_v33, %v776_v32  ;;  %v784_v33 = vld [vmem:[#allocation5 + $0x1420] sm:$0xff] }
 0x183   :  { %4843 = vmatpush3.bf16.msra.mxu0 %v4842_v49  ;;  %v779_v49 = vld [vmem:[#allocation5 + $0x13f8] sm:$0xff] }
 0x184   :  { %4845 = vmatprep.subr.bf16.mxu0 %v4844_v52  ;;  %v4862_v52 = vpack.c.bf16 %v729_v38, %v728_v37  ;;  %v4896_v60 = vpack.c.bf16 %v779_v49, %v778_v48  ;;  %v817_v37 = vld [vmem:[#allocation5 + $0x1528] sm:$0xff]  ;;  %v802_v38 = vld [vmem:[#allocation5 + $0x14b0] sm:$0xff] }
 0x185   :  { %4875 = vmatpush3.bf16.msra.mxu1 %v4874_v51  ;;  %v4912_v45 = vpack.c.bf16 %v803_v39, %v802_v38  ;;  %v818_v48 = vld [vmem:[#allocation5 + $0x1530] sm:$0xff] }
 0x186   :  { %4877 = vmatprep.subr.bf16.mxu1 %v4876_v56  ;;  %v730_v56 = vld [vmem:[#allocation5 + $0x1270] sm:$0xff] }
 0x187   :  { %4847 = vmatpush3.bf16.msra.mxu0 %v4846_v62  ;;  %v796_v62 = vld [vmem:[#allocation5 + $0x1480] sm:$0xff]  ;;  %v4866_v3 = vpack.c.bf16 %v731_v57, %v730_v56  ;;  %v826_v38 = vld [vmem:[#allocation5 + $0x1570] sm:$0xff] }
 0x188   :  { %4849 = vmatprep.subr.bf16.mxu0 %v4848_v0  ;;  %v828_v0 = vld [vmem:[#allocation5 + $0x1580] sm:$0xff] }
 0x189   :  { %4879 = vmatpush3.bf16.msra.mxu1 %v4878_v63  ;;  %v797_v63 = vld [vmem:[#allocation5 + $0x1488] sm:$0xff] }
 0x18a   :  { %4881 = vmatprep.subr.bf16.mxu1 %v4880_v4  ;;  %v4898_v4 = vpack.c.bf16 %v763_v61, %v762_v58  ;;  %v4900_v5 = vpack.c.bf16 %v797_v63, %v796_v62  ;;  %v788_v58 = vld [vmem:[#allocation5 + $0x1440] sm:$0xff]  ;;  %v821_v62 = vld [vmem:[#allocation5 + $0x1548] sm:$0xff]  ;;  %v806_v63 = vld [vmem:[#allocation5 + $0x14d0] sm:$0xff] }
 0x18b   :  { %4851 = vmatpush3.bf16.msra.mxu0 %v4850_v10  ;;  %v798_v10 = vld [vmem:[#allocation5 + $0x1490] sm:$0xff] }
 0x18c   :  { %4853 = vmatprep.subr.bf16.mxu0 %v4852_v12  ;;  %v830_v12 = vld [vmem:[#allocation5 + $0x1590] sm:$0xff] }
 0x18d   :  { %4883 = vmatpush3.bf16.msra.mxu1 %v4882_v11  ;;  %v799_v11 = vld [vmem:[#allocation5 + $0x1498] sm:$0xff] }
 0x18e   :  { %4885 = vmatprep.subr.bf16.mxu1 %v4884_v16  ;;  %v121_v16 = vld [vmem:[#allocation2 + $0x130] sm:$0xff]  ;;  %v4904_v18 = vpack.c.bf16 %v799_v11, %v798_v10  ;;  %v823_v10 = vld [vmem:[#allocation5 + $0x1558] sm:$0xff]  ;;  %v808_v11 = vld [vmem:[#allocation5 + $0x14e0] sm:$0xff] }
 0x18f   :  { %4855 = vmatpush3.bf16.msra.mxu0 %v4854_v23  ;;  %v4936_v23 = vpack.c.bf16 %v831_v13, %v830_v12  ;;  %v809_v12 = vld [vmem:[#allocation5 + $0x14e8] sm:$0xff]  ;;  %v840_v13 = vld [vmem:[#allocation5 + $0x15e0] sm:$0xff] }
 0x190   :  { %4857 = vmatprep.subr.bf16.mxu0 %v4856_v25  ;;  %v800_v25 = vld [vmem:[#allocation5 + $0x14a0] sm:$0xff] }
 0x191   :  { %4887 = vmatpush3.bf16.msra.mxu1 %v4886_v24  ;;  %v3372_v41 = vpop.f32.mrb[4].mxu0  ;;  %v815_v24 = vld [vmem:[#allocation5 + $0x1518] sm:$0xff]  ;;  %v4908_v32 = vpack.c.bf16 %v801_v26, %v800_v25  ;;  %v810_v25 = vld [vmem:[#allocation5 + $0x14f0] sm:$0xff] }
 0x192   :  { %4889 = vmatprep.subr.bf16.mxu1 %v4888_v28  ;;  %v3373_v46 = vpop.f32.mrb[5].mxu0  ;;  %v124_v28 = vld [vmem:[#allocation2 + $0x148] sm:$0xff]  ;;  %v4938_v31 = vpack.c.bf16 %v815_v24, %v814_v22  ;;  %v825_v24 = vld [vmem:[#allocation5 + $0x1568] sm:$0xff]  ;;  %v811_v26 = vld [vmem:[#allocation5 + $0x14f8] sm:$0xff] }
 0x193   :  { %v3407_v47 = vpop.f32.mrb[4].mxu1  ;;  %v3374_v50 = vadd.f32 %v3373_v46, %v3372_v41  ;;  %4859 = vmatpush3.bf16.msra.mxu0 %v4858_v34  ;;  %v785_v34 = vld [vmem:[#allocation5 + $0x1428] sm:$0xff]  ;;  %v834_v41 = vld [vmem:[#allocation5 + $0x15b0] sm:$0xff] }
 0x194   :  { %v3408_v51 = vpop.f32.mrb[5].mxu1  ;;  %4861 = vmatprep.subr.bf16.mxu0 %v4860_v36  ;;  %v4940_v36 = vpack.c.bf16 %v833_v40, %v832_v27  ;;  %v4910_v43 = vpack.c.bf16 %v785_v34, %v784_v33  ;;  %v786_v46 = vld [vmem:[#allocation5 + $0x1430] sm:$0xff]  ;;  %v4958_v34 = vpack.c.bf16 %v825_v24, %v824_v20  ;;  %v867_v20 = vld [vmem:[#allocation5 + $0x16b8] sm:$0xff] }
 0x195   :  { %v3409_v53 = vadd.f32 %v3408_v51, %v3407_v47  ;;  %4891 = vmatpush3.bf16.msra.mxu1 %v4890_v35  ;;  %v1402_v59 = vadd.f32 %v3374_v50, %v5447_v21  ;;  %v4932_v21 = vpack.c.bf16 %v829_v1, %v828_v0  ;;  %v816_v35 = vld [vmem:[#allocation5 + $0x1520] sm:$0xff]  ;;  %v787_v47 = vld [vmem:[#allocation5 + $0x1438] sm:$0xff]  ;;  %v838_v1 = vld [vmem:[#allocation5 + $0x15d0] sm:$0xff] }
 0x196   :  { %4893 = vmatprep.subr.bf16.mxu1 %v4892_v42  ;;  %v835_v42 = vld [vmem:[#allocation5 + $0x15b8] sm:$0xff]  ;;  %v4942_v44 = vpack.c.bf16 %v817_v37, %v816_v35  ;;  %v804_v51 = vld [vmem:[#allocation5 + $0x14c0] sm:$0xff]  ;;  %v4928_v35 = vpack.c.bf16 %v811_v26, %v810_v25 }
 0x197   :  { %v5450_v2 = vadd.f32 %v3409_v53, %v1402_v59  ;;  %4863 = vmatpush3.bf16.msra.mxu0 %v4862_v52  ;;  %v4944_v49 = vpack.c.bf16 %v835_v42, %v834_v41  ;;  %v819_v50 = vld [vmem:[#allocation5 + $0x1538] sm:$0xff]  ;;  %v805_v52 = vld [vmem:[#allocation5 + $0x14c8] sm:$0xff]  ;;  %v836_v53 = vld [vmem:[#allocation5 + $0x15c0] sm:$0xff] }
 0x198   :  { %4865 = vmatprep.subr.bf16.mxu0 %v4864_v55  ;;  %v4914_v55 = vpack.c.bf16 %v787_v47, %v786_v46  ;;  %v4946_v56 = vpack.c.bf16 %v819_v50, %v818_v48  ;;  %v4916_v57 = vpack.c.bf16 %v805_v52, %v804_v51  ;;  %v789_v59 = vld [vmem:[#allocation5 + $0x1448] sm:$0xff]  ;;  %v807_v0 = vld [vmem:[#allocation5 + $0x14d8] sm:$0xff]  ;;  %v844_v51 = vld [vmem:[#allocation5 + $0x1600] sm:$0xff] }
 0x199   :  { %4895 = vmatpush3.bf16.msra.mxu1 %v4894_v54  ;;  %v837_v54 = vld [vmem:[#allocation5 + $0x15c8] sm:$0xff]  ;;  %v4920_v6 = vpack.c.bf16 %v807_v0, %v806_v63  ;;  %v795_v37 = vld [vmem:[#allocation5 + $0x1478] sm:$0xff]  ;;  %v846_v0 = vld [vmem:[#allocation5 + $0x1610] sm:$0xff] }
 0x19a   :  { %4897 = vmatprep.subr.bf16.mxu1 %v4896_v60  ;;  %v820_v60 = vld [vmem:[#allocation5 + $0x1540] sm:$0xff]  ;;  %v4948_v61 = vpack.c.bf16 %v837_v54, %v836_v53  ;;  %v827_v42 = vld [vmem:[#allocation5 + $0x1578] sm:$0xff]  ;;  %v893_v46 = vld [vmem:[#allocation5 + $0x1788] sm:$0xff] }
 0x19b   :  { %4867 = vmatpush3.bf16.msra.mxu0 %v4866_v3  ;;  %v839_v3 = vld [vmem:[#allocation5 + $0x15d8] sm:$0xff]  ;;  %v845_v52 = vld [vmem:[#allocation5 + $0x1608] sm:$0xff]  ;;  %v876_v53 = vld [vmem:[#allocation5 + $0x1700] sm:$0xff] }
 0x19c   :  { %4901 = vmatprep.subr.bf16.mxu0 %v4900_v5  ;;  %v4950_v5 = vpack.c.bf16 %v821_v62, %v820_v60  ;;  %v4952_v9 = vpack.c.bf16 %v839_v3, %v838_v1  ;;  %v877_v54 = vld [vmem:[#allocation5 + $0x1708] sm:$0xff]  ;;  %v4966_v60 = vpack.c.bf16 %v845_v52, %v844_v51  ;;  %v847_v1 = vld [vmem:[#allocation5 + $0x1618] sm:$0xff]  ;;  %v878_v3 = vld [vmem:[#allocation5 + $0x1710] sm:$0xff] }
 0x19d   :  { %4899 = vmatpush3.bf16.msra.mxu1 %v4898_v4  ;;  %v4918_v4 = vpack.c.bf16 %v789_v59, %v788_v58  ;;  %v895_v58 = vld [vmem:[#allocation5 + $0x1798] sm:$0xff]  ;;  %v4998_v62 = vpack.c.bf16 %v877_v54, %v876_v53  ;;  %v854_v52 = vld [vmem:[#allocation5 + $0x1650] sm:$0xff] }
 0x19e   :  { %4933 = vmatprep.subr.bf16.mxu1 %v4932_v21  ;;  %2380 = vmatmul.mubr.f32.vlgmr.msra.gmra.mrb[18].mxu0 %v119_v14  ;;  %v822_v21 = vld [vmem:[#allocation5 + $0x1550] sm:$0xff]  ;;  %v841_v14 = vld [vmem:[#allocation5 + $0x15e8] sm:$0xff]  ;;  %v123_v59 = vld [vmem:[#allocation2 + $0x140] sm:$0xff] }
 0x19f   :  { %4903 = vmatpush3.bf16.msra.mxu0 %v4902_v15  ;;  %2519 = vmatprep.mubr.f32.mxu0 %v124_v28  ;;  %v4922_v15 = vpack.c.bf16 %v791_v8, %v790_v7  ;;  %v842_v28 = vld [vmem:[#allocation5 + $0x15f0] sm:$0xff]  ;;  %v865_v7 = vld [vmem:[#allocation5 + $0x16a8] sm:$0xff]  ;;  %v896_v8 = vld [vmem:[#allocation5 + $0x17a0] sm:$0xff] }
 0x1a0   :  { %2450 = vmatmul.mubr.f32.vlgmr.msra.gmra.mrb[18].mxu1 %v121_v16  ;;  %4905 = vmatprep.subr.bf16.mxu0 %v4904_v18  ;;  %v4954_v16 = vpack.c.bf16 %v823_v10, %v822_v21  ;;  %v792_v18 = vld [vmem:[#allocation5 + $0x1460] sm:$0xff]  ;;  %v897_v21 = vld [vmem:[#allocation5 + $0x17a8] sm:$0xff]  ;;  %v4970_v10 = vpack.c.bf16 %v847_v1, %v846_v0  ;;  %v855_v53 = vld [vmem:[#allocation5 + $0x1658] sm:$0xff] }
 0x1a1   :  { %4935 = vmatpush3.bf16.msra.mxu1 %v4934_v17  ;;  %2589 = vmatprep.mubr.f32.mxu1 %v126_v30  ;;  %v4924_v17 = vpack.c.bf16 %v809_v12, %v808_v11  ;;  %v130_v11 = vld [vmem:[#allocation2 + $0x178] sm:$0xff]  ;;  %v857_v0 = vld [vmem:[#allocation5 + $0x1668] sm:$0xff]  ;;  %v888_v1 = vld [vmem:[#allocation5 + $0x1760] sm:$0xff] }
 0x1a2   :  { %4937 = vmatprep.subr.bf16.mxu1 %v4936_v23  ;;  %v4956_v23 = vpack.c.bf16 %v841_v14, %v840_v13  ;;  %v848_v14 = vld [vmem:[#allocation5 + $0x1620] sm:$0xff] }
 0x1a3   :  { %4907 = vmatpush3.bf16.msra.mxu0 %v4906_v29  ;;  %v843_v29 = vld [vmem:[#allocation5 + $0x15f8] sm:$0xff] }
 0x1a4   :  { %4909 = vmatprep.subr.bf16.mxu0 %v4908_v32  ;;  %v4926_v32 = vpack.c.bf16 %v793_v19, %v792_v18  ;;  %v4960_v41 = vpack.c.bf16 %v843_v29, %v842_v28  ;;  %v881_v18 = vld [vmem:[#allocation5 + $0x1728] sm:$0xff]  ;;  %v866_v19 = vld [vmem:[#allocation5 + $0x16b0] sm:$0xff] }
 0x1a5   :  { %4939 = vmatpush3.bf16.msra.mxu1 %v4938_v31  ;;  %v4976_v26 = vpack.c.bf16 %v867_v20, %v866_v19  ;;  %v882_v28 = vld [vmem:[#allocation5 + $0x1730] sm:$0xff] }
 0x1a6   :  { %4941 = vmatprep.subr.bf16.mxu1 %v4940_v36  ;;  %v794_v36 = vld [vmem:[#allocation5 + $0x1470] sm:$0xff] }
 0x1a7   :  { %4911 = vmatpush3.bf16.msra.mxu0 %v4910_v43  ;;  %v860_v43 = vld [vmem:[#allocation5 + $0x1680] sm:$0xff]  ;;  %v4930_v48 = vpack.c.bf16 %v795_v37, %v794_v36  ;;  %v890_v19 = vld [vmem:[#allocation5 + $0x1770] sm:$0xff] }
 0x1a8   :  { %4913 = vmatprep.subr.bf16.mxu0 %v4912_v45  ;;  %v892_v45 = vld [vmem:[#allocation5 + $0x1780] sm:$0xff] }
 0x1a9   :  { %4943 = vmatpush3.bf16.msra.mxu1 %v4942_v44  ;;  %v861_v44 = vld [vmem:[#allocation5 + $0x1688] sm:$0xff] }
 0x1aa   :  { %4945 = vmatprep.subr.bf16.mxu1 %v4944_v49  ;;  %v4962_v49 = vpack.c.bf16 %v827_v42, %v826_v38  ;;  %v4964_v50 = vpack.c.bf16 %v861_v44, %v860_v43  ;;  %v852_v38 = vld [vmem:[#allocation5 + $0x1640] sm:$0xff]  ;;  %v885_v43 = vld [vmem:[#allocation5 + $0x1748] sm:$0xff]  ;;  %v870_v44 = vld [vmem:[#allocation5 + $0x16d0] sm:$0xff] }
 0x1ab   :  { %4915 = vmatpush3.bf16.msra.mxu0 %v4914_v55  ;;  %v862_v55 = vld [vmem:[#allocation5 + $0x1690] sm:$0xff] }
 0x1ac   :  { %4917 = vmatprep.subr.bf16.mxu0 %v4916_v57  ;;  %v894_v57 = vld [vmem:[#allocation5 + $0x1790] sm:$0xff] }
 0x1ad   :  { %4947 = vmatpush3.bf16.msra.mxu1 %v4946_v56  ;;  %v863_v56 = vld [vmem:[#allocation5 + $0x1698] sm:$0xff] }
 0x1ae   :  { %4949 = vmatprep.subr.bf16.mxu1 %v4948_v61  ;;  %v125_v61 = vld [vmem:[#allocation2 + $0x150] sm:$0xff]  ;;  %v4968_v63 = vpack.c.bf16 %v863_v56, %v862_v55  ;;  %v887_v55 = vld [vmem:[#allocation5 + $0x1758] sm:$0xff]  ;;  %v872_v56 = vld [vmem:[#allocation5 + $0x16e0] sm:$0xff] }
 0x1af   :  { %4919 = vmatpush3.bf16.msra.mxu0 %v4918_v4  ;;  %v5000_v4 = vpack.c.bf16 %v895_v58, %v894_v57  ;;  %v873_v57 = vld [vmem:[#allocation5 + $0x16e8] sm:$0xff]  ;;  %v904_v58 = vld [vmem:[#allocation5 + $0x17e0] sm:$0xff] }
 0x1b0   :  { %4921 = vmatprep.subr.bf16.mxu0 %v4920_v6  ;;  %v864_v6 = vld [vmem:[#allocation5 + $0x16a0] sm:$0xff] }
 0x1b1   :  { %4951 = vmatpush3.bf16.msra.mxu1 %v4950_v5  ;;  %v3442_v22 = vpop.f32.mrb[6].mxu0  ;;  %v879_v5 = vld [vmem:[#allocation5 + $0x1718] sm:$0xff]  ;;  %v4972_v13 = vpack.c.bf16 %v865_v7, %v864_v6  ;;  %v874_v6 = vld [vmem:[#allocation5 + $0x16f0] sm:$0xff] }
 0x1b2   :  { %4953 = vmatprep.subr.bf16.mxu1 %v4952_v9  ;;  %v3443_v27 = vpop.f32.mrb[7].mxu0  ;;  %v128_v9 = vld [vmem:[#allocation2 + $0x168] sm:$0xff]  ;;  %v5002_v12 = vpack.c.bf16 %v879_v5, %v878_v3  ;;  %v889_v5 = vld [vmem:[#allocation5 + $0x1768] sm:$0xff]  ;;  %v875_v7 = vld [vmem:[#allocation5 + $0x16f8] sm:$0xff] }
 0x1b3   :  { %v3477_v40 = vpop.f32.mrb[6].mxu1  ;;  %v3444_v30 = vadd.f32 %v3443_v27, %v3442_v22  ;;  %4923 = vmatpush3.bf16.msra.mxu0 %v4922_v15  ;;  %v849_v15 = vld [vmem:[#allocation5 + $0x1628] sm:$0xff]  ;;  %v898_v22 = vld [vmem:[#allocation5 + $0x17b0] sm:$0xff] }
 0x1b4   :  { %v3478_v31 = vpop.f32.mrb[7].mxu1  ;;  %4925 = vmatprep.subr.bf16.mxu0 %v4924_v17  ;;  %v5004_v17 = vpack.c.bf16 %v897_v21, %v896_v8  ;;  %v4974_v24 = vpack.c.bf16 %v849_v15, %v848_v14  ;;  %v850_v27 = vld [vmem:[#allocation5 + $0x1630] sm:$0xff]  ;;  %v5022_v15 = vpack.c.bf16 %v889_v5, %v888_v1  ;;  %v931_v1 = vld [vmem:[#allocation5 + $0x18b8] sm:$0xff] }
 0x1b5   :  { %v3479_v33 = vadd.f32 %v3478_v31, %v3477_v40  ;;  %4955 = vmatpush3.bf16.msra.mxu1 %v4954_v16  ;;  %v1542_v39 = vadd.f32 %v3444_v30, %v5450_v2  ;;  %v4996_v2 = vpack.c.bf16 %v893_v46, %v892_v45  ;;  %v880_v16 = vld [vmem:[#allocation5 + $0x1720] sm:$0xff]  ;;  %v851_v40 = vld [vmem:[#allocation5 + $0x1638] sm:$0xff]  ;;  %v902_v46 = vld [vmem:[#allocation5 + $0x17d0] sm:$0xff] }
 0x1b6   :  { %4957 = vmatprep.subr.bf16.mxu1 %v4956_v23  ;;  %v899_v23 = vld [vmem:[#allocation5 + $0x17b8] sm:$0xff]  ;;  %v5006_v25 = vpack.c.bf16 %v881_v18, %v880_v16  ;;  %v868_v31 = vld [vmem:[#allocation5 + $0x16c0] sm:$0xff]  ;;  %v4992_v16 = vpack.c.bf16 %v875_v7, %v874_v6 }
 0x1b7   :  { %v5453_v47 = vadd.f32 %v3479_v33, %v1542_v39  ;;  %4927 = vmatpush3.bf16.msra.mxu0 %v4926_v32  ;;  %v5008_v29 = vpack.c.bf16 %v899_v23, %v898_v22  ;;  %v883_v30 = vld [vmem:[#allocation5 + $0x1738] sm:$0xff]  ;;  %v869_v32 = vld [vmem:[#allocation5 + $0x16c8] sm:$0xff]  ;;  %v900_v33 = vld [vmem:[#allocation5 + $0x17c0] sm:$0xff] }
 0x1b8   :  { %4929 = vmatprep.subr.bf16.mxu0 %v4928_v35  ;;  %v4978_v35 = vpack.c.bf16 %v851_v40, %v850_v27  ;;  %v5010_v36 = vpack.c.bf16 %v883_v30, %v882_v28  ;;  %v4980_v37 = vpack.c.bf16 %v869_v32, %v868_v31  ;;  %v853_v39 = vld [vmem:[#allocation5 + $0x1648] sm:$0xff]  ;;  %v871_v45 = vld [vmem:[#allocation5 + $0x16d8] sm:$0xff]  ;;  %v908_v31 = vld [vmem:[#allocation5 + $0x1800] sm:$0xff] }
 0x1b9   :  { %4959 = vmatpush3.bf16.msra.mxu1 %v4958_v34  ;;  %v901_v34 = vld [vmem:[#allocation5 + $0x17c8] sm:$0xff]  ;;  %v4984_v51 = vpack.c.bf16 %v871_v45, %v870_v44  ;;  %v859_v18 = vld [vmem:[#allocation5 + $0x1678] sm:$0xff]  ;;  %v910_v45 = vld [vmem:[#allocation5 + $0x1810] sm:$0xff] }
 0x1ba   :  { %4961 = vmatprep.subr.bf16.mxu1 %v4960_v41  ;;  %v884_v41 = vld [vmem:[#allocation5 + $0x1740] sm:$0xff]  ;;  %v5012_v42 = vpack.c.bf16 %v901_v34, %v900_v33  ;;  %v891_v23 = vld [vmem:[#allocation5 + $0x1778] sm:$0xff]  ;;  %v957_v27 = vld [vmem:[#allocation5 + $0x1988] sm:$0xff] }
 0x1bb   :  { %4931 = vmatpush3.bf16.msra.mxu0 %v4930_v48  ;;  %v903_v48 = vld [vmem:[#allocation5 + $0x17d8] sm:$0xff]  ;;  %v909_v32 = vld [vmem:[#allocation5 + $0x1808] sm:$0xff]  ;;  %v940_v33 = vld [vmem:[#allocation5 + $0x1900] sm:$0xff] }
 0x1bc   :  { %4965 = vmatprep.subr.bf16.mxu0 %v4964_v50  ;;  %v5014_v50 = vpack.c.bf16 %v885_v43, %v884_v41  ;;  %v5016_v54 = vpack.c.bf16 %v903_v48, %v902_v46  ;;  %v941_v34 = vld [vmem:[#allocation5 + $0x1908] sm:$0xff]  ;;  %v5030_v41 = vpack.c.bf16 %v909_v32, %v908_v31  ;;  %v911_v46 = vld [vmem:[#allocation5 + $0x1818] sm:$0xff]  ;;  %v942_v48 = vld [vmem:[#allocation5 + $0x1910] sm:$0xff] }
 0x1bd   :  { %4963 = vmatpush3.bf16.msra.mxu1 %v4962_v49  ;;  %v4982_v49 = vpack.c.bf16 %v853_v39, %v852_v38  ;;  %v959_v38 = vld [vmem:[#allocation5 + $0x1998] sm:$0xff]  ;;  %v5062_v43 = vpack.c.bf16 %v941_v34, %v940_v33  ;;  %v918_v32 = vld [vmem:[#allocation5 + $0x1850] sm:$0xff] }
 0x1be   :  { %4997 = vmatprep.subr.bf16.mxu1 %v4996_v2  ;;  %2520 = vmatmul.mubr.f32.vlgmr.msra.gmra.mrb[20].mxu0 %v123_v59  ;;  %v886_v2 = vld [vmem:[#allocation5 + $0x1750] sm:$0xff]  ;;  %v905_v59 = vld [vmem:[#allocation5 + $0x17e8] sm:$0xff]  ;;  %v127_v39 = vld [vmem:[#allocation2 + $0x160] sm:$0xff] }
 0x1bf   :  { %4967 = vmatpush3.bf16.msra.mxu0 %v4966_v60  ;;  %2659 = vmatprep.mubr.f32.mxu0 %v128_v9  ;;  %v4986_v60 = vpack.c.bf16 %v855_v53, %v854_v52  ;;  %v906_v9 = vld [vmem:[#allocation5 + $0x17f0] sm:$0xff]  ;;  %v929_v52 = vld [vmem:[#allocation5 + $0x18a8] sm:$0xff]  ;;  %v960_v53 = vld [vmem:[#allocation5 + $0x19a0] sm:$0xff] }
 0x1c0   :  { %2590 = vmatmul.mubr.f32.vlgmr.msra.gmra.mrb[20].mxu1 %v125_v61  ;;  %4969 = vmatprep.subr.bf16.mxu0 %v4968_v63  ;;  %v5018_v61 = vpack.c.bf16 %v887_v55, %v886_v2  ;;  %v856_v63 = vld [vmem:[#allocation5 + $0x1660] sm:$0xff]  ;;  %v961_v2 = vld [vmem:[#allocation5 + $0x19a8] sm:$0xff]  ;;  %v5034_v55 = vpack.c.bf16 %v911_v46, %v910_v45  ;;  %v919_v33 = vld [vmem:[#allocation5 + $0x1858] sm:$0xff] }
 0x1c1   :  { %4999 = vmatpush3.bf16.msra.mxu1 %v4998_v62  ;;  %2729 = vmatprep.mubr.f32.mxu1 %v130_v11  ;;  %v4988_v62 = vpack.c.bf16 %v873_v57, %v872_v56  ;;  %v134_v56 = vld [vmem:[#allocation2 + $0x198] sm:$0xff]  ;;  %v921_v45 = vld [vmem:[#allocation5 + $0x1868] sm:$0xff]  ;;  %v952_v46 = vld [vmem:[#allocation5 + $0x1960] sm:$0xff] }
 0x1c2   :  { %5001 = vmatprep.subr.bf16.mxu1 %v5000_v4  ;;  %v5020_v4 = vpack.c.bf16 %v905_v59, %v904_v58  ;;  %v912_v59 = vld [vmem:[#allocation5 + $0x1820] sm:$0xff] }
 0x1c3   :  { %4971 = vmatpush3.bf16.msra.mxu0 %v4970_v10  ;;  %v907_v10 = vld [vmem:[#allocation5 + $0x17f8] sm:$0xff] }
 0x1c4   :  { %4973 = vmatprep.subr.bf16.mxu0 %v4972_v13  ;;  %v4990_v13 = vpack.c.bf16 %v857_v0, %v856_v63  ;;  %v5024_v22 = vpack.c.bf16 %v907_v10, %v906_v9  ;;  %v945_v63 = vld [vmem:[#allocation5 + $0x1928] sm:$0xff]  ;;  %v930_v0 = vld [vmem:[#allocation5 + $0x18b0] sm:$0xff] }
 0x1c5   :  { %5003 = vmatpush3.bf16.msra.mxu1 %v5002_v12  ;;  %v5040_v7 = vpack.c.bf16 %v931_v1, %v930_v0  ;;  %v946_v9 = vld [vmem:[#allocation5 + $0x1930] sm:$0xff] }
 0x1c6   :  { %5005 = vmatprep.subr.bf16.mxu1 %v5004_v17  ;;  %v858_v17 = vld [vmem:[#allocation5 + $0x1670] sm:$0xff] }
 0x1c7   :  { %4975 = vmatpush3.bf16.msra.mxu0 %v4974_v24  ;;  %v924_v24 = vld [vmem:[#allocation5 + $0x1880] sm:$0xff]  ;;  %v4994_v28 = vpack.c.bf16 %v859_v18, %v858_v17  ;;  %v954_v0 = vld [vmem:[#allocation5 + $0x1970] sm:$0xff] }
 0x1c8   :  { %4977 = vmatprep.subr.bf16.mxu0 %v4976_v26  ;;  %v956_v26 = vld [vmem:[#allocation5 + $0x1980] sm:$0xff] }
 0x1c9   :  { %5007 = vmatpush3.bf16.msra.mxu1 %v5006_v25  ;;  %v925_v25 = vld [vmem:[#allocation5 + $0x1888] sm:$0xff] }
 0x1ca   :  { %5009 = vmatprep.subr.bf16.mxu1 %v5008_v29  ;;  %v5026_v29 = vpack.c.bf16 %v891_v23, %v890_v19  ;;  %v5028_v30 = vpack.c.bf16 %v925_v25, %v924_v24  ;;  %v916_v19 = vld [vmem:[#allocation5 + $0x1840] sm:$0xff]  ;;  %v949_v24 = vld [vmem:[#allocation5 + $0x1948] sm:$0xff]  ;;  %v934_v25 = vld [vmem:[#allocation5 + $0x18d0] sm:$0xff] }
 0x1cb   :  { %4979 = vmatpush3.bf16.msra.mxu0 %v4978_v35  ;;  %v926_v35 = vld [vmem:[#allocation5 + $0x1890] sm:$0xff] }
 0x1cc   :  { %4981 = vmatprep.subr.bf16.mxu0 %v4980_v37  ;;  %v958_v37 = vld [vmem:[#allocation5 + $0x1990] sm:$0xff] }
 0x1cd   :  { %5011 = vmatpush3.bf16.msra.mxu1 %v5010_v36  ;;  %v927_v36 = vld [vmem:[#allocation5 + $0x1898] sm:$0xff] }
 0x1ce   :  { %5013 = vmatprep.subr.bf16.mxu1 %v5012_v42  ;;  %v129_v42 = vld [vmem:[#allocation2 + $0x170] sm:$0xff]  ;;  %v5032_v44 = vpack.c.bf16 %v927_v36, %v926_v35  ;;  %v951_v35 = vld [vmem:[#allocation5 + $0x1958] sm:$0xff]  ;;  %v936_v36 = vld [vmem:[#allocation5 + $0x18e0] sm:$0xff] }
 0x1cf   :  { %4983 = vmatpush3.bf16.msra.mxu0 %v4982_v49  ;;  %v5064_v49 = vpack.c.bf16 %v959_v38, %v958_v37  ;;  %v937_v37 = vld [vmem:[#allocation5 + $0x18e8] sm:$0xff]  ;;  %v968_v38 = vld [vmem:[#allocation5 + $0x19e0] sm:$0xff] }
 0x1d0   :  { %4985 = vmatprep.subr.bf16.mxu0 %v4984_v51  ;;  %v928_v51 = vld [vmem:[#allocation5 + $0x18a0] sm:$0xff] }
 0x1d1   :  { %5015 = vmatpush3.bf16.msra.mxu1 %v5014_v50  ;;  %v3512_v3 = vpop.f32.mrb[8].mxu0  ;;  %v943_v50 = vld [vmem:[#allocation5 + $0x1918] sm:$0xff]  ;;  %v5036_v58 = vpack.c.bf16 %v929_v52, %v928_v51  ;;  %v938_v51 = vld [vmem:[#allocation5 + $0x18f0] sm:$0xff] }
 0x1d2   :  { %5017 = vmatprep.subr.bf16.mxu1 %v5016_v54  ;;  %v3513_v8 = vpop.f32.mrb[9].mxu0  ;;  %v132_v54 = vld [vmem:[#allocation2 + $0x188] sm:$0xff]  ;;  %v5066_v57 = vpack.c.bf16 %v943_v50, %v942_v48  ;;  %v953_v50 = vld [vmem:[#allocation5 + $0x1968] sm:$0xff]  ;;  %v939_v52 = vld [vmem:[#allocation5 + $0x18f8] sm:$0xff] }
 0x1d3   :  { %v3547_v21 = vpop.f32.mrb[8].mxu1  ;;  %v3514_v11 = vadd.f32 %v3513_v8, %v3512_v3  ;;  %4987 = vmatpush3.bf16.msra.mxu0 %v4986_v60  ;;  %v913_v60 = vld [vmem:[#allocation5 + $0x1828] sm:$0xff]  ;;  %v962_v3 = vld [vmem:[#allocation5 + $0x19b0] sm:$0xff] }
 0x1d4   :  { %v3548_v12 = vpop.f32.mrb[9].mxu1  ;;  %4989 = vmatprep.subr.bf16.mxu0 %v4988_v62  ;;  %v5068_v62 = vpack.c.bf16 %v961_v2, %v960_v53  ;;  %v5038_v5 = vpack.c.bf16 %v913_v60, %v912_v59  ;;  %v914_v8 = vld [vmem:[#allocation5 + $0x1830] sm:$0xff]  ;;  %v5086_v60 = vpack.c.bf16 %v953_v50, %v952_v46  ;;  %v995_v46 = vld [vmem:[#allocation5 + $0x1ab8] sm:$0xff] }
 0x1d5   :  { %v3549_v14 = vadd.f32 %v3548_v12, %v3547_v21  ;;  %5019 = vmatpush3.bf16.msra.mxu1 %v5018_v61  ;;  %v1682_v20 = vadd.f32 %v3514_v11, %v5453_v47  ;;  %v5060_v47 = vpack.c.bf16 %v957_v27, %v956_v26  ;;  %v944_v61 = vld [vmem:[#allocation5 + $0x1920] sm:$0xff]  ;;  %v915_v21 = vld [vmem:[#allocation5 + $0x1838] sm:$0xff]  ;;  %v966_v27 = vld [vmem:[#allocation5 + $0x19d0] sm:$0xff] }
 0x1d6   :  { %5021 = vmatprep.subr.bf16.mxu1 %v5020_v4  ;;  %v963_v4 = vld [vmem:[#allocation5 + $0x19b8] sm:$0xff]  ;;  %v5070_v6 = vpack.c.bf16 %v945_v63, %v944_v61  ;;  %v932_v12 = vld [vmem:[#allocation5 + $0x18c0] sm:$0xff]  ;;  %v5056_v61 = vpack.c.bf16 %v939_v52, %v938_v51 }
 0x1d7   :  { %v5456_v40 = vadd.f32 %v3549_v14, %v1682_v20  ;;  %4991 = vmatpush3.bf16.msra.mxu0 %v4990_v13  ;;  %v5072_v10 = vpack.c.bf16 %v963_v4, %v962_v3  ;;  %v947_v11 = vld [vmem:[#allocation5 + $0x1938] sm:$0xff]  ;;  %v933_v13 = vld [vmem:[#allocation5 + $0x18c8] sm:$0xff]  ;;  %v964_v14 = vld [vmem:[#allocation5 + $0x19c0] sm:$0xff] }
 0x1d8   :  { %4993 = vmatprep.subr.bf16.mxu0 %v4992_v16  ;;  %v5042_v16 = vpack.c.bf16 %v915_v21, %v914_v8  ;;  %v5074_v17 = vpack.c.bf16 %v947_v11, %v946_v9  ;;  %v5044_v18 = vpack.c.bf16 %v933_v13, %v932_v12  ;;  %v917_v20 = vld [vmem:[#allocation5 + $0x1848] sm:$0xff]  ;;  %v935_v26 = vld [vmem:[#allocation5 + $0x18d8] sm:$0xff]  ;;  %v972_v12 = vld [vmem:[#allocation5 + $0x1a00] sm:$0xff] }
 0x1d9   :  { %5023 = vmatpush3.bf16.msra.mxu1 %v5022_v15  ;;  %v965_v15 = vld [vmem:[#allocation5 + $0x19c8] sm:$0xff]  ;;  %v5048_v31 = vpack.c.bf16 %v935_v26, %v934_v25  ;;  %v923_v63 = vld [vmem:[#allocation5 + $0x1878] sm:$0xff]  ;;  %v974_v26 = vld [vmem:[#allocation5 + $0x1a10] sm:$0xff] }
 0x1da   :  { %5025 = vmatprep.subr.bf16.mxu1 %v5024_v22  ;;  %v948_v22 = vld [vmem:[#allocation5 + $0x1940] sm:$0xff]  ;;  %v5076_v23 = vpack.c.bf16 %v965_v15, %v964_v14  ;;  %v955_v4 = vld [vmem:[#allocation5 + $0x1978] sm:$0xff]  ;;  %v1021_v8 = vld [vmem:[#allocation5 + $0x1b88] sm:$0xff] }
 0x1db   :  { %4995 = vmatpush3.bf16.msra.mxu0 %v4994_v28  ;;  %v967_v28 = vld [vmem:[#allocation5 + $0x19d8] sm:$0xff]  ;;  %v973_v13 = vld [vmem:[#allocation5 + $0x1a08] sm:$0xff]  ;;  %v1004_v14 = vld [vmem:[#allocation5 + $0x1b00] sm:$0xff] }
 0x1dc   :  { %5029 = vmatprep.subr.bf16.mxu0 %v5028_v30  ;;  %v5078_v30 = vpack.c.bf16 %v949_v24, %v948_v22  ;;  %v5080_v34 = vpack.c.bf16 %v967_v28, %v966_v27  ;;  %v1005_v15 = vld [vmem:[#allocation5 + $0x1b08] sm:$0xff]  ;;  %v5094_v22 = vpack.c.bf16 %v973_v13, %v972_v12  ;;  %v975_v27 = vld [vmem:[#allocation5 + $0x1a18] sm:$0xff]  ;;  %v1006_v28 = vld [vmem:[#allocation5 + $0x1b10] sm:$0xff] }
 0x1dd   :  { %5027 = vmatpush3.bf16.msra.mxu1 %v5026_v29  ;;  %v5046_v29 = vpack.c.bf16 %v917_v20, %v916_v19  ;;  %v1023_v19 = vld [vmem:[#allocation5 + $0x1b98] sm:$0xff]  ;;  %v5126_v24 = vpack.c.bf16 %v1005_v15, %v1004_v14  ;;  %v982_v13 = vld [vmem:[#allocation5 + $0x1a50] sm:$0xff] }
 0x1de   :  { %5061 = vmatprep.subr.bf16.mxu1 %v5060_v47  ;;  %2660 = vmatmul.mubr.f32.vlgmr.msra.gmra.mrb[22].mxu0 %v127_v39  ;;  %v950_v47 = vld [vmem:[#allocation5 + $0x1950] sm:$0xff]  ;;  %v969_v39 = vld [vmem:[#allocation5 + $0x19e8] sm:$0xff]  ;;  %v131_v20 = vld [vmem:[#allocation2 + $0x180] sm:$0xff] }
 0x1df   :  { %5031 = vmatpush3.bf16.msra.mxu0 %v5030_v41  ;;  %2799 = vmatprep.mubr.f32.mxu0 %v132_v54  ;;  %v5050_v41 = vpack.c.bf16 %v919_v33, %v918_v32  ;;  %v970_v54 = vld [vmem:[#allocation5 + $0x19f0] sm:$0xff]  ;;  %v993_v32 = vld [vmem:[#allocation5 + $0x1aa8] sm:$0xff]  ;;  %v1024_v33 = vld [vmem:[#allocation5 + $0x1ba0] sm:$0xff] }
 0x1e0   :  { %2730 = vmatmul.mubr.f32.vlgmr.msra.gmra.mrb[22].mxu1 %v129_v42  ;;  %5033 = vmatprep.subr.bf16.mxu0 %v5032_v44  ;;  %v5082_v42 = vpack.c.bf16 %v951_v35, %v950_v47  ;;  %v920_v44 = vld [vmem:[#allocation5 + $0x1860] sm:$0xff]  ;;  %v1025_v47 = vld [vmem:[#allocation5 + $0x1ba8] sm:$0xff]  ;;  %v5098_v35 = vpack.c.bf16 %v975_v27, %v974_v26  ;;  %v983_v14 = vld [vmem:[#allocation5 + $0x1a58] sm:$0xff] }
 0x1e1   :  { %5063 = vmatpush3.bf16.msra.mxu1 %v5062_v43  ;;  %2869 = vmatprep.mubr.f32.mxu1 %v134_v56  ;;  %v5052_v43 = vpack.c.bf16 %v937_v37, %v936_v36  ;;  %v138_v36 = vld [vmem:[#allocation2 + $0x1b8] sm:$0xff]  ;;  %v985_v26 = vld [vmem:[#allocation5 + $0x1a68] sm:$0xff]  ;;  %v1016_v27 = vld [vmem:[#allocation5 + $0x1b60] sm:$0xff] }
 0x1e2   :  { %5065 = vmatprep.subr.bf16.mxu1 %v5064_v49  ;;  %v5084_v49 = vpack.c.bf16 %v969_v39, %v968_v38  ;;  %v976_v39 = vld [vmem:[#allocation5 + $0x1a20] sm:$0xff] }
 0x1e3   :  { %5035 = vmatpush3.bf16.msra.mxu0 %v5034_v55  ;;  %v971_v55 = vld [vmem:[#allocation5 + $0x19f8] sm:$0xff] }
 0x1e4   :  { %5037 = vmatprep.subr.bf16.mxu0 %v5036_v58  ;;  %v5054_v58 = vpack.c.bf16 %v921_v45, %v920_v44  ;;  %v5088_v3 = vpack.c.bf16 %v971_v55, %v970_v54  ;;  %v1009_v44 = vld [vmem:[#allocation5 + $0x1b28] sm:$0xff]  ;;  %v994_v45 = vld [vmem:[#allocation5 + $0x1ab0] sm:$0xff] }
 0x1e5   :  { %5067 = vmatpush3.bf16.msra.mxu1 %v5066_v57  ;;  %v5104_v52 = vpack.c.bf16 %v995_v46, %v994_v45  ;;  %v1010_v54 = vld [vmem:[#allocation5 + $0x1b30] sm:$0xff] }
 0x1e6   :  { %5069 = vmatprep.subr.bf16.mxu1 %v5068_v62  ;;  %v922_v62 = vld [vmem:[#allocation5 + $0x1870] sm:$0xff] }
 0x1e7   :  { %5039 = vmatpush3.bf16.msra.mxu0 %v5038_v5  ;;  %v988_v5 = vld [vmem:[#allocation5 + $0x1a80] sm:$0xff]  ;;  %v5058_v9 = vpack.c.bf16 %v923_v63, %v922_v62 }
 0x1e8   :  { %5041 = vmatprep.subr.bf16.mxu0 %v5040_v7  ;;  %v1020_v7 = vld [vmem:[#allocation5 + $0x1b80] sm:$0xff] }
 0x1e9   :  { %5071 = vmatpush3.bf16.msra.mxu1 %v5070_v6  ;;  %v989_v6 = vld [vmem:[#allocation5 + $0x1a88] sm:$0xff] }
 0x1ea   :  { %5073 = vmatprep.subr.bf16.mxu1 %v5072_v10  ;;  %v5090_v10 = vpack.c.bf16 %v955_v4, %v954_v0  ;;  %v5092_v11 = vpack.c.bf16 %v989_v6, %v988_v5  ;;  %v980_v0 = vld [vmem:[#allocation5 + $0x1a40] sm:$0xff]  ;;  %v1013_v5 = vld [vmem:[#allocation5 + $0x1b48] sm:$0xff]  ;;  %v998_v6 = vld [vmem:[#allocation5 + $0x1ad0] sm:$0xff] }
 0x1eb   :  { %5043 = vmatpush3.bf16.msra.mxu0 %v5042_v16  ;;  %v990_v16 = vld [vmem:[#allocation5 + $0x1a90] sm:$0xff] }
 0x1ec   :  { %5045 = vmatprep.subr.bf16.mxu0 %v5044_v18  ;;  %v1022_v18 = vld [vmem:[#allocation5 + $0x1b90] sm:$0xff] }
 0x1ed   :  { %5075 = vmatpush3.bf16.msra.mxu1 %v5074_v17  ;;  %v991_v17 = vld [vmem:[#allocation5 + $0x1a98] sm:$0xff] }
 0x1ee   :  { %5077 = vmatprep.subr.bf16.mxu1 %v5076_v23  ;;  %v133_v23 = vld [vmem:[#allocation2 + $0x190] sm:$0xff]  ;;  %v5096_v25 = vpack.c.bf16 %v991_v17, %v990_v16  ;;  %v1015_v16 = vld [vmem:[#allocation5 + $0x1b58] sm:$0xff]  ;;  %v1000_v17 = vld [vmem:[#allocation5 + $0x1ae0] sm:$0xff] }
 0x1ef   :  { %5047 = vmatpush3.bf16.msra.mxu0 %v5046_v29  ;;  %v5128_v29 = vpack.c.bf16 %v1023_v19, %v1022_v18  ;;  %v1001_v18 = vld [vmem:[#allocation5 + $0x1ae8] sm:$0xff]  ;;  %v1032_v19 = vld [vmem:[#allocation5 + $0x1be0] sm:$0xff] }
 0x1f0   :  { %5049 = vmatprep.subr.bf16.mxu0 %v5048_v31  ;;  %v992_v31 = vld [vmem:[#allocation5 + $0x1aa0] sm:$0xff] }
 0x1f1   :  { %5079 = vmatpush3.bf16.msra.mxu1 %v5078_v30  ;;  %v3582_v48 = vpop.f32.mrb[10].mxu0  ;;  %v1007_v30 = vld [vmem:[#allocation5 + $0x1b18] sm:$0xff]  ;;  %v5100_v38 = vpack.c.bf16 %v993_v32, %v992_v31  ;;  %v1002_v31 = vld [vmem:[#allocation5 + $0x1af0] sm:$0xff] }
 0x1f2   :  { %5081 = vmatprep.subr.bf16.mxu1 %v5080_v34  ;;  %v3583_v53 = vpop.f32.mrb[11].mxu0  ;;  %v136_v34 = vld [vmem:[#allocation2 + $0x1a8] sm:$0xff]  ;;  %v5130_v37 = vpack.c.bf16 %v1007_v30, %v1006_v28  ;;  %v1017_v30 = vld [vmem:[#allocation5 + $0x1b68] sm:$0xff]  ;;  %v1003_v32 = vld [vmem:[#allocation5 + $0x1af8] sm:$0xff] }
 0x1f3   :  { %v3617_v2 = vpop.f32.mrb[10].mxu1  ;;  %v3584_v56 = vadd.f32 %v3583_v53, %v3582_v48  ;;  %5051 = vmatpush3.bf16.msra.mxu0 %v5050_v41  ;;  %v977_v41 = vld [vmem:[#allocation5 + $0x1a28] sm:$0xff]  ;;  %v1026_v48 = vld [vmem:[#allocation5 + $0x1bb0] sm:$0xff] }
 0x1f4   :  { %v3618_v57 = vpop.f32.mrb[11].mxu1  ;;  %5053 = vmatprep.subr.bf16.mxu0 %v5052_v43  ;;  %v5132_v43 = vpack.c.bf16 %v1025_v47, %v1024_v33  ;;  %v5102_v50 = vpack.c.bf16 %v977_v41, %v976_v39  ;;  %v978_v53 = vld [vmem:[#allocation5 + $0x1a30] sm:$0xff]  ;;  %v5150_v41 = vpack.c.bf16 %v1017_v30, %v1016_v27  ;;  %v3090_v27 = vld [vmem:[#allocation8 + $0x20] sm:$0xff] }
 0x1f5   :  { %v3619_v59 = vadd.f32 %v3618_v57, %v3617_v2  ;;  %5083 = vmatpush3.bf16.msra.mxu1 %v5082_v42  ;;  %v1822_v1 = vadd.f32 %v3584_v56, %v5456_v40  ;;  %v5124_v40 = vpack.c.bf16 %v1021_v8, %v1020_v7  ;;  %v1008_v42 = vld [vmem:[#allocation5 + $0x1b20] sm:$0xff]  ;;  %v979_v2 = vld [vmem:[#allocation5 + $0x1a38] sm:$0xff]  ;;  %v1030_v8 = vld [vmem:[#allocation5 + $0x1bd0] sm:$0xff] }
 0x1f6   :  { %5085 = vmatprep.subr.bf16.mxu1 %v5084_v49  ;;  %v1027_v49 = vld [vmem:[#allocation5 + $0x1bb8] sm:$0xff]  ;;  %v5134_v51 = vpack.c.bf16 %v1009_v44, %v1008_v42  ;;  %v996_v57 = vld [vmem:[#allocation5 + $0x1ac0] sm:$0xff]  ;;  %v5120_v42 = vpack.c.bf16 %v1003_v32, %v1002_v31 }
 0x1f7   :  { %v5459_v21 = vadd.f32 %v3619_v59, %v1822_v1  ;;  %5055 = vmatpush3.bf16.msra.mxu0 %v5054_v58  ;;  %v5136_v55 = vpack.c.bf16 %v1027_v49, %v1026_v48  ;;  %v1011_v56 = vld [vmem:[#allocation5 + $0x1b38] sm:$0xff]  ;;  %v997_v58 = vld [vmem:[#allocation5 + $0x1ac8] sm:$0xff]  ;;  %v1028_v59 = vld [vmem:[#allocation5 + $0x1bc0] sm:$0xff] }
 0x1f8   :  { %5057 = vmatprep.subr.bf16.mxu0 %v5056_v61  ;;  %v5106_v61 = vpack.c.bf16 %v979_v2, %v978_v53  ;;  %v5138_v62 = vpack.c.bf16 %v1011_v56, %v1010_v54  ;;  %v5108_v63 = vpack.c.bf16 %v997_v58, %v996_v57  ;;  %v981_v1 = vld [vmem:[#allocation5 + $0x1a48] sm:$0xff]  ;;  %v999_v7 = vld [vmem:[#allocation5 + $0x1ad8] sm:$0xff]  ;;  %v1018_v48 = vld [vmem:[#allocation5 + $0x1b70] sm:$0xff]  ;;  %v5350_v56 = vmov 0.0|0.0  }
 0x1f9   :  { %5087 = vmatpush3.bf16.msra.mxu1 %v5086_v60  ;;  %v1029_v60 = vld [vmem:[#allocation5 + $0x1bc8] sm:$0xff]  ;;  %v5112_v12 = vpack.c.bf16 %v999_v7, %v998_v6  ;;  %v987_v44 = vld [vmem:[#allocation5 + $0x1a78] sm:$0xff]  ;;  %v1036_v53 = vld [vmem:[#allocation5 + $0x1c00] sm:$0xff] }
 0x1fa   :  { %5089 = vmatprep.subr.bf16.mxu1 %v5088_v3  ;;  %v1012_v3 = vld [vmem:[#allocation5 + $0x1b40] sm:$0xff]  ;;  %v5140_v4 = vpack.c.bf16 %v1029_v60, %v1028_v59  ;;  %v1019_v49 = vld [vmem:[#allocation5 + $0x1b78] sm:$0xff]  ;;  %v1037_v2 = vld [vmem:[#allocation5 + $0x1c08] sm:$0xff] }
 0x1fb   :  { %5059 = vmatpush3.bf16.msra.mxu0 %v5058_v9  ;;  %v1031_v9 = vld [vmem:[#allocation5 + $0x1bd8] sm:$0xff]  ;;  %v1038_v57 = vld [vmem:[#allocation5 + $0x1c10] sm:$0xff]  ;;  %v1040_v60 = vld [vmem:[#allocation5 + $0x1c20] sm:$0xff] }
 0x1fc   :  { %5093 = vmatprep.subr.bf16.mxu0 %v5092_v11  ;;  %v5142_v11 = vpack.c.bf16 %v1013_v5, %v1012_v3  ;;  %v5144_v15 = vpack.c.bf16 %v1031_v9, %v1030_v8  ;;  %v135_v54 = vld [vmem:[#allocation2 + $0x1a0] sm:$0xff] }
 0x1fd   :  { %5091 = vmatpush3.bf16.msra.mxu1 %v5090_v10  ;;  %v5110_v10 = vpack.c.bf16 %v981_v1, %v980_v0  ;;  %v1039_v58 = vld [vmem:[#allocation5 + $0x1c18] sm:$0xff]  ;;  %v1042_v0 = vld [vmem:[#allocation5 + $0x1c30] sm:$0xff] }
 0x1fe   :  { %5125 = vmatprep.subr.bf16.mxu1 %v5124_v40  ;;  %2800 = vmatmul.mubr.f32.vlgmr.msra.gmra.mrb[24].mxu0 %v131_v20  ;;  %v1014_v40 = vld [vmem:[#allocation5 + $0x1b50] sm:$0xff]  ;;  %v1033_v20 = vld [vmem:[#allocation5 + $0x1be8] sm:$0xff]  ;;  %v5160_v59 = vpack.c.bf16 %v1039_v58, %v1038_v57  ;;  %v1043_v1 = vld [vmem:[#allocation5 + $0x1c38] sm:$0xff] }
 0x1ff   :  { %5095 = vmatpush3.bf16.msra.mxu0 %v5094_v22  ;;  %2939 = vmatprep.mubr.f32.mxu0 %v136_v34  ;;  %v5114_v22 = vpack.c.bf16 %v983_v14, %v982_v13  ;;  %v1034_v34 = vld [vmem:[#allocation5 + $0x1bf0] sm:$0xff]  ;;  %v5166_v3 = vpack.c.bf16 %v1043_v1, %v1042_v0  ;;  %v3093_v31 = vld [vmem:[#allocation8 + $0x38] sm:$0xff] }
 0x200   :  { %2870 = vmatmul.mubr.f32.vlgmr.msra.gmra.mrb[24].mxu1 %v133_v23  ;;  %5097 = vmatprep.subr.bf16.mxu0 %v5096_v25  ;;  %v5146_v23 = vpack.c.bf16 %v1015_v16, %v1014_v40  ;;  %v984_v25 = vld [vmem:[#allocation5 + $0x1a60] sm:$0xff]  ;;  %v3092_v30 = vld [vmem:[#allocation8 + $0x30] sm:$0xff] }
 0x201   :  { %5127 = vmatpush3.bf16.msra.mxu1 %v5126_v24  ;;  %3009 = vmatprep.mubr.f32.mxu1 %v138_v36  ;;  %v5116_v24 = vpack.c.bf16 %v1001_v18, %v1000_v17 }
 0x202   :  { %5129 = vmatprep.subr.bf16.mxu1 %v5128_v29  ;;  %v5148_v29 = vpack.c.bf16 %v1033_v20, %v1032_v19  ;;  %v3086_v20 = vld [vmem:[#allocation8] sm:$0xff] }
 0x203   :  { %5099 = vmatpush3.bf16.msra.mxu0 %v5098_v35  ;;  %v1035_v35 = vld [vmem:[#allocation5 + $0x1bf8] sm:$0xff] }
 0x204   :  { %5101 = vmatprep.subr.bf16.mxu0 %v5100_v38  ;;  %v5118_v38 = vpack.c.bf16 %v985_v26, %v984_v25  ;;  %v5152_v46 = vpack.c.bf16 %v1035_v35, %v1034_v34  ;;  %v3089_v25 = vld [vmem:[#allocation8 + $0x18] sm:$0xff] }
 0x205   :  { %5131 = vmatpush3.bf16.msra.mxu1 %v5130_v37 }
 0x206   :  { %5133 = vmatprep.subr.bf16.mxu1 %v5132_v43  ;;  %v986_v43 = vld [vmem:[#allocation5 + $0x1a70] sm:$0xff] }
 0x207   :  { %5103 = vmatpush3.bf16.msra.mxu0 %v5102_v50 }
 0x208   :  { %5105 = vmatprep.subr.bf16.mxu0 %v5104_v52  ;;  %v5154_v52 = vpack.c.bf16 %v1019_v49, %v1018_v48  ;;  %v3098_v48 = vld [vmem:[#allocation8 + $0x60] sm:$0xff]  ;;  %v3099_v49 = vld [vmem:[#allocation8 + $0x68] sm:$0xff] }
 0x209   :  { %5135 = vmatpush3.bf16.msra.mxu1 %v5134_v51  ;;  %v5122_v51 = vpack.c.bf16 %v987_v44, %v986_v43  ;;  %v3096_v43 = vld [vmem:[#allocation8 + $0x50] sm:$0xff]  ;;  %v3097_v44 = vld [vmem:[#allocation8 + $0x58] sm:$0xff] }
 0x20a   :  { %5137 = vmatprep.subr.bf16.mxu1 %v5136_v55  ;;  %v5157_v55 = vpack.c.bf16 %v1037_v2, %v1036_v53 }
 0x20b   :  { %5107 = vmatpush3.bf16.msra.mxu0 %v5106_v61  ;;  %v1041_v61 = vld [vmem:[#allocation5 + $0x1c28] sm:$0xff] }
 0x20c   :  { %5109 = vmatprep.subr.bf16.mxu0 %v5108_v63  ;;  %v5163_v63 = vpack.c.bf16 %v1041_v61, %v1040_v60 }
 0x20d   :  { %5139 = vmatpush3.bf16.msra.mxu1 %v5138_v62  ;;  %v5352_v62 = vmov 0.0  }
 0x20e   :  { %5141 = vmatprep.subr.bf16.mxu1 %v5140_v4  ;;  %v139_v4 = vld [vmem:[#allocation2 + $0x1c0] sm:$0xff] }
 0x20f   :  { %5111 = vmatpush3.bf16.msra.mxu0 %v5110_v10 }
 0x210   :  { %5113 = vmatprep.subr.bf16.mxu0 %v5112_v12 }
 0x211   :  { %5143 = vmatpush3.bf16.msra.mxu1 %v5142_v11  ;;  %v3652_v28 = vpop.f32.mrb[12].mxu0 }
 0x212   :  { %5145 = vmatprep.subr.bf16.mxu1 %v5144_v15  ;;  %v3653_v33 = vpop.f32.mrb[13].mxu0 }
 0x213   :  { %v3687_v47 = vpop.f32.mrb[12].mxu1  ;;  %v3654_v36 = vadd.f32 %v3653_v33, %v3652_v28  ;;  %5115 = vmatpush3.bf16.msra.mxu0 %v5114_v22  ;;  %v3087_v22 = vld [vmem:[#allocation8 + $0x8] sm:$0xff]  ;;  %v5178_v33 = vpack.c.bf16 %v3093_v31, %v3092_v30 }
 0x214   :  { %v3688_v37 = vpop.f32.mrb[13].mxu1  ;;  %5117 = vmatprep.subr.bf16.mxu0 %v5116_v24  ;;  %v5169_v24 = vpack.c.bf16 %v3087_v22, %v3086_v20  ;;  %v3091_v28 = vld [vmem:[#allocation8 + $0x28] sm:$0xff] }
 0x215   :  { %v3689_v39 = vadd.f32 %v3688_v37, %v3687_v47  ;;  %5147 = vmatpush3.bf16.msra.mxu1 %v5146_v23  ;;  %v1962_v45 = vadd.f32 %v3654_v36, %v5459_v21  ;;  %v137_v21 = vld [vmem:[#allocation2 + $0x1b0] sm:$0xff]  ;;  %v3088_v23 = vld [vmem:[#allocation8 + $0x10] sm:$0xff] }
 0x216   :  { %5149 = vmatprep.subr.bf16.mxu1 %v5148_v29  ;;  %v5172_v26 = vpack.c.bf16 %v3089_v25, %v3088_v23  ;;  %v5175_v29 = vpack.c.bf16 %v3091_v28, %v3090_v27  ;;  %v3199_v25 = vld [vmem:[#allocation10] ss:$0 sm:$0xff] }
 0x217   :  { %v2032_v50 = vadd.f32 %v3689_v39, %v1962_v45  ;;  %5119 = vmatpush3.bf16.msra.mxu0 %v5118_v38  ;;  %v3094_v38 = vld [vmem:[#allocation8 + $0x40] sm:$0xff]  ;;  %v3095_v39 = vld [vmem:[#allocation8 + $0x48] sm:$0xff] }
 0x218   :  { %5121 = vmatprep.subr.bf16.mxu0 %v5120_v42  ;;  %v5181_v42 = vpack.c.bf16 %v3095_v39, %v3094_v38 }
 0x219   :  { %5151 = vmatpush3.bf16.msra.mxu1 %v5150_v41 }
 0x21a   :  { %5153 = vmatprep.subr.bf16.mxu1 %v5152_v46  ;;  %v5184_v46 = vpack.c.bf16 %v3097_v44, %v3096_v43 }
 0x21b   :  { %5123 = vmatpush3.bf16.msra.mxu0 %v5122_v51  ;;  %v3100_v51 = vld [vmem:[#allocation8 + $0x70] sm:$0xff] }
 0x21c   :  { %5156 = vmatprep.subr.bf16.mxu0 %v5350_v56 }
 0x21d   :  { %5155 = vmatpush3.bf16.msra.mxu1 %v5154_v52  ;;  %v3101_v52 = vld [vmem:[#allocation8 + $0x78] sm:$0xff] }
 0x21e   :  { %5168 = vmatprep.subr.bf16.mxu1 %v5350_v56  ;;  %2940 = vmatmul.mubr.f32.vlgmr.msra.gmra.mrb[26].mxu0 %v135_v54  ;;  %v5190_v53 = vpack.c.bf16 %v3101_v52, %v3100_v51 }
 0x21f   :  { %5158 = vmatpush3.bf16.msra.mxu0 %v5157_v55  ;;  %4222 = vmatprep.mubr.msk.f32.mxu0 %vm5351_vm0, %v5352_v62 }
 0x220   :  { %3010 = vmatmul.mubr.f32.vlgmr.msra.gmra.mrb[26].mxu1 %v137_v21  ;;  %5159 = vmatprep.subr.bf16.mxu0 %v5350_v56 }
 0x221   :  { %4257 = vmatprep.mubr.msk.f32.mxu1 %vm5351_vm0, %v5352_v62  ;;  %5170 = vmatpush3.bf16.msra.mxu1 %v5169_v24 }
 0x222   :  { %5171 = vmatprep.subr.bf16.mxu1 %v5350_v56 }
 0x223   :  { %5161 = vmatpush3.bf16.msra.mxu0 %v5160_v59 }
 0x224   :  { %5162 = vmatprep.subr.bf16.mxu0 %v5350_v56 }
 0x225   :  { %5173 = vmatpush3.bf16.msra.mxu1 %v5172_v26 }
 0x226   :  { %5174 = vmatprep.subr.bf16.mxu1 %v5350_v56 }
 0x227   :  { %5164 = vmatpush3.bf16.msra.mxu0 %v5163_v63 }
 0x228   :  { %5165 = vmatprep.subr.bf16.mxu0 %v5350_v56 }
 0x229   :  { %5176 = vmatpush3.bf16.msra.mxu1 %v5175_v29 }
 0x22a   :  { %5177 = vmatprep.subr.bf16.mxu1 %v5350_v56 }
 0x22b   :  { %5167 = vmatpush3.bf16.msra.mxu0 %v5166_v3 }
 0x22d   :  { %5179 = vmatpush3.bf16.msra.mxu1 %v5178_v33 }
 0x22e   :  { %4223 = vmatmul.mubr.msk.f32.vlgmr.msra.gmra.mrb[28].mxu0 %vm1051_vm1, %v139_v4  ;;  %5180 = vmatprep.subr.bf16.mxu1 %v5350_v56 }
 0x231   :  { %v3722_v5 = vpop.f32.mrb[14].mxu0  ;;  %5182 = vmatpush3.bf16.msra.mxu1 %v5181_v42 }
 0x232   :  { %v3723_v6 = vpop.f32.mrb[15].mxu0  ;;  %5183 = vmatprep.subr.bf16.mxu1 %v5350_v56 }
 0x233   :  { %v3757_v7 = vpop.f32.mrb[14].mxu1  ;;  %v3724_v8 = vadd.f32 %v3723_v6, %v3722_v5 }
 0x234   :  { %v3758_v9 = vpop.f32.mrb[15].mxu1 }
 0x235   :  { %v3759_v10 = vadd.f32 %v3758_v9, %v3757_v7  ;;  %v2102_v11 = vadd.f32 %v3724_v8, %v2032_v50  ;;  %5185 = vmatpush3.bf16.msra.mxu1 %v5184_v46  ;;  %v5187_v50 = vpack.c.bf16 %v3099_v49, %v3098_v48 }
 0x236   :  { %5186 = vmatprep.subr.bf16.mxu1 %v5350_v56 }
 0x237   :  { %v2172_v12 = vadd.f32 %v3759_v10, %v2102_v11 }
 0x239   :  { %5188 = vmatpush3.bf16.msra.mxu1 %v5187_v50 }
 0x23a   :  { %5189 = vmatprep.subr.bf16.mxu1 %v5350_v56 }
 0x23d   :  { %5191 = vmatpush3.bf16.msra.mxu1 %v5190_v53 }
 0x251   :  { %v3792_v13 = vpop.f32.mrb[16].mxu0 }
 0x252   :  { %v3793_v14 = vpop.f32.mrb[17].mxu0 }
 0x253   :  { %v3827_v40 = vpop.f32.mrb[16].mxu1  ;;  %v3794_v15 = vadd.f32 %v3793_v14, %v3792_v13 }
 0x254   :  { %v3828_v16 = vpop.f32.mrb[17].mxu1 }
 0x255   :  { %v3829_v17 = vadd.f32 %v3828_v16, %v3827_v40  ;;  %v2242_v18 = vadd.f32 %v3794_v15, %v2172_v12 }
 0x257   :  { %v2312_v19 = vadd.f32 %v3829_v17, %v2242_v18 }
 0x271   :  { %v3862_v32 = vpop.f32.mrb[18].mxu0 }
 0x272   :  { %v3863_v47 = vpop.f32.mrb[19].mxu0 }
 0x273   :  { %v3897_v34 = vpop.f32.mrb[18].mxu1  ;;  %v3864_v35 = vadd.f32 %v3863_v47, %v3862_v32 }
 0x274   :  { %v3898_v36 = vpop.f32.mrb[19].mxu1 }
 0x275   :  { %v3899_v37 = vadd.f32 %v3898_v36, %v3897_v34  ;;  %v2382_v41 = vadd.f32 %v3864_v35, %v2312_v19 }
 0x277   :  { %v2452_v45 = vadd.f32 %v3899_v37, %v2382_v41 }
 0x291   :  { %v3932_v2 = vpop.f32.mrb[20].mxu0 }
 0x292   :  { %v3933_v54 = vpop.f32.mrb[21].mxu0 }
 0x293   :  { %v3967_v55 = vpop.f32.mrb[20].mxu1  ;;  %v3934_v21 = vadd.f32 %v3933_v54, %v3932_v2 }
 0x294   :  { %v3968_v57 = vpop.f32.mrb[21].mxu1 }
 0x295   :  { %v3969_v58 = vadd.f32 %v3968_v57, %v3967_v55  ;;  %v2522_v59 = vadd.f32 %v3934_v21, %v2452_v45 }
 0x297   :  { %v2592_v60 = vadd.f32 %v3969_v58, %v2522_v59 }
 0x2b1   :  { %v4002_v61 = vpop.f32.mrb[22].mxu0 }
 0x2b2   :  { %v4003_v62 = vpop.f32.mrb[23].mxu0 }
 0x2b3   :  { %v4037_v63 = vpop.f32.mrb[22].mxu1  ;;  %v4004_v0 = vadd.f32 %v4003_v62, %v4002_v61 }
 0x2b4   :  { %v4038_v1 = vpop.f32.mrb[23].mxu1 }
 0x2b5   :  { %v4039_v3 = vadd.f32 %v4038_v1, %v4037_v63  ;;  %v2662_v4 = vadd.f32 %v4004_v0, %v2592_v60 }
 0x2b7   :  { %v2732_v56 = vadd.f32 %v4039_v3, %v2662_v4 }
 0x2d1   :  { %v4072_v5 = vpop.f32.mrb[24].mxu0 }
 0x2d2   :  { %v4073_v6 = vpop.f32.mrb[25].mxu0 }
 0x2d3   :  { %v4107_v7 = vpop.f32.mrb[24].mxu1  ;;  %v4074_v8 = vadd.f32 %v4073_v6, %v4072_v5 }
 0x2d4   :  { %v4108_v9 = vpop.f32.mrb[25].mxu1 }
 0x2d5   :  { %v4109_v10 = vadd.f32 %v4108_v9, %v4107_v7  ;;  %v2802_v11 = vadd.f32 %v4074_v8, %v2732_v56 }
 0x2d7   :  { %v2872_v12 = vadd.f32 %v4109_v10, %v2802_v11 }
 0x2f1   :  { %v4142_v13 = vpop.f32.mrb[26].mxu0 }
 0x2f2   :  { %v4143_v14 = vpop.f32.mrb[27].mxu0 }
 0x2f3   :  { %v4177_v40 = vpop.f32.mrb[26].mxu1  ;;  %v4144_v15 = vadd.f32 %v4143_v14, %v4142_v13 }
 0x2f4   :  { %v4178_v16 = vpop.f32.mrb[27].mxu1 }
 0x2f5   :  { %v4179_v17 = vadd.f32 %v4178_v16, %v4177_v40  ;;  %v2942_v18 = vadd.f32 %v4144_v15, %v2872_v12 }
 0x2f7   :  { %v3012_v19 = vadd.f32 %v4179_v17, %v2942_v18 }
 0x301   :  { %v3081_v20 = vpop.f32.mrb[28].mxu0 }
 0x302   :  { %v3082_v22 = vadd.f32 %v3081_v20, %v3012_v19  ;;  %v4224_v23 = vpop.f32.mrb[29].mxu0 }
 0x304   :  { %v3085_v24 = vmax.f32 %v3082_v22, 0.0 }
 0x306   :  { %4258 = vmatmul.mubr.f32.vlgmr.msra.gmra.mrb[28].mxu1 %v3085_v24 }
 0x3d9   :  { %v3175_v26 = vpop.f32.mrb[28].mxu1 }
 0x3da   :  { %v3176_v27 = vadd.f32 %v3199_v25, %v3175_v26  ;;  %v4259_v28 = vpop.f32.mrb[29].mxu1 }
 0x3dc   :  { %3179 = vst [vmem:[#allocation11] sm:$0xff] %v3176_v27 }
 0x3dd   :  { %5324 = shalt.err (!%p5321_p2)
}
 0x3de   :  { %s5325_s30 = scalar_lea.hbm %s5491_s5, 128 }
 0x3df   :  { %p5326_p3 = scmp.ne.s32.totalorder %s5491_s5, %s5325_s30  ;;  %p5329_p4 = scmp.lt.u32.totalorder %s5325_s30, %s5491_s5 }
 0x3e1   :  { %p5331_p5 = pnand %p5329_p4, %p5326_p3 }
 0x3e3   :  { %5334 = shalt.err (!%p5331_p5)
}
 0x3e4   :  { %3189 = dma.vmem_to_hbm [thread:$0]  %s3187_s27, 128, %s5491_s5, [#allocation4]  }
 0x3e5   :  { %5341 = dma.done.wait [#allocation4], 128  }
 0x3e6   :  { %5342 = vsyncadd [#allocation4], 4294967168 }
 0x3e7   :  { %3193 = vsyncpa [#allocation3], 1 }
 0x3e8   :  { %3194 = vsyncpa [#allocation6], 1 }
 0x3e9   :  { %3195 = vsyncpa [#allocation9], 1 }
 0x3ea   :  { %3196 = vsyncpa [#allocation4], 1 }

</bundles_post_ra>
